<compile_context>
chip_gen: v6e
topology: v6e:2x2x1
jax: 0.10.0
libtpu: 0.0.40
codegen_flags: <defaults>
</compile_context>

<pallas_src>
import jax
import jax.numpy as jnp
from jax import lax
from jax.experimental import pallas as pl
from jax.experimental.pallas import tpu as pltpu


def _round_up(x, m):
    return (x + m - 1) // m * m


def _lstm_critic_kernel(x_ref, lens_ref,
                        wih1_ref, whh1_ref, b1_ref,
                        w2_ref, b2_ref,
                        wfc_ref, bfc_ref,
                        out_ref,
                        gx1_ref, h1_ref, c1_ref, h2_ref, c2_ref, last_ref):
    """One (batch-chunk, time-tile) grid step of the fused LSTM critic.

    x_ref    : (Tt*Bt, D)  f32  time tile, rows ordered (t, b) within the chunk
    lens_ref : (Bt, 1)     i32  clamped sequence lengths for this batch chunk
    wih1_ref : (D,   4Hp)  f32  layer-1 input weights (gate-padded)
    whh1_ref : (Hp,  4Hp)  f32  layer-1 recurrent weights
    b1_ref   : (1,   4Hp)  f32  layer-1 bias (b_ih + b_hh)
    w2_ref   : (2Hp, 4Hp)  f32  fused [W_ih2 ; W_hh2]
    b2_ref   : (1,   4Hp)  f32  layer-2 bias
    wfc_ref  : (Hp,  O)    f32  FC weight
    bfc_ref  : (1,   O)    f32  FC bias
    out_ref  : (Bt,  O)    f32
    State scratch (h1,c1,h2,c2,last): (Bt, Hp) f32, carried across time tiles.
    """
    TB, _ = x_ref.shape
    Bt, Hp = h1_ref.shape
    Tt = TB // Bt
    t_idx = pl.program_id(1)
    n_t = pl.num_programs(1)

    # ---- init state at the first time tile of each batch chunk.
    @pl.when(t_idx == 0)
    def _init():
        z = jnp.zeros((Bt, Hp), jnp.float32)
        h1_ref[...] = z
        c1_ref[...] = z
        h2_ref[...] = z
        c2_ref[...] = z
        last_ref[...] = z

    # ---- hoisted layer-1 input projection (+ bias) for the whole time tile:
    # one well-shaped MXU matmul instead of Tt tiny (Bt x D) ones.
    gx1_ref[...] = (jnp.dot(x_ref[...], wih1_ref[...],
                            preferred_element_type=jnp.float32)
                    + b1_ref[...])

    # Hoisted loads (kept off the serial recurrence path).
    whh1 = whh1_ref[...]               # (Hp, 4Hp)
    w2 = w2_ref[...]                   # (2Hp, 4Hp)
    b2 = b2_ref[...]                   # (1, 4Hp)
    lens_m1 = lens_ref[...] - 1        # (Bt, 1) i32
    t0 = t_idx * Tt

    def gates(g):
        # Hp is a multiple of 128 -> lane-aligned static slices.
        i = jax.nn.sigmoid(g[:, 0 * Hp:1 * Hp])
        f = jax.nn.sigmoid(g[:, 1 * Hp:2 * Hp])
        c_in = jnp.tanh(g[:, 2 * Hp:3 * Hp])
        o = jax.nn.sigmoid(g[:, 3 * Hp:4 * Hp])
        return i, f, c_in, o

    def step(s, carry):
        h1, c1, h2, c2, last = carry
        # Layer 1: only the recurrent matmul is serial; input term is precomputed.
        off = pl.multiple_of(s * Bt, Bt)
        g1 = gx1_ref[pl.ds(off, Bt), :] + jnp.dot(
            h1, whh1, preferred_element_type=jnp.float32)
        i1, f1, ci1, o1 = gates(g1)
        c1 = f1 * c1 + i1 * ci1
        h1 = o1 * jnp.tanh(c1)
        # Layer 2: single fused matmul [h1 | h2] @ [W_ih2 ; W_hh2].
        g2 = jnp.dot(jnp.concatenate([h1, h2], axis=1), w2,
                     preferred_element_type=jnp.float32) + b2
        i2, f2, ci2, o2 = gates(g2)
        c2 = f2 * c2 + i2 * ci2
        h2 = o2 * jnp.tanh(c2)
        # torch gather output[i, lens[i]-1, :] as a running masked select.
        last = jnp.where(lens_m1 == t0 + s, h2, last)
        return h1, c1, h2, c2, last

    carry = (h1_ref[...], c1_ref[...], h2_ref[...], c2_ref[...], last_ref[...])
    h1, c1, h2, c2, last = lax.fori_loop(0, Tt, step, carry, unroll=True)
    h1_ref[...] = h1
    c1_ref[...] = c1
    h2_ref[...] = h2
    c2_ref[...] = c2
    last_ref[...] = last

    # ---- final FC at the last time tile of each batch chunk.
    @pl.when(t_idx == n_t - 1)
    def _fc():
        out_ref[...] = (jnp.dot(last, wfc_ref[...],
                                preferred_element_type=jnp.float32)
                        + bfc_ref[...])


def _prepare_kernel_params(params, hidden, hp):
    """Pad H -> Hp per gate (lane alignment) and fuse layer-2 weights.

    Padded gate columns / hidden rows are zero, so the padded h/c lanes stay
    exactly zero through the recurrence and the FC ignores them.
    """
    wih1, whh1, b1, wih2, whh2, b2, wfc, bfc = params

    def pad_gate_cols(w):
        parts = [jnp.pad(w[:, k * hidden:(k + 1) * hidden],
                         ((0, 0), (0, hp - hidden))) for k in range(4)]
        return jnp.concatenate(parts, axis=1)

    def pad_rows(w):
        return jnp.pad(w, ((0, hp - hidden), (0, 0)))

    wih1_p = pad_gate_cols(wih1)                                     # (D,   4Hp)
    whh1_p = pad_rows(pad_gate_cols(whh1))                           # (Hp,  4Hp)
    b1_p = pad_gate_cols(b1)                                         # (1,   4Hp)
    w2_p = jnp.concatenate([pad_rows(pad_gate_cols(wih2)),
                            pad_rows(pad_gate_cols(whh2))], axis=0)  # (2Hp, 4Hp)
    b2_p = pad_gate_cols(b2)                                         # (1,   4Hp)
    wfc_p = pad_rows(wfc)                                            # (Hp,  O)
    return wih1_p, whh1_p, b1_p, w2_p, b2_p, wfc_p, bfc


def lstm_critic_forward(x, lens, vector, params, *, t_tile=None, b_tile=8):
    """Wrapper mirroring LSTM_Critic.forward (batch_first inputs)."""
    B, T, _ = x.shape
    hidden = params[1].shape[0]             # whh1: (H, 4H)
    out_dim = params[6].shape[1]            # wfc:  (H, O)
    hp = _round_up(hidden, 128)             # lane-aligned hidden
    bp = _round_up(B, b_tile)               # sublane-aligned batch
    if t_tile is None:
        t_tile = T if T <= 8 else 8
    tp = _round_up(T, t_tile)
    n_b = bp // b_tile
    n_t = tp // t_tile

    # Glue: concat conditioning vector over time (== torch.cat(..., dim=2)),
    # go time-major, pad B/T to tile granularity, and lay x out per batch
    # chunk as (n_b, T*b_tile, D) so the kernel gets a flat (Tt*Bt, D) tile.
    emb = vector.shape[-1]
    x_cat = jnp.concatenate(
        [x, jnp.broadcast_to(vector[:, None, :], (B, T, emb))], axis=2)
    x_tbd = jnp.transpose(x_cat, (1, 0, 2)).astype(jnp.float32)      # (T, B, D)
    d = x_tbd.shape[-1]
    x_tbd = jnp.pad(x_tbd, ((0, tp - T), (0, bp - B), (0, 0)))       # (tp, bp, D)
    x3 = (x_tbd.reshape(tp, n_b, b_tile, d)
               .transpose(1, 0, 2, 3)
               .reshape(n_b, tp * b_tile, d))                        # (n_b, tp*Bt, D)

    # Contract: clamp lens into [1, T]; padded batch rows get lens=1.
    lens2d = jnp.clip(lens.astype(jnp.int32), 1, T).reshape(B, 1)
    lens2d = jnp.pad(lens2d, ((0, bp - B), (0, 0)), constant_values=1)

    wih1, whh1, b1, w2, b2, wfc, bfc = _prepare_kernel_params(params, hidden, hp)

    whole = lambda b, t: (0, 0)
    out = pl.pallas_call(
        _lstm_critic_kernel,
        out_shape=jax.ShapeDtypeStruct((bp, out_dim), jnp.float32),
        grid_spec=pltpu.PrefetchScalarGridSpec(
            num_scalar_prefetch=0,
            grid=(n_b, n_t),
            in_specs=[
                pl.BlockSpec((None, t_tile * b_tile, d), lambda b, t: (b, t, 0)),
                pl.BlockSpec((b_tile, 1), lambda b, t: (b, 0)),
                pl.BlockSpec(wih1.shape, whole),
                pl.BlockSpec(whh1.shape, whole),
                pl.BlockSpec(b1.shape, whole),
                pl.BlockSpec(w2.shape, whole),
                pl.BlockSpec(b2.shape, whole),
                pl.BlockSpec(wfc.shape, whole),
                pl.BlockSpec(bfc.shape, whole),
            ],
            out_specs=pl.BlockSpec((b_tile, out_dim), lambda b, t: (b, 0)),
            scratch_shapes=[
                pltpu.VMEM((t_tile * b_tile, 4 * hp), jnp.float32),  # gx1
                pltpu.VMEM((b_tile, hp), jnp.float32),               # h1
                pltpu.VMEM((b_tile, hp), jnp.float32),               # c1
                pltpu.VMEM((b_tile, hp), jnp.float32),               # h2
                pltpu.VMEM((b_tile, hp), jnp.float32),               # c2
                pltpu.VMEM((b_tile, hp), jnp.float32),               # last
            ],
        ),
        compiler_params=pltpu.CompilerParams(
            dimension_semantics=("parallel", "arbitrary")),
    )(x3, lens2d, wih1, whh1, b1, w2, b2, wfc, bfc)
    return out[:B]


def make_params(key, input_dim, hidden, out_dim):
    """Deterministic synthetic params, PyTorch-style U(-1/sqrt(H), 1/sqrt(H)).

    Stored pre-transposed (unpadded): W_ih (D_in, 4H), W_hh (H, 4H),
    biases summed into (1, 4H), W_fc (H, O), b_fc (1, O). Gate order i,f,g,o.
    """
    ks = jax.random.split(key, 10)
    s = 1.0 / jnp.sqrt(hidden)

    def u(k, shape):
        return jax.random.uniform(k, shape, jnp.float32, -s, s)

    wih1 = u(ks[0], (input_dim, 4 * hidden))
    whh1 = u(ks[1], (hidden, 4 * hidden))
    b1 = u(ks[2], (1, 4 * hidden)) + u(ks[3], (1, 4 * hidden))   # b_ih + b_hh
    wih2 = u(ks[4], (hidden, 4 * hidden))
    whh2 = u(ks[5], (hidden, 4 * hidden))
    b2 = u(ks[6], (1, 4 * hidden)) + u(ks[7], (1, 4 * hidden))
    wfc = u(ks[8], (hidden, out_dim))
    bfc = u(ks[9], (1, out_dim))
    return (wih1, whh1, b1, wih2, whh2, b2, wfc, bfc)


def lstm_critic_reference(x, lens, vector, params):
    """Pure-JAX reference with identical math (for correctness check)."""
    (wih1, whh1, b1, wih2, whh2, b2, wfc, bfc) = params
    B, T, _ = x.shape
    H = whh1.shape[0]
    x_cat = jnp.concatenate(
        [x, jnp.broadcast_to(vector[:, None, :], (B, T, vector.shape[-1]))],
        axis=2).astype(jnp.float32)

    def cell(x_t, h, c, wih, whh, b):
        g = x_t @ wih + h @ whh + b
        i = jax.nn.sigmoid(g[:, 0 * H:1 * H])
        f = jax.nn.sigmoid(g[:, 1 * H:2 * H])
        gg = jnp.tanh(g[:, 2 * H:3 * H])
        o = jax.nn.sigmoid(g[:, 3 * H:4 * H])
        c = f * c + i * gg
        return o * jnp.tanh(c), c

    def scan_fn(carry, x_t):
        h1, c1, h2, c2 = carry
        h1, c1 = cell(x_t, h1, c1, wih1, whh1, b1)
        h2, c2 = cell(h1, h2, c2, wih2, whh2, b2)
        return (h1, c1, h2, c2), h2

    z = jnp.zeros((B, H), jnp.float32)
    _, out_seq = lax.scan(scan_fn, (z, z, z, z),
                          jnp.transpose(x_cat, (1, 0, 2)))   # (T, B, H)
    out_seq = jnp.transpose(out_seq, (1, 0, 2))              # (B, T, H)
    last = out_seq[jnp.arange(B), jnp.clip(lens.astype(jnp.int32), 1, T) - 1, :]
    return last @ wfc + bfc


if __name__ == "__main__":
    # Small shapes consistent with the module (scaled down from the defaults
    # input_size=30, embed_size=300, hidden=200).
    B, T = 4, 8
    INPUT_SIZE, EMBED_SIZE, HIDDEN, OUT = 6, 26, 32, 1

    key = jax.random.PRNGKey(0)
    kx, kv, kp = jax.random.split(key, 3)
    x = jax.random.normal(kx, (B, T, INPUT_SIZE), jnp.float32)
    vector = jax.random.normal(kv, (B, EMBED_SIZE), jnp.float32)
    lens = jnp.array([T, 5, 3, T], jnp.int32)

    params = make_params(kp, INPUT_SIZE + EMBED_SIZE, HIDDEN, OUT)

    # t_tile=4 -> 2 time tiles, exercising the scratch-carried pipelined grid.
    out = lstm_critic_forward(x, lens, vector, params, t_tile=4)
    out = jax.block_until_ready(out)

    ref = jax.block_until_ready(lstm_critic_reference(x, lens, vector, params))
    assert out.shape == (B, OUT), out.shape
    # f32 tolerance: summation order differs (fused/hoisted matmuls) vs XLA ref.
    assert jnp.allclose(out, ref, atol=1e-4, rtol=1e-4), (out, ref)

    print("KERNEL_OK")
</pallas_src>

<mosaic_0001>
module attributes {stable_mosaic.version = 11 : i64} {
  func.func @_lstm_critic_kernel(%arg0: i32, %arg1: i32, %arg2: memref<1x32x32xf32, #tpu.memory_space<vmem>>, %arg3: memref<8x1xi32, #tpu.memory_space<vmem>>, %arg4: memref<32x512xf32, #tpu.memory_space<vmem>>, %arg5: memref<128x512xf32, #tpu.memory_space<vmem>>, %arg6: memref<1x512xf32, #tpu.memory_space<vmem>>, %arg7: memref<256x512xf32, #tpu.memory_space<vmem>>, %arg8: memref<1x512xf32, #tpu.memory_space<vmem>>, %arg9: memref<128x1xf32, #tpu.memory_space<vmem>>, %arg10: memref<1x1xf32, #tpu.memory_space<vmem>>, %arg11: memref<8x1xf32, #tpu.memory_space<vmem>>, %arg12: memref<32x512xf32, #tpu.memory_space<vmem>>, %arg13: memref<8x128xf32, #tpu.memory_space<vmem>>, %arg14: memref<8x128xf32, #tpu.memory_space<vmem>>, %arg15: memref<8x128xf32, #tpu.memory_space<vmem>>, %arg16: memref<8x128xf32, #tpu.memory_space<vmem>>, %arg17: memref<8x128xf32, #tpu.memory_space<vmem>>) attributes {dimension_semantics = [#tpu.dimension_semantics<parallel>, #tpu.dimension_semantics<arbitrary>], iteration_bounds = array<i64: 1, 2>, scalar_prefetch = 0 : i64, scratch_operands = 6 : i64, tpu.core_type = #tpu.core_type<tc>, window_params = [{transform_indices = @transform_0, window_bounds = array<i64: 1, 32, 32>}, {transform_indices = @transform_1, window_bounds = array<i64: 8, 1>}, {pipeline_mode = #tpu.pipeline_mode<synchronous>, transform_indices = @transform_2, window_bounds = array<i64: 32, 512>}, {pipeline_mode = #tpu.pipeline_mode<synchronous>, transform_indices = @transform_3, window_bounds = array<i64: 128, 512>}, {pipeline_mode = #tpu.pipeline_mode<synchronous>, transform_indices = @transform_4, window_bounds = array<i64: 1, 512>}, {pipeline_mode = #tpu.pipeline_mode<synchronous>, transform_indices = @transform_5, window_bounds = array<i64: 256, 512>}, {pipeline_mode = #tpu.pipeline_mode<synchronous>, transform_indices = @transform_6, window_bounds = array<i64: 1, 512>}, {pipeline_mode = #tpu.pipeline_mode<synchronous>, transform_indices = @transform_7, window_bounds = array<i64: 128, 1>}, {pipeline_mode = #tpu.pipeline_mode<synchronous>, transform_indices = @transform_8, window_bounds = array<i64: 1, 1>}, {transform_indices = @transform_9, window_bounds = array<i64: 8, 1>}]} {
    %c0_i32 = arith.constant 0 : i32
    %0 = arith.cmpi eq, %arg1, %c0_i32 : i32
    %1 = arith.extui %0 : i1 to i32
    %c0_i32_0 = arith.constant 0 : i32
    %2 = arith.cmpi ne, %1, %c0_i32_0 : i32
    scf.if %2 {
      %cst_81 = arith.constant 0.000000e+00 : f32
      %295 = vector.broadcast %cst_81 : f32 to vector<8x128xf32>
      %c0_82 = arith.constant 0 : index
      %c0_83 = arith.constant 0 : index
      %296 = vector.load %arg13[%c0_82, %c0_83] : memref<8x128xf32, #tpu.memory_space<vmem>>, vector<8x128xf32>
      tpu.vector_store %arg13[%c0_82, %c0_83], %295 {strides = array<i32>} : memref<8x128xf32, #tpu.memory_space<vmem>>, vector<8x128xf32>,
      %c0_84 = arith.constant 0 : index
      %c0_85 = arith.constant 0 : index
      %297 = vector.load %arg14[%c0_84, %c0_85] : memref<8x128xf32, #tpu.memory_space<vmem>>, vector<8x128xf32>
      tpu.vector_store %arg14[%c0_84, %c0_85], %295 {strides = array<i32>} : memref<8x128xf32, #tpu.memory_space<vmem>>, vector<8x128xf32>,
      %c0_86 = arith.constant 0 : index
      %c0_87 = arith.constant 0 : index
      %298 = vector.load %arg15[%c0_86, %c0_87] : memref<8x128xf32, #tpu.memory_space<vmem>>, vector<8x128xf32>
      tpu.vector_store %arg15[%c0_86, %c0_87], %295 {strides = array<i32>} : memref<8x128xf32, #tpu.memory_space<vmem>>, vector<8x128xf32>,
      %c0_88 = arith.constant 0 : index
      %c0_89 = arith.constant 0 : index
      %299 = vector.load %arg16[%c0_88, %c0_89] : memref<8x128xf32, #tpu.memory_space<vmem>>, vector<8x128xf32>
      tpu.vector_store %arg16[%c0_88, %c0_89], %295 {strides = array<i32>} : memref<8x128xf32, #tpu.memory_space<vmem>>, vector<8x128xf32>,
      %c0_90 = arith.constant 0 : index
      %c0_91 = arith.constant 0 : index
      %300 = vector.load %arg17[%c0_90, %c0_91] : memref<8x128xf32, #tpu.memory_space<vmem>>, vector<8x128xf32>
      tpu.vector_store %arg17[%c0_90, %c0_91], %295 {strides = array<i32>} : memref<8x128xf32, #tpu.memory_space<vmem>>, vector<8x128xf32>,
    } else {
    }
    %c0 = arith.constant 0 : index
    %c0_1 = arith.constant 0 : index
    %c0_2 = arith.constant 0 : index
    %3 = vector.load %arg2[%c0, %c0_1, %c0_2] : memref<1x32x32xf32, #tpu.memory_space<vmem>>, vector<1x32x32xf32>
    %4 = vector.shape_cast %3 : vector<1x32x32xf32> to vector<32x32xf32>
    %c0_3 = arith.constant 0 : index
    %c0_4 = arith.constant 0 : index
    %5 = vector.load %arg4[%c0_3, %c0_4] : memref<32x512xf32, #tpu.memory_space<vmem>>, vector<32x512xf32>
    %cst = arith.constant dense<0.000000e+00> : vector<32x512xf32>
    %6 = tpu.matmul %4, %5, %cst {dimension_numbers = #tpu.dot_dimension_numbers<[1], [0], [0], [1], [0, 0, 1, 1], [], []>} : vector<32x32xf32>, vector<32x512xf32>, vector<32x512xf32> -> vector<32x512xf32>
    %c0_5 = arith.constant 0 : index
    %c0_6 = arith.constant 0 : index
    %7 = vector.load %arg6[%c0_5, %c0_6] : memref<1x512xf32, #tpu.memory_space<vmem>>, vector<1x512xf32>
    %8 = vector.broadcast %7 : vector<1x512xf32> to vector<32x512xf32>
    %9 = arith.addf %6, %8 : vector<32x512xf32>
    %c0_7 = arith.constant 0 : index
    %c0_8 = arith.constant 0 : index
    %10 = vector.load %arg12[%c0_7, %c0_8] : memref<32x512xf32, #tpu.memory_space<vmem>>, vector<32x512xf32>
    tpu.vector_store %arg12[%c0_7, %c0_8], %9 {strides = array<i32>} : memref<32x512xf32, #tpu.memory_space<vmem>>, vector<32x512xf32>,
    %c0_9 = arith.constant 0 : index
    %c0_10 = arith.constant 0 : index
    %11 = vector.load %arg5[%c0_9, %c0_10] : memref<128x512xf32, #tpu.memory_space<vmem>>, vector<128x512xf32>
    %c0_11 = arith.constant 0 : index
    %c0_12 = arith.constant 0 : index
    %12 = vector.load %arg7[%c0_11, %c0_12] : memref<256x512xf32, #tpu.memory_space<vmem>>, vector<256x512xf32>
    %c0_13 = arith.constant 0 : index
    %c0_14 = arith.constant 0 : index
    %13 = vector.load %arg8[%c0_13, %c0_14] : memref<1x512xf32, #tpu.memory_space<vmem>>, vector<1x512xf32>
    %c0_15 = arith.constant 0 : index
    %c0_16 = arith.constant 0 : index
    %14 = vector.load %arg3[%c0_15, %c0_16] : memref<8x1xi32, #tpu.memory_space<vmem>>, vector<8x1xi32>
    %c1_i32 = arith.constant 1 : i32
    %15 = vector.broadcast %c1_i32 : i32 to vector<8x1xi32>
    %16 = arith.subi %14, %15 : vector<8x1xi32>
    %c4_i32 = arith.constant 4 : i32
    %17 = arith.muli %arg1, %c4_i32 : i32
    %c0_17 = arith.constant 0 : index
    %c0_18 = arith.constant 0 : index
    %18 = vector.load %arg13[%c0_17, %c0_18] : memref<8x128xf32, #tpu.memory_space<vmem>>, vector<8x128xf32>
    %c0_19 = arith.constant 0 : index
    %c0_20 = arith.constant 0 : index
    %19 = vector.load %arg14[%c0_19, %c0_20] : memref<8x128xf32, #tpu.memory_space<vmem>>, vector<8x128xf32>
    %c0_21 = arith.constant 0 : index
    %c0_22 = arith.constant 0 : index
    %20 = vector.load %arg15[%c0_21, %c0_22] : memref<8x128xf32, #tpu.memory_space<vmem>>, vector<8x128xf32>
    %c0_23 = arith.constant 0 : index
    %c0_24 = arith.constant 0 : index
    %21 = vector.load %arg16[%c0_23, %c0_24] : memref<8x128xf32, #tpu.memory_space<vmem>>, vector<8x128xf32>
    %c0_25 = arith.constant 0 : index
    %c0_26 = arith.constant 0 : index
    %22 = vector.load %arg17[%c0_25, %c0_26] : memref<8x128xf32, #tpu.memory_space<vmem>>, vector<8x128xf32>
    %c0_i32_27 = arith.constant 0 : i32
    %c8_i32 = arith.constant 8 : i32
    %23 = arith.muli %c0_i32_27, %c8_i32 : i32
    %24 = tpu.assume_multiple %23, 8 : i32
    %25 = arith.index_cast %24 : i32 to index
    %c0_28 = arith.constant 0 : index
    %26 = vector.load %arg12[%25, %c0_28] : memref<32x512xf32, #tpu.memory_space<vmem>>, vector<8x512xf32>
    %cst_29 = arith.constant dense<0.000000e+00> : vector<8x512xf32>
    %27 = tpu.matmul %18, %11, %cst_29 {dimension_numbers = #tpu.dot_dimension_numbers<[1], [0], [0], [1], [0, 0, 1, 1], [], []>} : vector<8x128xf32>, vector<128x512xf32>, vector<8x512xf32> -> vector<8x512xf32>
    %28 = arith.addf %26, %27 : vector<8x512xf32>
    %29 = vector.extract_strided_slice %28 {offsets = [0, 0], sizes = [8, 128], strides = [1, 1]} : vector<8x512xf32> to vector<8x128xf32>
    %30 = arith.negf %29 : vector<8x128xf32>
    %31 = math.exp %30 : vector<8x128xf32>
    %cst_30 = arith.constant 1.000000e+00 : f32
    %32 = vector.broadcast %cst_30 : f32 to vector<8x128xf32>
    %33 = arith.addf %32, %31 : vector<8x128xf32>
    %34 = arith.divf %32, %33 : vector<8x128xf32>
    %35 = vector.extract_strided_slice %28 {offsets = [0, 128], sizes = [8, 128], strides = [1, 1]} : vector<8x512xf32> to vector<8x128xf32>
    %36 = arith.negf %35 : vector<8x128xf32>
    %37 = math.exp %36 : vector<8x128xf32>
    %cst_31 = arith.constant 1.000000e+00 : f32
    %38 = vector.broadcast %cst_31 : f32 to vector<8x128xf32>
    %39 = arith.addf %38, %37 : vector<8x128xf32>
    %40 = arith.divf %38, %39 : vector<8x128xf32>
    %41 = vector.extract_strided_slice %28 {offsets = [0, 256], sizes = [8, 128], strides = [1, 1]} : vector<8x512xf32> to vector<8x128xf32>
    %42 = math.tanh %41 : vector<8x128xf32>
    %43 = vector.extract_strided_slice %28 {offsets = [0, 384], sizes = [8, 128], strides = [1, 1]} : vector<8x512xf32> to vector<8x128xf32>
    %44 = arith.negf %43 : vector<8x128xf32>
    %45 = math.exp %44 : vector<8x128xf32>
    %cst_32 = arith.constant 1.000000e+00 : f32
    %46 = vector.broadcast %cst_32 : f32 to vector<8x128xf32>
    %47 = arith.addf %46, %45 : vector<8x128xf32>
    %48 = arith.divf %46, %47 : vector<8x128xf32>
    %49 = arith.mulf %40, %19 : vector<8x128xf32>
    %50 = arith.mulf %34, %42 : vector<8x128xf32>
    %51 = arith.addf %49, %50 : vector<8x128xf32>
    %52 = math.tanh %51 : vector<8x128xf32>
    %53 = arith.mulf %48, %52 : vector<8x128xf32>
    %54 = tpu.concatenate %53, %20 in 1 : vector<8x128xf32>, vector<8x128xf32> -> vector<8x256xf32>
    %cst_33 = arith.constant dense<0.000000e+00> : vector<8x512xf32>
    %55 = tpu.matmul %54, %12, %cst_33 {dimension_numbers = #tpu.dot_dimension_numbers<[1], [0], [0], [1], [0, 0, 1, 1], [], []>} : vector<8x256xf32>, vector<256x512xf32>, vector<8x512xf32> -> vector<8x512xf32>
    %56 = vector.broadcast %13 : vector<1x512xf32> to vector<8x512xf32>
    %57 = arith.addf %55, %56 : vector<8x512xf32>
    %58 = vector.extract_strided_slice %57 {offsets = [0, 0], sizes = [8, 128], strides = [1, 1]} : vector<8x512xf32> to vector<8x128xf32>
    %59 = arith.negf %58 : vector<8x128xf32>
    %60 = math.exp %59 : vector<8x128xf32>
    %cst_34 = arith.constant 1.000000e+00 : f32
    %61 = vector.broadcast %cst_34 : f32 to vector<8x128xf32>
    %62 = arith.addf %61, %60 : vector<8x128xf32>
    %63 = arith.divf %61, %62 : vector<8x128xf32>
    %64 = vector.extract_strided_slice %57 {offsets = [0, 128], sizes = [8, 128], strides = [1, 1]} : vector<8x512xf32> to vector<8x128xf32>
    %65 = arith.negf %64 : vector<8x128xf32>
    %66 = math.exp %65 : vector<8x128xf32>
    %cst_35 = arith.constant 1.000000e+00 : f32
    %67 = vector.broadcast %cst_35 : f32 to vector<8x128xf32>
    %68 = arith.addf %67, %66 : vector<8x128xf32>
    %69 = arith.divf %67, %68 : vector<8x128xf32>
    %70 = vector.extract_strided_slice %57 {offsets = [0, 256], sizes = [8, 128], strides = [1, 1]} : vector<8x512xf32> to vector<8x128xf32>
    %71 = math.tanh %70 : vector<8x128xf32>
    %72 = vector.extract_strided_slice %57 {offsets = [0, 384], sizes = [8, 128], strides = [1, 1]} : vector<8x512xf32> to vector<8x128xf32>
    %73 = arith.negf %72 : vector<8x128xf32>
    %74 = math.exp %73 : vector<8x128xf32>
    %cst_36 = arith.constant 1.000000e+00 : f32
    %75 = vector.broadcast %cst_36 : f32 to vector<8x128xf32>
    %76 = arith.addf %75, %74 : vector<8x128xf32>
    %77 = arith.divf %75, %76 : vector<8x128xf32>
    %78 = arith.mulf %69, %21 : vector<8x128xf32>
    %79 = arith.mulf %63, %71 : vector<8x128xf32>
    %80 = arith.addf %78, %79 : vector<8x128xf32>
    %81 = math.tanh %80 : vector<8x128xf32>
    %82 = arith.mulf %77, %81 : vector<8x128xf32>
    %83 = arith.addi %17, %c0_i32_27 : i32
    %84 = vector.broadcast %83 : i32 to vector<8x1xi32>
    %85 = arith.cmpi eq, %16, %84 : vector<8x1xi32>
    %86 = vector.shape_cast %85 : vector<8x1xi1> to vector<8x1xi1>
    %87 = vector.broadcast %86 : vector<8x1xi1> to vector<8x128xi1>
    %88 = arith.select %87, %82, %22 : vector<8x128xi1>, vector<8x128xf32>
    %c1_i32_37 = arith.constant 1 : i32
    %c8_i32_38 = arith.constant 8 : i32
    %89 = arith.muli %c1_i32_37, %c8_i32_38 : i32
    %90 = tpu.assume_multiple %89, 8 : i32
    %91 = arith.index_cast %90 : i32 to index
    %c0_39 = arith.constant 0 : index
    %92 = vector.load %arg12[%91, %c0_39] : memref<32x512xf32, #tpu.memory_space<vmem>>, vector<8x512xf32>
    %cst_40 = arith.constant dense<0.000000e+00> : vector<8x512xf32>
    %93 = tpu.matmul %53, %11, %cst_40 {dimension_numbers = #tpu.dot_dimension_numbers<[1], [0], [0], [1], [0, 0, 1, 1], [], []>} : vector<8x128xf32>, vector<128x512xf32>, vector<8x512xf32> -> vector<8x512xf32>
    %94 = arith.addf %92, %93 : vector<8x512xf32>
    %95 = vector.extract_strided_slice %94 {offsets = [0, 0], sizes = [8, 128], strides = [1, 1]} : vector<8x512xf32> to vector<8x128xf32>
    %96 = arith.negf %95 : vector<8x128xf32>
    %97 = math.exp %96 : vector<8x128xf32>
    %cst_41 = arith.constant 1.000000e+00 : f32
    %98 = vector.broadcast %cst_41 : f32 to vector<8x128xf32>
    %99 = arith.addf %98, %97 : vector<8x128xf32>
    %100 = arith.divf %98, %99 : vector<8x128xf32>
    %101 = vector.extract_strided_slice %94 {offsets = [0, 128], sizes = [8, 128], strides = [1, 1]} : vector<8x512xf32> to vector<8x128xf32>
    %102 = arith.negf %101 : vector<8x128xf32>
    %103 = math.exp %102 : vector<8x128xf32>
    %cst_42 = arith.constant 1.000000e+00 : f32
    %104 = vector.broadcast %cst_42 : f32 to vector<8x128xf32>
    %105 = arith.addf %104, %103 : vector<8x128xf32>
    %106 = arith.divf %104, %105 : vector<8x128xf32>
    %107 = vector.extract_strided_slice %94 {offsets = [0, 256], sizes = [8, 128], strides = [1, 1]} : vector<8x512xf32> to vector<8x128xf32>
    %108 = math.tanh %107 : vector<8x128xf32>
    %109 = vector.extract_strided_slice %94 {offsets = [0, 384], sizes = [8, 128], strides = [1, 1]} : vector<8x512xf32> to vector<8x128xf32>
    %110 = arith.negf %109 : vector<8x128xf32>
    %111 = math.exp %110 : vector<8x128xf32>
    %cst_43 = arith.constant 1.000000e+00 : f32
    %112 = vector.broadcast %cst_43 : f32 to vector<8x128xf32>
    %113 = arith.addf %112, %111 : vector<8x128xf32>
    %114 = arith.divf %112, %113 : vector<8x128xf32>
    %115 = arith.mulf %106, %51 : vector<8x128xf32>
    %116 = arith.mulf %100, %108 : vector<8x128xf32>
    %117 = arith.addf %115, %116 : vector<8x128xf32>
    %118 = math.tanh %117 : vector<8x128xf32>
    %119 = arith.mulf %114, %118 : vector<8x128xf32>
    %120 = tpu.concatenate %119, %82 in 1 : vector<8x128xf32>, vector<8x128xf32> -> vector<8x256xf32>
    %cst_44 = arith.constant dense<0.000000e+00> : vector<8x512xf32>
    %121 = tpu.matmul %120, %12, %cst_44 {dimension_numbers = #tpu.dot_dimension_numbers<[1], [0], [0], [1], [0, 0, 1, 1], [], []>} : vector<8x256xf32>, vector<256x512xf32>, vector<8x512xf32> -> vector<8x512xf32>
    %122 = vector.broadcast %13 : vector<1x512xf32> to vector<8x512xf32>
    %123 = arith.addf %121, %122 : vector<8x512xf32>
    %124 = vector.extract_strided_slice %123 {offsets = [0, 0], sizes = [8, 128], strides = [1, 1]} : vector<8x512xf32> to vector<8x128xf32>
    %125 = arith.negf %124 : vector<8x128xf32>
    %126 = math.exp %125 : vector<8x128xf32>
    %cst_45 = arith.constant 1.000000e+00 : f32
    %127 = vector.broadcast %cst_45 : f32 to vector<8x128xf32>
    %128 = arith.addf %127, %126 : vector<8x128xf32>
    %129 = arith.divf %127, %128 : vector<8x128xf32>
    %130 = vector.extract_strided_slice %123 {offsets = [0, 128], sizes = [8, 128], strides = [1, 1]} : vector<8x512xf32> to vector<8x128xf32>
    %131 = arith.negf %130 : vector<8x128xf32>
    %132 = math.exp %131 : vector<8x128xf32>
    %cst_46 = arith.constant 1.000000e+00 : f32
    %133 = vector.broadcast %cst_46 : f32 to vector<8x128xf32>
    %134 = arith.addf %133, %132 : vector<8x128xf32>
    %135 = arith.divf %133, %134 : vector<8x128xf32>
    %136 = vector.extract_strided_slice %123 {offsets = [0, 256], sizes = [8, 128], strides = [1, 1]} : vector<8x512xf32> to vector<8x128xf32>
    %137 = math.tanh %136 : vector<8x128xf32>
    %138 = vector.extract_strided_slice %123 {offsets = [0, 384], sizes = [8, 128], strides = [1, 1]} : vector<8x512xf32> to vector<8x128xf32>
    %139 = arith.negf %138 : vector<8x128xf32>
    %140 = math.exp %139 : vector<8x128xf32>
    %cst_47 = arith.constant 1.000000e+00 : f32
    %141 = vector.broadcast %cst_47 : f32 to vector<8x128xf32>
    %142 = arith.addf %141, %140 : vector<8x128xf32>
    %143 = arith.divf %141, %142 : vector<8x128xf32>
    %144 = arith.mulf %135, %80 : vector<8x128xf32>
    %145 = arith.mulf %129, %137 : vector<8x128xf32>
    %146 = arith.addf %144, %145 : vector<8x128xf32>
    %147 = math.tanh %146 : vector<8x128xf32>
    %148 = arith.mulf %143, %147 : vector<8x128xf32>
    %149 = arith.addi %17, %c1_i32_37 : i32
    %150 = vector.broadcast %149 : i32 to vector<8x1xi32>
    %151 = arith.cmpi eq, %16, %150 : vector<8x1xi32>
    %152 = vector.shape_cast %151 : vector<8x1xi1> to vector<8x1xi1>
    %153 = vector.broadcast %152 : vector<8x1xi1> to vector<8x128xi1>
    %154 = arith.select %153, %148, %88 : vector<8x128xi1>, vector<8x128xf32>
    %c2_i32 = arith.constant 2 : i32
    %c8_i32_48 = arith.constant 8 : i32
    %155 = arith.muli %c2_i32, %c8_i32_48 : i32
    %156 = tpu.assume_multiple %155, 8 : i32
    %157 = arith.index_cast %156 : i32 to index
    %c0_49 = arith.constant 0 : index
    %158 = vector.load %arg12[%157, %c0_49] : memref<32x512xf32, #tpu.memory_space<vmem>>, vector<8x512xf32>
    %cst_50 = arith.constant dense<0.000000e+00> : vector<8x512xf32>
    %159 = tpu.matmul %119, %11, %cst_50 {dimension_numbers = #tpu.dot_dimension_numbers<[1], [0], [0], [1], [0, 0, 1, 1], [], []>} : vector<8x128xf32>, vector<128x512xf32>, vector<8x512xf32> -> vector<8x512xf32>
    %160 = arith.addf %158, %159 : vector<8x512xf32>
    %161 = vector.extract_strided_slice %160 {offsets = [0, 0], sizes = [8, 128], strides = [1, 1]} : vector<8x512xf32> to vector<8x128xf32>
    %162 = arith.negf %161 : vector<8x128xf32>
    %163 = math.exp %162 : vector<8x128xf32>
    %cst_51 = arith.constant 1.000000e+00 : f32
    %164 = vector.broadcast %cst_51 : f32 to vector<8x128xf32>
    %165 = arith.addf %164, %163 : vector<8x128xf32>
    %166 = arith.divf %164, %165 : vector<8x128xf32>
    %167 = vector.extract_strided_slice %160 {offsets = [0, 128], sizes = [8, 128], strides = [1, 1]} : vector<8x512xf32> to vector<8x128xf32>
    %168 = arith.negf %167 : vector<8x128xf32>
    %169 = math.exp %168 : vector<8x128xf32>
    %cst_52 = arith.constant 1.000000e+00 : f32
    %170 = vector.broadcast %cst_52 : f32 to vector<8x128xf32>
    %171 = arith.addf %170, %169 : vector<8x128xf32>
    %172 = arith.divf %170, %171 : vector<8x128xf32>
    %173 = vector.extract_strided_slice %160 {offsets = [0, 256], sizes = [8, 128], strides = [1, 1]} : vector<8x512xf32> to vector<8x128xf32>
    %174 = math.tanh %173 : vector<8x128xf32>
    %175 = vector.extract_strided_slice %160 {offsets = [0, 384], sizes = [8, 128], strides = [1, 1]} : vector<8x512xf32> to vector<8x128xf32>
    %176 = arith.negf %175 : vector<8x128xf32>
    %177 = math.exp %176 : vector<8x128xf32>
    %cst_53 = arith.constant 1.000000e+00 : f32
    %178 = vector.broadcast %cst_53 : f32 to vector<8x128xf32>
    %179 = arith.addf %178, %177 : vector<8x128xf32>
    %180 = arith.divf %178, %179 : vector<8x128xf32>
    %181 = arith.mulf %172, %117 : vector<8x128xf32>
    %182 = arith.mulf %166, %174 : vector<8x128xf32>
    %183 = arith.addf %181, %182 : vector<8x128xf32>
    %184 = math.tanh %183 : vector<8x128xf32>
    %185 = arith.mulf %180, %184 : vector<8x128xf32>
    %186 = tpu.concatenate %185, %148 in 1 : vector<8x128xf32>, vector<8x128xf32> -> vector<8x256xf32>
    %cst_54 = arith.constant dense<0.000000e+00> : vector<8x512xf32>
    %187 = tpu.matmul %186, %12, %cst_54 {dimension_numbers = #tpu.dot_dimension_numbers<[1], [0], [0], [1], [0, 0, 1, 1], [], []>} : vector<8x256xf32>, vector<256x512xf32>, vector<8x512xf32> -> vector<8x512xf32>
    %188 = vector.broadcast %13 : vector<1x512xf32> to vector<8x512xf32>
    %189 = arith.addf %187, %188 : vector<8x512xf32>
    %190 = vector.extract_strided_slice %189 {offsets = [0, 0], sizes = [8, 128], strides = [1, 1]} : vector<8x512xf32> to vector<8x128xf32>
    %191 = arith.negf %190 : vector<8x128xf32>
    %192 = math.exp %191 : vector<8x128xf32>
    %cst_55 = arith.constant 1.000000e+00 : f32
    %193 = vector.broadcast %cst_55 : f32 to vector<8x128xf32>
    %194 = arith.addf %193, %192 : vector<8x128xf32>
    %195 = arith.divf %193, %194 : vector<8x128xf32>
    %196 = vector.extract_strided_slice %189 {offsets = [0, 128], sizes = [8, 128], strides = [1, 1]} : vector<8x512xf32> to vector<8x128xf32>
    %197 = arith.negf %196 : vector<8x128xf32>
    %198 = math.exp %197 : vector<8x128xf32>
    %cst_56 = arith.constant 1.000000e+00 : f32
    %199 = vector.broadcast %cst_56 : f32 to vector<8x128xf32>
    %200 = arith.addf %199, %198 : vector<8x128xf32>
    %201 = arith.divf %199, %200 : vector<8x128xf32>
    %202 = vector.extract_strided_slice %189 {offsets = [0, 256], sizes = [8, 128], strides = [1, 1]} : vector<8x512xf32> to vector<8x128xf32>
    %203 = math.tanh %202 : vector<8x128xf32>
    %204 = vector.extract_strided_slice %189 {offsets = [0, 384], sizes = [8, 128], strides = [1, 1]} : vector<8x512xf32> to vector<8x128xf32>
    %205 = arith.negf %204 : vector<8x128xf32>
    %206 = math.exp %205 : vector<8x128xf32>
    %cst_57 = arith.constant 1.000000e+00 : f32
    %207 = vector.broadcast %cst_57 : f32 to vector<8x128xf32>
    %208 = arith.addf %207, %206 : vector<8x128xf32>
    %209 = arith.divf %207, %208 : vector<8x128xf32>
    %210 = arith.mulf %201, %146 : vector<8x128xf32>
    %211 = arith.mulf %195, %203 : vector<8x128xf32>
    %212 = arith.addf %210, %211 : vector<8x128xf32>
    %213 = math.tanh %212 : vector<8x128xf32>
    %214 = arith.mulf %209, %213 : vector<8x128xf32>
    %215 = arith.addi %17, %c2_i32 : i32
    %216 = vector.broadcast %215 : i32 to vector<8x1xi32>
    %217 = arith.cmpi eq, %16, %216 : vector<8x1xi32>
    %218 = vector.shape_cast %217 : vector<8x1xi1> to vector<8x1xi1>
    %219 = vector.broadcast %218 : vector<8x1xi1> to vector<8x128xi1>
    %220 = arith.select %219, %214, %154 : vector<8x128xi1>, vector<8x128xf32>
    %c3_i32 = arith.constant 3 : i32
    %c8_i32_58 = arith.constant 8 : i32
    %221 = arith.muli %c3_i32, %c8_i32_58 : i32
    %222 = tpu.assume_multiple %221, 8 : i32
    %223 = arith.index_cast %222 : i32 to index
    %c0_59 = arith.constant 0 : index
    %224 = vector.load %arg12[%223, %c0_59] : memref<32x512xf32, #tpu.memory_space<vmem>>, vector<8x512xf32>
    %cst_60 = arith.constant dense<0.000000e+00> : vector<8x512xf32>
    %225 = tpu.matmul %185, %11, %cst_60 {dimension_numbers = #tpu.dot_dimension_numbers<[1], [0], [0], [1], [0, 0, 1, 1], [], []>} : vector<8x128xf32>, vector<128x512xf32>, vector<8x512xf32> -> vector<8x512xf32>
    %226 = arith.addf %224, %225 : vector<8x512xf32>
    %227 = vector.extract_strided_slice %226 {offsets = [0, 0], sizes = [8, 128], strides = [1, 1]} : vector<8x512xf32> to vector<8x128xf32>
    %228 = arith.negf %227 : vector<8x128xf32>
    %229 = math.exp %228 : vector<8x128xf32>
    %cst_61 = arith.constant 1.000000e+00 : f32
    %230 = vector.broadcast %cst_61 : f32 to vector<8x128xf32>
    %231 = arith.addf %230, %229 : vector<8x128xf32>
    %232 = arith.divf %230, %231 : vector<8x128xf32>
    %233 = vector.extract_strided_slice %226 {offsets = [0, 128], sizes = [8, 128], strides = [1, 1]} : vector<8x512xf32> to vector<8x128xf32>
    %234 = arith.negf %233 : vector<8x128xf32>
    %235 = math.exp %234 : vector<8x128xf32>
    %cst_62 = arith.constant 1.000000e+00 : f32
    %236 = vector.broadcast %cst_62 : f32 to vector<8x128xf32>
    %237 = arith.addf %236, %235 : vector<8x128xf32>
    %238 = arith.divf %236, %237 : vector<8x128xf32>
    %239 = vector.extract_strided_slice %226 {offsets = [0, 256], sizes = [8, 128], strides = [1, 1]} : vector<8x512xf32> to vector<8x128xf32>
    %240 = math.tanh %239 : vector<8x128xf32>
    %241 = vector.extract_strided_slice %226 {offsets = [0, 384], sizes = [8, 128], strides = [1, 1]} : vector<8x512xf32> to vector<8x128xf32>
    %242 = arith.negf %241 : vector<8x128xf32>
    %243 = math.exp %242 : vector<8x128xf32>
    %cst_63 = arith.constant 1.000000e+00 : f32
    %244 = vector.broadcast %cst_63 : f32 to vector<8x128xf32>
    %245 = arith.addf %244, %243 : vector<8x128xf32>
    %246 = arith.divf %244, %245 : vector<8x128xf32>
    %247 = arith.mulf %238, %183 : vector<8x128xf32>
    %248 = arith.mulf %232, %240 : vector<8x128xf32>
    %249 = arith.addf %247, %248 : vector<8x128xf32>
    %250 = math.tanh %249 : vector<8x128xf32>
    %251 = arith.mulf %246, %250 : vector<8x128xf32>
    %252 = tpu.concatenate %251, %214 in 1 : vector<8x128xf32>, vector<8x128xf32> -> vector<8x256xf32>
    %cst_64 = arith.constant dense<0.000000e+00> : vector<8x512xf32>
    %253 = tpu.matmul %252, %12, %cst_64 {dimension_numbers = #tpu.dot_dimension_numbers<[1], [0], [0], [1], [0, 0, 1, 1], [], []>} : vector<8x256xf32>, vector<256x512xf32>, vector<8x512xf32> -> vector<8x512xf32>
    %254 = vector.broadcast %13 : vector<1x512xf32> to vector<8x512xf32>
    %255 = arith.addf %253, %254 : vector<8x512xf32>
    %256 = vector.extract_strided_slice %255 {offsets = [0, 0], sizes = [8, 128], strides = [1, 1]} : vector<8x512xf32> to vector<8x128xf32>
    %257 = arith.negf %256 : vector<8x128xf32>
    %258 = math.exp %257 : vector<8x128xf32>
    %cst_65 = arith.constant 1.000000e+00 : f32
    %259 = vector.broadcast %cst_65 : f32 to vector<8x128xf32>
    %260 = arith.addf %259, %258 : vector<8x128xf32>
    %261 = arith.divf %259, %260 : vector<8x128xf32>
    %262 = vector.extract_strided_slice %255 {offsets = [0, 128], sizes = [8, 128], strides = [1, 1]} : vector<8x512xf32> to vector<8x128xf32>
    %263 = arith.negf %262 : vector<8x128xf32>
    %264 = math.exp %263 : vector<8x128xf32>
    %cst_66 = arith.constant 1.000000e+00 : f32
    %265 = vector.broadcast %cst_66 : f32 to vector<8x128xf32>
    %266 = arith.addf %265, %264 : vector<8x128xf32>
    %267 = arith.divf %265, %266 : vector<8x128xf32>
    %268 = vector.extract_strided_slice %255 {offsets = [0, 256], sizes = [8, 128], strides = [1, 1]} : vector<8x512xf32> to vector<8x128xf32>
    %269 = math.tanh %268 : vector<8x128xf32>
    %270 = vector.extract_strided_slice %255 {offsets = [0, 384], sizes = [8, 128], strides = [1, 1]} : vector<8x512xf32> to vector<8x128xf32>
    %271 = arith.negf %270 : vector<8x128xf32>
    %272 = math.exp %271 : vector<8x128xf32>
    %cst_67 = arith.constant 1.000000e+00 : f32
    %273 = vector.broadcast %cst_67 : f32 to vector<8x128xf32>
    %274 = arith.addf %273, %272 : vector<8x128xf32>
    %275 = arith.divf %273, %274 : vector<8x128xf32>
    %276 = arith.mulf %267, %212 : vector<8x128xf32>
    %277 = arith.mulf %261, %269 : vector<8x128xf32>
    %278 = arith.addf %276, %277 : vector<8x128xf32>
    %279 = math.tanh %278 : vector<8x128xf32>
    %280 = arith.mulf %275, %279 : vector<8x128xf32>
    %281 = arith.addi %17, %c3_i32 : i32
    %282 = vector.broadcast %281 : i32 to vector<8x1xi32>
    %283 = arith.cmpi eq, %16, %282 : vector<8x1xi32>
    %284 = vector.shape_cast %283 : vector<8x1xi1> to vector<8x1xi1>
    %285 = vector.broadcast %284 : vector<8x1xi1> to vector<8x128xi1>
    %286 = arith.select %285, %280, %220 : vector<8x128xi1>, vector<8x128xf32>
    %c4_i32_68 = arith.constant 4 : i32
    %c0_69 = arith.constant 0 : index
    %c0_70 = arith.constant 0 : index
    %287 = vector.load %arg13[%c0_69, %c0_70] : memref<8x128xf32, #tpu.memory_space<vmem>>, vector<8x128xf32>
    tpu.vector_store %arg13[%c0_69, %c0_70], %251 {strides = array<i32>} : memref<8x128xf32, #tpu.memory_space<vmem>>, vector<8x128xf32>,
    %c0_71 = arith.constant 0 : index
    %c0_72 = arith.constant 0 : index
    %288 = vector.load %arg14[%c0_71, %c0_72] : memref<8x128xf32, #tpu.memory_space<vmem>>, vector<8x128xf32>
    tpu.vector_store %arg14[%c0_71, %c0_72], %249 {strides = array<i32>} : memref<8x128xf32, #tpu.memory_space<vmem>>, vector<8x128xf32>,
    %c0_73 = arith.constant 0 : index
    %c0_74 = arith.constant 0 : index
    %289 = vector.load %arg15[%c0_73, %c0_74] : memref<8x128xf32, #tpu.memory_space<vmem>>, vector<8x128xf32>
    tpu.vector_store %arg15[%c0_73, %c0_74], %280 {strides = array<i32>} : memref<8x128xf32, #tpu.memory_space<vmem>>, vector<8x128xf32>,
    %c0_75 = arith.constant 0 : index
    %c0_76 = arith.constant 0 : index
    %290 = vector.load %arg16[%c0_75, %c0_76] : memref<8x128xf32, #tpu.memory_space<vmem>>, vector<8x128xf32>
    tpu.vector_store %arg16[%c0_75, %c0_76], %278 {strides = array<i32>} : memref<8x128xf32, #tpu.memory_space<vmem>>, vector<8x128xf32>,
    %c0_77 = arith.constant 0 : index
    %c0_78 = arith.constant 0 : index
    %291 = vector.load %arg17[%c0_77, %c0_78] : memref<8x128xf32, #tpu.memory_space<vmem>>, vector<8x128xf32>
    tpu.vector_store %arg17[%c0_77, %c0_78], %286 {strides = array<i32>} : memref<8x128xf32, #tpu.memory_space<vmem>>, vector<8x128xf32>,
    %c1_i32_79 = arith.constant 1 : i32
    %292 = arith.cmpi eq, %arg1, %c1_i32_79 : i32
    %293 = arith.extui %292 : i1 to i32
    %c0_i32_80 = arith.constant 0 : i32
    %294 = arith.cmpi ne, %293, %c0_i32_80 : i32
    scf.if %294 {
      %c0_81 = arith.constant 0 : index
      %c0_82 = arith.constant 0 : index
      %295 = vector.load %arg9[%c0_81, %c0_82] : memref<128x1xf32, #tpu.memory_space<vmem>>, vector<128x1xf32>
      %cst_83 = arith.constant dense<0.000000e+00> : vector<8x1xf32>
      %296 = tpu.matmul %286, %295, %cst_83 {dimension_numbers = #tpu.dot_dimension_numbers<[1], [0], [0], [1], [0, 0, 1, 1], [], []>} : vector<8x128xf32>, vector<128x1xf32>, vector<8x1xf32> -> vector<8x1xf32>
      %c0_84 = arith.constant 0 : index
      %c0_85 = arith.constant 0 : index
      %297 = vector.load %arg10[%c0_84, %c0_85] : memref<1x1xf32, #tpu.memory_space<vmem>>, vector<1x1xf32>
      %298 = vector.broadcast %297 : vector<1x1xf32> to vector<8x1xf32>
      %299 = arith.addf %296, %298 : vector<8x1xf32>
      %c0_86 = arith.constant 0 : index
      %c0_87 = arith.constant 0 : index
      %300 = vector.load %arg11[%c0_86, %c0_87] : memref<8x1xf32, #tpu.memory_space<vmem>>, vector<8x1xf32>
      tpu.vector_store %arg11[%c0_86, %c0_87], %299 {strides = array<i32>} : memref<8x1xf32, #tpu.memory_space<vmem>>, vector<8x1xf32>,
    } else {
    }
    return
  }
  func.func @transform_0(%arg0: i32, %arg1: i32) -> (i32, i32, i32) {
    %c0_i32 = arith.constant 0 : i32
    %c0_i32_0 = arith.constant 0 : i32
    return %arg0, %arg1, %c0_i32 : i32, i32, i32
  }
  func.func @transform_1(%arg0: i32, %arg1: i32) -> (i32, i32) {
    %c0_i32 = arith.constant 0 : i32
    %c0_i32_0 = arith.constant 0 : i32
    return %arg0, %c0_i32 : i32, i32
  }
  func.func @transform_2(%arg0: i32, %arg1: i32) -> (i32, i32) {
    %c0_i32 = arith.constant 0 : i32
    %c0_i32_0 = arith.constant 0 : i32
    %c0_i32_1 = arith.constant 0 : i32
    return %c0_i32, %c0_i32_0 : i32, i32
  }
  func.func @transform_3(%arg0: i32, %arg1: i32) -> (i32, i32) {
    %c0_i32 = arith.constant 0 : i32
    %c0_i32_0 = arith.constant 0 : i32
    %c0_i32_1 = arith.constant 0 : i32
    return %c0_i32, %c0_i32_0 : i32, i32
  }
  func.func @transform_4(%arg0: i32, %arg1: i32) -> (i32, i32) {
    %c0_i32 = arith.constant 0 : i32
    %c0_i32_0 = arith.constant 0 : i32
    %c0_i32_1 = arith.constant 0 : i32
    return %c0_i32, %c0_i32_0 : i32, i32
  }
  func.func @transform_5(%arg0: i32, %arg1: i32) -> (i32, i32) {
    %c0_i32 = arith.constant 0 : i32
    %c0_i32_0 = arith.constant 0 : i32
    %c0_i32_1 = arith.constant 0 : i32
    return %c0_i32, %c0_i32_0 : i32, i32
  }
  func.func @transform_6(%arg0: i32, %arg1: i32) -> (i32, i32) {
    %c0_i32 = arith.constant 0 : i32
    %c0_i32_0 = arith.constant 0 : i32
    %c0_i32_1 = arith.constant 0 : i32
    return %c0_i32, %c0_i32_0 : i32, i32
  }
  func.func @transform_7(%arg0: i32, %arg1: i32) -> (i32, i32) {
    %c0_i32 = arith.constant 0 : i32
    %c0_i32_0 = arith.constant 0 : i32
    %c0_i32_1 = arith.constant 0 : i32
    return %c0_i32, %c0_i32_0 : i32, i32
  }
  func.func @transform_8(%arg0: i32, %arg1: i32) -> (i32, i32) {
    %c0_i32 = arith.constant 0 : i32
    %c0_i32_0 = arith.constant 0 : i32
    %c0_i32_1 = arith.constant 0 : i32
    return %c0_i32, %c0_i32_0 : i32, i32
  }
  func.func @transform_9(%arg0: i32, %arg1: i32) -> (i32, i32) {
    %c0_i32 = arith.constant 0 : i32
    %c0_i32_0 = arith.constant 0 : i32
    return %arg0, %c0_i32 : i32, i32
  }
}

</mosaic_0001>

<bundles_post_ra>
// kernel: tpu_custom_call.1
= control target key start
LH: loop header
LB: loop body
LE: loop exit
PB: predicated region body
PF: predicated region fallthrough
CT: control target
= control target key end

     0   :  { %s5033_s0 = inlined_call_operand.vmem [shape: f32[1,64,32], index: 0, kind: input, shape index: {}]   ;;  %s5034_s1 = inlined_call_operand.vmem [shape: s32[8,1], index: 1, kind: input, shape index: {}]   ;;  %s5035_s2 = inlined_call_operand.vmem [shape: f32[32,512], index: 2, kind: input, shape index: {}]   ;;  %s5036_s3 = inlined_call_operand.hbm [shape: f32[128,512], index: 3, kind: input, shape index: {}]   ;;  %s5037_s4 = inlined_call_operand.vmem [shape: f32[1,512], index: 4, kind: input, shape index: {}]   ;;  %s5038_s5 = inlined_call_operand.hbm [shape: f32[256,512], index: 5, kind: input, shape index: {}]   ;;  %s5039_s6 = inlined_call_operand.vmem [shape: f32[1,512], index: 6, kind: input, shape index: {}]   ;;  %s5040_s7 = inlined_call_operand.vmem [shape: f32[128,1], index: 7, kind: input, shape index: {}]   ;;  %s5041_s8 = inlined_call_operand.<no memory space> [shape: f32[1,1], index: 8, kind: input, shape index: {}]   ;;  %s5042_s9 = inlined_call_operand.vmem [shape: f32[8,1], index: 9, kind: output, shape index: {}]  }
   0x1   :  { %v14_v0 = vstv %s5041_s8 }
   0x2   :  { %15 = vst [vmem:[#allocation8] sm:$0x1] %v14_v0 }
   0x3   :  { %16 = vsyncpa [#allocation10], 0 }
   0x4   :  { %17 = vsyncpa [#allocation12], 0  ;;  %s3127_s11 = smov 0   ;;  %s3129_s12 = smov 0  }
   0x5   :  { %s3131_s13 = smov 0  }
   0x6 LB: > { %s2504_s8 = sadd.s32 4294967295, %s3063_s13   ;;  %s32_s14 = sadd.s32 1, %s3059_s12  ;;  %s3063_s13 = sphi %s3131_s13, %s23_s13   ;;  %s3059_s12 = sphi %s3129_s12, %s6020_s12   ;;  %s3055_s11 = sphi %s3127_s11, %s6019_s11  }
   0x7   : > { %p33_p0 = scmp.ge.s32.totalorder %s32_s14, 2  ;;  %p2505_p1 = scmp.ge.s32.totalorder %s3063_s13, 1 }
   0x8   : > { %p267_p2 = scmp.lt.s32.totalorder %s3063_s13, 3  ;;  %p3152_p4 = scmp.eq.s32.totalorder %s2504_s8, 0 }
   0x9   : > { %s6022_s14 = smov (%p33_p0, %s32_s14), 0  ;;  %s3065_s17 = smov [#allocation9]  }
   0xa   : > { %p3148_p3 = pnand %p2505_p1, %p267_p2  ;;  %s289_s18 = sshll.u32 %s3065_s17, 4  ;;  %s290_s18 = int_to_ptr.vmem [resolvable:$true] %s289_s18 }
   0xb   : > { %s3066_s20 = smov [#allocation11]   ;;  %s2992_s22 = scalar_lea.vmem %s290_s18, 8192 }
   0xc   : > { %p2615_p5 = pneg %p3148_p3  ;;  %s305_s21 = sshll.u32 %s3066_s20, 4  ;;  %s306_s21 = int_to_ptr.vmem [resolvable:$true] %s305_s21 }
   0xd   : > { %p2993_p8 = scmp.ne.s32.totalorder %s290_s18, %s2992_s22  ;;  %p3000_p11 = scmp.lt.s32.totalorder %s290_s18, %s290_s18 }
   0xe   : > { %p3160_p6 = pnand %p3152_p4, %p2615_p5  ;;  %p3001_p12 = scmp.lt.s32.totalorder %s2992_s22, %s2992_s22 }
  0x10   : > { %p2983_p7 = pneg %p3160_p6  ;;  %p3002_p13 = por %p3001_p12, %p3000_p11 }
  0x12   : > { %p2995_p9 = pnand %p2993_p8, %p2983_p7 }
  0x14   : > { %p2996_p10 = pneg %p2995_p9 }
  0x16   : > { %p3003_p0 = pnand %p3002_p13, %p2996_p10 }
  0x18   : > { %3006 = shalt.err (!%p3003_p0)
}
  0x19   : > { %s3067_s23 = smov 512   ;;  %s3068_s24 = smov 32  }
  0x1a   : > { %2618 = dma.hbm_to_vmem [thread:$0]  (!%p3160_p6), %s5036_s3, 8192, %s290_s18, [#allocation10], %s3067_s23, %s3067_s23, %s3068_s24  }
  0x1b   : > { %s3018_s27 = scalar_lea.vmem %s306_s21, 16384  ;;  %p3026_p8 = scmp.lt.s32.totalorder %s306_s21, %s306_s21 }
  0x1c   : > { %p3019_p1 = scmp.ne.s32.totalorder %s306_s21, %s3018_s27  ;;  %p3027_p9 = scmp.lt.s32.totalorder %s3018_s27, %s3018_s27 }
  0x1e   : > { %p3021_p2 = pnand %p3019_p1, %p2983_p7  ;;  %p3028_p11 = por %p3027_p9, %p3026_p8 }
  0x20   : > { %p3022_p5 = pneg %p3021_p2 }
  0x22   : > { %p3029_p10 = pnand %p3028_p11, %p3022_p5 }
  0x24   : > { %3032 = shalt.err (!%p3029_p10)
}
  0x25   : > { %2621 = dma.hbm_to_vmem [thread:$0]  (!%p3160_p6), %s5038_s5, 16384, %s306_s21, [#allocation12], %s3067_s23, %s3067_s23, %s3068_s24  }
  0x26   : > { %343 = sbr.rel (%p3148_p3) target bundleno = 1682 (0x692), region = 56 }
  0x2b   : > { %3046 = dma.done.wait (%p3152_p4), [#allocation10], 8192  }
  0x2c   : > { %3048 = vsyncadd (%p3152_p4), [#allocation10], 4294959104 }
  0x2d   : > { %3050 = dma.done.wait (%p3152_p4), [#allocation12], 16384  }
  0x2e   : > { %3052 = vsyncadd (%p3152_p4), [#allocation12], 4294950912  ;;  %s3193_s30 = sshll.u32 %s3055_s11, 2  ;;  %p2515_p3 = scmp.ne.s32.totalorder %s3055_s11, 0 }
  0x2f   : > { %p393_p6 = scmp.lt.s32.totalorder %s3193_s30, 7 }
  0x30   : > { %411 = sbr.rel (%p2515_p3) target bundleno = 57 (0x39), region = 68 }
  0x31   : > { %s394_s10 = scalar_select %p393_p6, %s3193_s30, 7 }
  0x33   : > { %s2514_s8 = sshll.u32 %s394_s10, 3 }
  0x34   : > { %s3200_s18 = scalar_lea.vmem %s5033_s0, %s2514_s8 }
  0x35   : > { %v3069_v1 = vmov 0.0  }
  0x36   : > { %412 = vst [vmem:[#allocation3] sm:$0xff] %v3069_v1  ;;  %413 = vst [vmem:[#allocation4] sm:$0xff] %v3069_v1 }
  0x37   : > { %414 = vst [vmem:[#allocation5] sm:$0xff] %v3069_v1  ;;  %415 = vst [vmem:[#allocation6] sm:$0xff] %v3069_v1 }
  0x38   : > { %416 = vst [vmem:[#allocation7] sm:$0xff] %v3069_v1 }
  0x39 PF: > { %v434_v2 = vld [vmem:[%s5035_s2 + $0x68] sm:$0xff]  ;;  %v436_v3 = vld [vmem:[%s5035_s2 + $0x78] sm:$0xff]  ;;  %v433_v4 = vld [vmem:[%s5035_s2 + $0x60] sm:$0xff]  ;;  %vm459_vm0 = vcmask 261120   ;;  %v5044_v20 = vmov 0.0   ;;  %s1582_s23 = sadd.s32 1, %s3193_s30 }
  0x3a   : > { %496 = vmatprep.subr.mxu0 %v434_v2  ;;  %585 = vmatprep.subr.mxu1 %v436_v3  ;;  %v435_v5 = vld [vmem:[%s5035_s2 + $0x70] sm:$0xff]  ;;  %v430_v6 = vld [vmem:[%s5035_s2 + $0x48] sm:$0xff]  ;;  %v432_v7 = vld [vmem:[%s5035_s2 + $0x58] sm:$0xff]  ;;  %s1934_s24 = sadd.s32 2, %s3193_s30  ;;  %s2286_s25 = sadd.s32 3, %s3193_s30 }
  0x3b   : > { %497 = vmatpush1.msra.mxu0 %v433_v4  ;;  %586 = vmatpush1.msra.mxu1 %v435_v5  ;;  %v429_v8 = vld [vmem:[%s5035_s2 + $0x40] sm:$0xff]  ;;  %v431_v9 = vld [vmem:[%s5035_s2 + $0x50] sm:$0xff]  ;;  %v426_v10 = vld [vmem:[%s5035_s2 + $0x28] sm:$0xff]  ;;  %p2550_p4 = scmp.ne.s32.totalorder %s3055_s11, 1 }
  0x3c   : > { %498 = vmatprep.subr.mxu0 %v430_v6  ;;  %587 = vmatprep.subr.mxu1 %v432_v7  ;;  %v428_v11 = vld [vmem:[%s5035_s2 + $0x38] sm:$0xff]  ;;  %v425_v12 = vld [vmem:[%s5035_s2 + $0x20] sm:$0xff]  ;;  %v427_v13 = vld [vmem:[%s5035_s2 + $0x30] sm:$0xff] }
  0x3d   : > { %499 = vmatpush1.msra.mxu0 %v429_v8  ;;  %588 = vmatpush1.msra.mxu1 %v431_v9  ;;  %v422_v14 = vld [vmem:[%s5035_s2 + $0x8] sm:$0xff]  ;;  %v424_v15 = vld [vmem:[%s5035_s2 + $0x18] sm:$0xff]  ;;  %v421_v16 = vld [vmem:[%s5035_s2] sm:$0xff] }
  0x3e   : > { %500 = vmatprep.subr.mxu0 %v426_v10  ;;  %589 = vmatprep.subr.mxu1 %v428_v11  ;;  %v423_v17 = vld [vmem:[%s5035_s2 + $0x10] sm:$0xff]  ;;  %v417_v18 = vld [vmem:[%s3200_s18] sm:$0xff]  ;;  %v418_v56 = vld [vmem:[%s3200_s18 + $0x8] sm:$0xff] }
  0x3f   : > { %501 = vmatpush1.msra.mxu0 %v425_v12  ;;  %590 = vmatpush1.msra.mxu1 %v427_v13  ;;  %v3252_v19 = vld [vmem:[#allocation9 + $0x1e8] sm:$0xff]  ;;  %v3255_v21 = vld [vmem:[#allocation9 + $0x1f8] sm:$0xff]  ;;  %v3258_v22 = vld [vmem:[#allocation9 + $0x1e0] sm:$0xff] }
  0x40   : > { %502 = vmatprep.subr.mxu0 %v422_v14  ;;  %591 = vmatprep.subr.mxu1 %v424_v15  ;;  %v3260_v23 = vld [vmem:[#allocation9 + $0x1f0] sm:$0xff]  ;;  %v3264_v24 = vld [vmem:[#allocation9 + $0x1c8] sm:$0xff]  ;;  %v3266_v25 = vld [vmem:[#allocation9 + $0x1d8] sm:$0xff] }
  0x41   : > { %503 = vmatpush1.msra.mxu0 %v421_v16  ;;  %536 = vmatprep.mubr.f32.mxu0 %v5044_v20  ;;  %v3270_v26 = vld [vmem:[#allocation9 + $0x1c0] sm:$0xff]  ;;  %v3272_v27 = vld [vmem:[#allocation9 + $0x1d0] sm:$0xff]  ;;  %v3276_v28 = vld [vmem:[#allocation9 + $0x1a8] sm:$0xff] }
  0x42   : > { %592 = vmatpush1.msra.mxu1 %v423_v17  ;;  %2516 = vmatmul.mubr.msk.f32.vlgmr.msra.gmra.mxu0 %vm459_vm0, %v417_v18  ;;  %v3278_v29 = vld [vmem:[#allocation9 + $0x1b8] sm:$0xff]  ;;  %v3282_v30 = vld [vmem:[#allocation9 + $0x1a0] sm:$0xff]  ;;  %v3284_v31 = vld [vmem:[#allocation9 + $0x1b0] sm:$0xff] }
  0x43   : > { %625 = vmatprep.mubr.f32.mxu1 %v5044_v20  ;;  %874 = vmatprep.subr.mxu0 %v3252_v19  ;;  %v3288_v32 = vld [vmem:[#allocation9 + $0x188] sm:$0xff]  ;;  %v3290_v33 = vld [vmem:[#allocation9 + $0x198] sm:$0xff]  ;;  %v3294_v34 = vld [vmem:[#allocation9 + $0x180] sm:$0xff] }
  0x44   : > { %945 = vmatprep.subr.mxu1 %v3255_v21  ;;  %2520 = vmatmul.mubr.msk.f32.vlgmr.msra.gmra.mxu1 %vm459_vm0, %v417_v18  ;;  %v3296_v35 = vld [vmem:[#allocation9 + $0x190] sm:$0xff]  ;;  %v3300_v36 = vld [vmem:[#allocation9 + $0x168] sm:$0xff]  ;;  %v3302_v37 = vld [vmem:[#allocation9 + $0x178] sm:$0xff] }
  0x45   : > { %875 = vmatpush1.msra.mxu0 %v3258_v22  ;;  %946 = vmatpush1.msra.mxu1 %v3260_v23  ;;  %v3306_v38 = vld [vmem:[#allocation9 + $0x160] sm:$0xff]  ;;  %v3308_v39 = vld [vmem:[#allocation9 + $0x170] sm:$0xff]  ;;  %v3312_v40 = vld [vmem:[#allocation9 + $0x148] sm:$0xff] }
  0x46   : > { %876 = vmatprep.subr.mxu0 %v3264_v24  ;;  %947 = vmatprep.subr.mxu1 %v3266_v25  ;;  %v3314_v41 = vld [vmem:[#allocation9 + $0x158] sm:$0xff]  ;;  %v3318_v42 = vld [vmem:[#allocation9 + $0x140] sm:$0xff]  ;;  %v3320_v43 = vld [vmem:[#allocation9 + $0x150] sm:$0xff] }
  0x47   : > { %877 = vmatpush1.msra.mxu0 %v3270_v26  ;;  %948 = vmatpush1.msra.mxu1 %v3272_v27  ;;  %v3324_v44 = vld [vmem:[#allocation9 + $0x128] sm:$0xff]  ;;  %v3326_v45 = vld [vmem:[#allocation9 + $0x138] sm:$0xff]  ;;  %v3330_v46 = vld [vmem:[#allocation9 + $0x120] sm:$0xff] }
  0x48   : > { %878 = vmatprep.subr.mxu0 %v3276_v28  ;;  %949 = vmatprep.subr.mxu1 %v3278_v29  ;;  %v3332_v47 = vld [vmem:[#allocation9 + $0x130] sm:$0xff]  ;;  %v3336_v48 = vld [vmem:[#allocation9 + $0x108] sm:$0xff]  ;;  %v3338_v49 = vld [vmem:[#allocation9 + $0x118] sm:$0xff] }
  0x49   : > { %879 = vmatpush1.msra.mxu0 %v3282_v30  ;;  %950 = vmatpush1.msra.mxu1 %v3284_v31  ;;  %v3342_v50 = vld [vmem:[#allocation9 + $0x100] sm:$0xff]  ;;  %v3344_v51 = vld [vmem:[#allocation9 + $0x110] sm:$0xff]  ;;  %v3348_v52 = vld [vmem:[#allocation9 + $0xe8] sm:$0xff] }
  0x4a   : > { %880 = vmatprep.subr.mxu0 %v3288_v32  ;;  %951 = vmatprep.subr.mxu1 %v3290_v33  ;;  %v3350_v53 = vld [vmem:[#allocation9 + $0xf8] sm:$0xff]  ;;  %v3354_v54 = vld [vmem:[#allocation9 + $0xe0] sm:$0xff]  ;;  %v3358_v55 = vld [vmem:[#allocation9 + $0xf0] sm:$0xff] }
  0x4b   : > { %881 = vmatpush1.msra.mxu0 %v3294_v34  ;;  %952 = vmatpush1.msra.mxu1 %v3296_v35  ;;  %v3363_v57 = vld [vmem:[#allocation9 + $0xc8] sm:$0xff]  ;;  %v3365_v58 = vld [vmem:[#allocation9 + $0xd8] sm:$0xff]  ;;  %v3369_v59 = vld [vmem:[#allocation9 + $0xc0] sm:$0xff] }
  0x4c   : > { %882 = vmatprep.subr.mxu0 %v3300_v36  ;;  %953 = vmatprep.subr.mxu1 %v3302_v37  ;;  %v3373_v60 = vld [vmem:[#allocation9 + $0xd0] sm:$0xff]  ;;  %v3375_v61 = vld [vmem:[#allocation9 + $0xa8] sm:$0xff]  ;;  %v3379_v62 = vld [vmem:[#allocation9 + $0xb8] sm:$0xff] }
  0x4d   : > { %883 = vmatpush1.msra.mxu0 %v3306_v38  ;;  %954 = vmatpush1.msra.mxu1 %v3308_v39  ;;  %5371 = vst [vmem:[#allocation15_spill] sm:$0xff] %v3375_v61  ;;  %5372 = vst [vmem:[#allocation16_spill] sm:$0xff] %v3379_v62  ;;  %v3383_v63 = vld [vmem:[#allocation9 + $0xa0] sm:$0xff]  ;;  %v3387_v0 = vld [vmem:[#allocation9 + $0xb0] sm:$0xff] }
  0x4e   : > { %884 = vmatprep.subr.mxu0 %v3312_v40  ;;  %955 = vmatprep.subr.mxu1 %v3314_v41  ;;  %5373 = vst [vmem:[#allocation17_spill] sm:$0xff] %v3383_v63  ;;  %5374 = vst [vmem:[#allocation18_spill] sm:$0xff] %v3387_v0  ;;  %v419_v1 = vld [vmem:[%s3200_s18 + $0x10] sm:$0xff]  ;;  %v3394_v3 = vld [vmem:[#allocation9 + $0x98] sm:$0xff] }
  0x4f   : > { %885 = vmatpush1.msra.mxu0 %v3318_v42  ;;  %956 = vmatpush1.msra.mxu1 %v3320_v43  ;;  %v3392_v2 = vld [vmem:[#allocation9 + $0x88] sm:$0xff]  ;;  %5376 = vst [vmem:[#allocation20_spill] sm:$0xff] %v3394_v3  ;;  %v3398_v4 = vld [vmem:[#allocation9 + $0x80] sm:$0xff]  ;;  %v3402_v5 = vld [vmem:[#allocation9 + $0x90] sm:$0xff] }
  0x50   : > { %886 = vmatprep.subr.mxu0 %v3324_v44  ;;  %957 = vmatprep.subr.mxu1 %v3326_v45  ;;  %5375 = vst [vmem:[#allocation19_spill] sm:$0xff] %v3392_v2  ;;  %5377 = vst [vmem:[#allocation21_spill] sm:$0xff] %v3398_v4  ;;  %v3404_v6 = vld [vmem:[#allocation9 + $0x68] sm:$0xff]  ;;  %v3408_v7 = vld [vmem:[#allocation9 + $0x78] sm:$0xff] }
  0x51   : > { %887 = vmatpush1.msra.mxu0 %v3330_v46  ;;  %958 = vmatpush1.msra.mxu1 %v3332_v47  ;;  %5378 = vst [vmem:[#allocation22_spill] sm:$0xff] %v3402_v5  ;;  %5379 = vst [vmem:[#allocation23_spill] sm:$0xff] %v3404_v6  ;;  %v3412_v8 = vld [vmem:[#allocation9 + $0x60] sm:$0xff]  ;;  %v3416_v9 = vld [vmem:[#allocation9 + $0x70] sm:$0xff] }
  0x52   : > { %888 = vmatprep.subr.mxu0 %v3336_v48  ;;  %959 = vmatprep.subr.mxu1 %v3338_v49  ;;  %5380 = vst [vmem:[#allocation24_spill] sm:$0xff] %v3408_v7  ;;  %5381 = vst [vmem:[#allocation25_spill] sm:$0xff] %v3412_v8  ;;  %v420_v10 = vld [vmem:[%s3200_s18 + $0x18] sm:$0xff]  ;;  %v3423_v12 = vld [vmem:[#allocation9 + $0x58] sm:$0xff] }
  0x53   : > { %889 = vmatpush1.msra.mxu0 %v3342_v50  ;;  %960 = vmatpush1.msra.mxu1 %v3344_v51  ;;  %5382 = vst [vmem:[#allocation26_spill] sm:$0xff] %v3416_v9  ;;  %v3421_v11 = vld [vmem:[#allocation9 + $0x48] sm:$0xff]  ;;  %5384 = vst [vmem:[#allocation28_spill] sm:$0xff] %v3423_v12  ;;  %v3427_v13 = vld [vmem:[#allocation9 + $0x40] sm:$0xff] }
  0x54   : > { %890 = vmatprep.subr.mxu0 %v3348_v52  ;;  %961 = vmatprep.subr.mxu1 %v3350_v53  ;;  %5383 = vst [vmem:[#allocation27_spill] sm:$0xff] %v3421_v11  ;;  %5385 = vst [vmem:[#allocation29_spill] sm:$0xff] %v3427_v13  ;;  %v3431_v14 = vld [vmem:[#allocation9 + $0x50] sm:$0xff]  ;;  %v3433_v15 = vld [vmem:[#allocation9 + $0x28] sm:$0xff] }
  0x55   : > { %542 = vmatprep.mubr.f32.mxu0 %v5044_v20  ;;  %891 = vmatpush1.msra.mxu0 %v3354_v54  ;;  %5386 = vst [vmem:[#allocation30_spill] sm:$0xff] %v3431_v14  ;;  %5387 = vst [vmem:[#allocation31_spill] sm:$0xff] %v3433_v15  ;;  %v3437_v16 = vld [vmem:[#allocation9 + $0x38] sm:$0xff]  ;;  %v3441_v17 = vld [vmem:[#allocation9 + $0x20] sm:$0xff] }
  0x56   : > { %962 = vmatpush1.msra.mxu1 %v3358_v55  ;;  %2517 = vmatmul.mubr.msk.f32.gmra.mxu0 %vm459_vm0, %v418_v56  ;;  %5388 = vst [vmem:[#allocation32_spill] sm:$0xff] %v3437_v16  ;;  %5389 = vst [vmem:[#allocation33_spill] sm:$0xff] %v3441_v17  ;;  %v3443_v18 = vld [vmem:[#allocation9 + $0x30] sm:$0xff] }
  0x57   : > { %892 = vmatprep.subr.mxu0 %v3363_v57  ;;  %963 = vmatprep.subr.mxu1 %v3365_v58  ;;  %5390 = vst [vmem:[#allocation34_spill] sm:$0xff] %v3443_v18 }
  0x58   : > { %631 = vmatprep.mubr.f32.mxu1 %v5044_v20  ;;  %893 = vmatpush1.msra.mxu0 %v3369_v59 }
  0x59   : > { %964 = vmatpush1.msra.mxu1 %v3373_v60  ;;  %894 = vmatprep.subr.mxu0 %v3375_v61 }
  0x5a   : > { %2521 = vmatmul.mubr.msk.f32.gmra.mxu1 %vm459_vm0, %v418_v56  ;;  %965 = vmatprep.subr.mxu1 %v3379_v62  ;;  %v3447_v56 = vld [vmem:[#allocation9 + $0x8] sm:$0xff] }
  0x5b   : > { %548 = vmatprep.mubr.f32.mxu0 %v5044_v20  ;;  %895 = vmatpush1.msra.mxu0 %v3383_v63  ;;  %5391 = vst [vmem:[#allocation35_spill] sm:$0xff] %v3447_v56 }
  0x5c   : > { %966 = vmatpush1.msra.mxu1 %v3387_v0  ;;  %2518 = vmatmul.mubr.msk.f32.gmra.mxu0 %vm459_vm0, %v419_v1 }
  0x5d   : > { %896 = vmatprep.subr.mxu0 %v3392_v2  ;;  %967 = vmatprep.subr.mxu1 %v3394_v3 }
  0x5e   : > { %637 = vmatprep.mubr.f32.mxu1 %v5044_v20  ;;  %897 = vmatpush1.msra.mxu0 %v3398_v4 }
  0x5f   : > { %968 = vmatpush1.msra.mxu1 %v3402_v5  ;;  %898 = vmatprep.subr.mxu0 %v3404_v6 }
  0x60   : > { %2522 = vmatmul.mubr.msk.f32.gmra.mxu1 %vm459_vm0, %v419_v1  ;;  %969 = vmatprep.subr.mxu1 %v3408_v7  ;;  %v3449_v1 = vld [vmem:[#allocation9 + $0x18] sm:$0xff] }
  0x61   : > { %554 = vmatprep.mubr.f32.mxu0 %v5044_v20  ;;  %899 = vmatpush1.msra.mxu0 %v3412_v8  ;;  %5392 = vst [vmem:[#allocation36_spill] sm:$0xff] %v3449_v1 }
  0x62   : > { %970 = vmatpush1.msra.mxu1 %v3416_v9  ;;  %2519 = vmatmul.mubr.msk.f32.gmra.mxu0 %vm459_vm0, %v420_v10 }
  0x63   : > { %900 = vmatprep.subr.mxu0 %v3421_v11  ;;  %971 = vmatprep.subr.mxu1 %v3423_v12  ;;  %v3453_v12 = vld [vmem:[#allocation9] sm:$0xff] }
  0x64   : > { %643 = vmatprep.mubr.f32.mxu1 %v5044_v20  ;;  %901 = vmatpush1.msra.mxu0 %v3427_v13  ;;  %5393 = vst [vmem:[#allocation37_spill] sm:$0xff] %v3453_v12  ;;  %v3457_v20 = vld [vmem:[#allocation9 + $0x10] sm:$0xff]  ;;  %v3791_v13 = vld [vmem:[#allocation11 + $0x280] sm:$0xff] }
  0x65   : > { %972 = vmatpush1.msra.mxu1 %v3431_v14  ;;  %902 = vmatprep.subr.mxu0 %v3433_v15  ;;  %5394 = vst [vmem:[#allocation38_spill] sm:$0xff] %v3457_v20  ;;  %v862_v15 = vld [vmem:[#allocation3] sm:$0xff]  ;;  %v5395_v14 = vmov 0.0   ;;  %5506 = vst [vmem:[#allocation149_spill] sm:$0xff] %v3791_v13 }
  0x66   : > { %2523 = vmatmul.mubr.msk.f32.gmra.mxu1 %vm459_vm0, %v420_v10  ;;  %973 = vmatprep.subr.mxu1 %v3437_v16  ;;  %v3465_v10 = vld [vmem:[#allocation11 + $0x1e8] sm:$0xff]  ;;  %v3775_v16 = vld [vmem:[#allocation11 + $0x2b8] sm:$0xff] }
  0x67   : > { %903 = vmatpush1.msra.mxu0 %v3441_v17  ;;  %974 = vmatpush1.msra.mxu1 %v3443_v18  ;;  %5396 = vst [vmem:[#allocation39_spill] sm:$0xff] %v3465_v10  ;;  %v3467_v18 = vld [vmem:[#allocation11 + $0x1f8] sm:$0xff]  ;;  %v3469_v17 = vld [vmem:[#allocation11 + $0x1e0] sm:$0xff]  ;;  %5501 = vst [vmem:[#allocation144_spill] sm:$0xff] %v3775_v16 }
  0x68   : > { %904 = vmatprep.subr.mxu0 %v3447_v56  ;;  %975 = vmatprep.subr.mxu1 %v3449_v1  ;;  %5397 = vst [vmem:[#allocation40_spill] sm:$0xff] %v3467_v18  ;;  %5398 = vst [vmem:[#allocation41_spill] sm:$0xff] %v3469_v17  ;;  %v3473_v1 = vld [vmem:[#allocation11 + $0x1f0] sm:$0xff]  ;;  %v3767_v56 = vld [vmem:[#allocation11 + $0x2c0] sm:$0xff] }
  0x69   : > { %905 = vmatpush1.msra.mxu0 %v3453_v12  ;;  %938 = vmatprep.mubr.f32.mxu0 %v5395_v14  ;;  %5399 = vst [vmem:[#allocation42_spill] sm:$0xff] %v3473_v1  ;;  %v3485_v12 = vld [vmem:[#allocation11 + $0x1d0] sm:$0xff]  ;;  %5498 = vst [vmem:[#allocation141_spill] sm:$0xff] %v3767_v56 }
  0x6a   : > { %976 = vmatpush1.msra.mxu1 %v3457_v20  ;;  %1009 = vmatprep.mubr.f32.mxu1 %v5395_v14  ;;  %v3477_v20 = vld [vmem:[#allocation11 + $0x1c8] sm:$0xff]  ;;  %v3479_v14 = vld [vmem:[#allocation11 + $0x1d8] sm:$0xff]  ;;  %5403 = vst [vmem:[#allocation46_spill] sm:$0xff] %v3485_v12 }
  0x6b   : > { %939 = vmatmul.mubr.f32.vlgmr.msra.gmra.mxu0 %v862_v15  ;;  %1010 = vmatmul.mubr.f32.vlgmr.msra.gmra.mxu1 %v862_v15  ;;  %5400 = vst [vmem:[#allocation43_spill] sm:$0xff] %v3477_v20  ;;  %5401 = vst [vmem:[#allocation44_spill] sm:$0xff] %v3479_v14  ;;  %v3481_v15 = vld [vmem:[#allocation11 + $0x1c0] sm:$0xff] }
  0x6c   : > { %1065 = vmatprep.subr.mxu0 %v3465_v10  ;;  %1136 = vmatprep.subr.mxu1 %v3467_v18  ;;  %5402 = vst [vmem:[#allocation45_spill] sm:$0xff] %v3481_v15  ;;  %v3489_v18 = vld [vmem:[#allocation11 + $0x1a8] sm:$0xff]  ;;  %v3497_v10 = vld [vmem:[#allocation11 + $0x1b0] sm:$0xff] }
  0x6d   : > { %1066 = vmatpush1.msra.mxu0 %v3469_v17  ;;  %1137 = vmatpush1.msra.mxu1 %v3473_v1  ;;  %5404 = vst [vmem:[#allocation47_spill] sm:$0xff] %v3489_v18  ;;  %v3491_v17 = vld [vmem:[#allocation11 + $0x1b8] sm:$0xff]  ;;  %v3495_v1 = vld [vmem:[#allocation11 + $0x1a0] sm:$0xff]  ;;  %5407 = vst [vmem:[#allocation50_spill] sm:$0xff] %v3497_v10 }
  0x6e   : > { %1067 = vmatprep.subr.mxu0 %v3477_v20  ;;  %1138 = vmatprep.subr.mxu1 %v3479_v14  ;;  %5405 = vst [vmem:[#allocation48_spill] sm:$0xff] %v3491_v17  ;;  %5406 = vst [vmem:[#allocation49_spill] sm:$0xff] %v3495_v1  ;;  %v3501_v14 = vld [vmem:[#allocation11 + $0x188] sm:$0xff]  ;;  %v3759_v20 = vld [vmem:[#allocation11 + $0x2f0] sm:$0xff] }
  0x6f   : > { %1068 = vmatpush1.msra.mxu0 %v3481_v15  ;;  %1139 = vmatpush1.msra.mxu1 %v3485_v12  ;;  %5408 = vst [vmem:[#allocation51_spill] sm:$0xff] %v3501_v14  ;;  %v3503_v15 = vld [vmem:[#allocation11 + $0x198] sm:$0xff]  ;;  %v3507_v12 = vld [vmem:[#allocation11 + $0x180] sm:$0xff]  ;;  %5495 = vst [vmem:[#allocation138_spill] sm:$0xff] %v3759_v20 }
  0x70   : > { %1069 = vmatprep.subr.mxu0 %v3489_v18  ;;  %1140 = vmatprep.subr.mxu1 %v3491_v17  ;;  %5409 = vst [vmem:[#allocation52_spill] sm:$0xff] %v3503_v15  ;;  %5410 = vst [vmem:[#allocation53_spill] sm:$0xff] %v3507_v12  ;;  %v3509_v18 = vld [vmem:[#allocation11 + $0x190] sm:$0xff]  ;;  %v3513_v17 = vld [vmem:[#allocation11 + $0x168] sm:$0xff] }
  0x71   : > { %1070 = vmatpush1.msra.mxu0 %v3495_v1  ;;  %1141 = vmatpush1.msra.mxu1 %v3497_v10  ;;  %5411 = vst [vmem:[#allocation54_spill] sm:$0xff] %v3509_v18  ;;  %5412 = vst [vmem:[#allocation55_spill] sm:$0xff] %v3513_v17  ;;  %v3515_v1 = vld [vmem:[#allocation11 + $0x178] sm:$0xff]  ;;  %v3519_v10 = vld [vmem:[#allocation11 + $0x160] sm:$0xff] }
  0x72   : > { %1071 = vmatprep.subr.mxu0 %v3501_v14  ;;  %1142 = vmatprep.subr.mxu1 %v3503_v15  ;;  %5413 = vst [vmem:[#allocation56_spill] sm:$0xff] %v3515_v1  ;;  %5414 = vst [vmem:[#allocation57_spill] sm:$0xff] %v3519_v10  ;;  %v3521_v14 = vld [vmem:[#allocation11 + $0x170] sm:$0xff]  ;;  %v3525_v15 = vld [vmem:[#allocation11 + $0x148] sm:$0xff] }
  0x73   : > { %1072 = vmatpush1.msra.mxu0 %v3507_v12  ;;  %1143 = vmatpush1.msra.mxu1 %v3509_v18  ;;  %5415 = vst [vmem:[#allocation58_spill] sm:$0xff] %v3521_v14  ;;  %5416 = vst [vmem:[#allocation59_spill] sm:$0xff] %v3525_v15  ;;  %v3527_v12 = vld [vmem:[#allocation11 + $0x158] sm:$0xff]  ;;  %v3531_v18 = vld [vmem:[#allocation11 + $0x140] sm:$0xff] }
  0x74   : > { %1073 = vmatprep.subr.mxu0 %v3513_v17  ;;  %1144 = vmatprep.subr.mxu1 %v3515_v1  ;;  %5417 = vst [vmem:[#allocation60_spill] sm:$0xff] %v3527_v12  ;;  %5418 = vst [vmem:[#allocation61_spill] sm:$0xff] %v3531_v18  ;;  %v3533_v17 = vld [vmem:[#allocation11 + $0x150] sm:$0xff]  ;;  %v3537_v1 = vld [vmem:[#allocation11 + $0x128] sm:$0xff] }
  0x75   : > { %1074 = vmatpush1.msra.mxu0 %v3519_v10  ;;  %1145 = vmatpush1.msra.mxu1 %v3521_v14  ;;  %5419 = vst [vmem:[#allocation62_spill] sm:$0xff] %v3533_v17  ;;  %5420 = vst [vmem:[#allocation63_spill] sm:$0xff] %v3537_v1  ;;  %v3539_v10 = vld [vmem:[#allocation11 + $0x138] sm:$0xff]  ;;  %v3543_v14 = vld [vmem:[#allocation11 + $0x120] sm:$0xff] }
  0x76   : > { %1075 = vmatprep.subr.mxu0 %v3525_v15  ;;  %1146 = vmatprep.subr.mxu1 %v3527_v12  ;;  %5421 = vst [vmem:[#allocation64_spill] sm:$0xff] %v3539_v10  ;;  %5422 = vst [vmem:[#allocation65_spill] sm:$0xff] %v3543_v14  ;;  %v3545_v15 = vld [vmem:[#allocation11 + $0x130] sm:$0xff]  ;;  %v3549_v12 = vld [vmem:[#allocation11 + $0x108] sm:$0xff] }
  0x77   : > { %1076 = vmatpush1.msra.mxu0 %v3531_v18  ;;  %1147 = vmatpush1.msra.mxu1 %v3533_v17  ;;  %5423 = vst [vmem:[#allocation66_spill] sm:$0xff] %v3545_v15  ;;  %5424 = vst [vmem:[#allocation67_spill] sm:$0xff] %v3549_v12  ;;  %v3551_v18 = vld [vmem:[#allocation11 + $0x118] sm:$0xff]  ;;  %v3555_v17 = vld [vmem:[#allocation11 + $0x100] sm:$0xff] }
  0x78   : > { %1077 = vmatprep.subr.mxu0 %v3537_v1  ;;  %1148 = vmatprep.subr.mxu1 %v3539_v10  ;;  %5425 = vst [vmem:[#allocation68_spill] sm:$0xff] %v3551_v18  ;;  %5426 = vst [vmem:[#allocation69_spill] sm:$0xff] %v3555_v17  ;;  %v3557_v1 = vld [vmem:[#allocation11 + $0x110] sm:$0xff]  ;;  %v3561_v10 = vld [vmem:[#allocation11 + $0xe8] sm:$0xff] }
  0x79   : > { %1078 = vmatpush1.msra.mxu0 %v3543_v14  ;;  %1149 = vmatpush1.msra.mxu1 %v3545_v15  ;;  %5427 = vst [vmem:[#allocation70_spill] sm:$0xff] %v3557_v1  ;;  %5428 = vst [vmem:[#allocation71_spill] sm:$0xff] %v3561_v10  ;;  %v3563_v14 = vld [vmem:[#allocation11 + $0xf8] sm:$0xff]  ;;  %v3567_v15 = vld [vmem:[#allocation11 + $0xe0] sm:$0xff] }
  0x7a   : > { %1079 = vmatprep.subr.mxu0 %v3549_v12  ;;  %1150 = vmatprep.subr.mxu1 %v3551_v18  ;;  %5429 = vst [vmem:[#allocation72_spill] sm:$0xff] %v3563_v14  ;;  %5430 = vst [vmem:[#allocation73_spill] sm:$0xff] %v3567_v15  ;;  %v3569_v12 = vld [vmem:[#allocation11 + $0xf0] sm:$0xff]  ;;  %v3573_v18 = vld [vmem:[#allocation11 + $0xc8] sm:$0xff] }
  0x7b   : > { %1080 = vmatpush1.msra.mxu0 %v3555_v17  ;;  %1151 = vmatpush1.msra.mxu1 %v3557_v1  ;;  %5431 = vst [vmem:[#allocation74_spill] sm:$0xff] %v3569_v12  ;;  %5432 = vst [vmem:[#allocation75_spill] sm:$0xff] %v3573_v18  ;;  %v3575_v17 = vld [vmem:[#allocation11 + $0xd8] sm:$0xff]  ;;  %v3579_v1 = vld [vmem:[#allocation11 + $0xc0] sm:$0xff] }
  0x7c   : > { %1081 = vmatprep.subr.mxu0 %v3561_v10  ;;  %1152 = vmatprep.subr.mxu1 %v3563_v14  ;;  %5433 = vst [vmem:[#allocation76_spill] sm:$0xff] %v3575_v17  ;;  %5434 = vst [vmem:[#allocation77_spill] sm:$0xff] %v3579_v1  ;;  %v3581_v10 = vld [vmem:[#allocation11 + $0xd0] sm:$0xff]  ;;  %v3585_v14 = vld [vmem:[#allocation11 + $0xa8] sm:$0xff] }
  0x7d   : > { %1082 = vmatpush1.msra.mxu0 %v3567_v15  ;;  %1153 = vmatpush1.msra.mxu1 %v3569_v12  ;;  %5435 = vst [vmem:[#allocation78_spill] sm:$0xff] %v3581_v10  ;;  %5436 = vst [vmem:[#allocation79_spill] sm:$0xff] %v3585_v14  ;;  %v3587_v15 = vld [vmem:[#allocation11 + $0xb8] sm:$0xff]  ;;  %v3591_v12 = vld [vmem:[#allocation11 + $0xa0] sm:$0xff] }
  0x7e   : > { %1083 = vmatprep.subr.mxu0 %v3573_v18  ;;  %1154 = vmatprep.subr.mxu1 %v3575_v17  ;;  %5437 = vst [vmem:[#allocation80_spill] sm:$0xff] %v3587_v15  ;;  %5438 = vst [vmem:[#allocation81_spill] sm:$0xff] %v3591_v12  ;;  %v3593_v18 = vld [vmem:[#allocation11 + $0xb0] sm:$0xff]  ;;  %v3597_v17 = vld [vmem:[#allocation11 + $0x88] sm:$0xff] }
  0x7f   : > { %1084 = vmatpush1.msra.mxu0 %v3579_v1  ;;  %1155 = vmatpush1.msra.mxu1 %v3581_v10  ;;  %5439 = vst [vmem:[#allocation82_spill] sm:$0xff] %v3593_v18  ;;  %5440 = vst [vmem:[#allocation83_spill] sm:$0xff] %v3597_v17  ;;  %v3599_v1 = vld [vmem:[#allocation11 + $0x98] sm:$0xff]  ;;  %v3603_v10 = vld [vmem:[#allocation11 + $0x80] sm:$0xff] }
  0x80   : > { %1085 = vmatprep.subr.mxu0 %v3585_v14  ;;  %1156 = vmatprep.subr.mxu1 %v3587_v15  ;;  %5441 = vst [vmem:[#allocation84_spill] sm:$0xff] %v3599_v1  ;;  %5442 = vst [vmem:[#allocation85_spill] sm:$0xff] %v3603_v10  ;;  %v3605_v14 = vld [vmem:[#allocation11 + $0x90] sm:$0xff]  ;;  %v3609_v15 = vld [vmem:[#allocation11 + $0x68] sm:$0xff] }
  0x81   : > { %1086 = vmatpush1.msra.mxu0 %v3591_v12  ;;  %1157 = vmatpush1.msra.mxu1 %v3593_v18  ;;  %5443 = vst [vmem:[#allocation86_spill] sm:$0xff] %v3605_v14  ;;  %5444 = vst [vmem:[#allocation87_spill] sm:$0xff] %v3609_v15  ;;  %v3611_v12 = vld [vmem:[#allocation11 + $0x78] sm:$0xff]  ;;  %v3615_v18 = vld [vmem:[#allocation11 + $0x60] sm:$0xff] }
  0x82   : > { %1087 = vmatprep.subr.mxu0 %v3597_v17  ;;  %1158 = vmatprep.subr.mxu1 %v3599_v1  ;;  %5445 = vst [vmem:[#allocation88_spill] sm:$0xff] %v3611_v12  ;;  %5446 = vst [vmem:[#allocation89_spill] sm:$0xff] %v3615_v18  ;;  %v3617_v17 = vld [vmem:[#allocation11 + $0x70] sm:$0xff]  ;;  %v3621_v1 = vld [vmem:[#allocation11 + $0x48] sm:$0xff] }
  0x83   : > { %1088 = vmatpush1.msra.mxu0 %v3603_v10  ;;  %1159 = vmatpush1.msra.mxu1 %v3605_v14  ;;  %5447 = vst [vmem:[#allocation90_spill] sm:$0xff] %v3617_v17  ;;  %5448 = vst [vmem:[#allocation91_spill] sm:$0xff] %v3621_v1  ;;  %v3623_v10 = vld [vmem:[#allocation11 + $0x58] sm:$0xff]  ;;  %v3627_v14 = vld [vmem:[#allocation11 + $0x40] sm:$0xff] }
  0x84   : > { %1089 = vmatprep.subr.mxu0 %v3609_v15  ;;  %1160 = vmatprep.subr.mxu1 %v3611_v12  ;;  %5449 = vst [vmem:[#allocation92_spill] sm:$0xff] %v3623_v10  ;;  %5450 = vst [vmem:[#allocation93_spill] sm:$0xff] %v3627_v14  ;;  %v3629_v15 = vld [vmem:[#allocation11 + $0x50] sm:$0xff]  ;;  %v3633_v12 = vld [vmem:[#allocation11 + $0x28] sm:$0xff] }
  0x85   : > { %1090 = vmatpush1.msra.mxu0 %v3615_v18  ;;  %1161 = vmatpush1.msra.mxu1 %v3617_v17  ;;  %5451 = vst [vmem:[#allocation94_spill] sm:$0xff] %v3629_v15  ;;  %5452 = vst [vmem:[#allocation95_spill] sm:$0xff] %v3633_v12  ;;  %v3635_v18 = vld [vmem:[#allocation11 + $0x38] sm:$0xff]  ;;  %v3639_v17 = vld [vmem:[#allocation11 + $0x20] sm:$0xff] }
  0x86   : > { %1091 = vmatprep.subr.mxu0 %v3621_v1  ;;  %1162 = vmatprep.subr.mxu1 %v3623_v10  ;;  %5453 = vst [vmem:[#allocation96_spill] sm:$0xff] %v3635_v18  ;;  %5454 = vst [vmem:[#allocation97_spill] sm:$0xff] %v3639_v17  ;;  %v3641_v1 = vld [vmem:[#allocation11 + $0x30] sm:$0xff]  ;;  %v3645_v10 = vld [vmem:[#allocation11 + $0x8] sm:$0xff] }
  0x87   : > { %1092 = vmatpush1.msra.mxu0 %v3627_v14  ;;  %1163 = vmatpush1.msra.mxu1 %v3629_v15  ;;  %5455 = vst [vmem:[#allocation98_spill] sm:$0xff] %v3641_v1  ;;  %5456 = vst [vmem:[#allocation99_spill] sm:$0xff] %v3645_v10  ;;  %v3647_v14 = vld [vmem:[#allocation11 + $0x18] sm:$0xff]  ;;  %v3651_v15 = vld [vmem:[#allocation11] sm:$0xff] }
  0x88   : > { %1093 = vmatprep.subr.mxu0 %v3633_v12  ;;  %1164 = vmatprep.subr.mxu1 %v3635_v18  ;;  %5457 = vst [vmem:[#allocation100_spill] sm:$0xff] %v3647_v14  ;;  %5458 = vst [vmem:[#allocation101_spill] sm:$0xff] %v3651_v15  ;;  %v3653_v12 = vld [vmem:[#allocation11 + $0x10] sm:$0xff]  ;;  %v3657_v18 = vld [vmem:[#allocation11 + $0x3e8] sm:$0xff] }
  0x89   : > { %1094 = vmatpush1.msra.mxu0 %v3639_v17  ;;  %1165 = vmatpush1.msra.mxu1 %v3641_v1  ;;  %5459 = vst [vmem:[#allocation102_spill] sm:$0xff] %v3653_v12  ;;  %5460 = vst [vmem:[#allocation103_spill] sm:$0xff] %v3657_v18  ;;  %v3659_v17 = vld [vmem:[#allocation11 + $0x3f8] sm:$0xff]  ;;  %v3663_v1 = vld [vmem:[#allocation11 + $0x3e0] sm:$0xff] }
  0x8a   : > { %1095 = vmatprep.subr.mxu0 %v3645_v10  ;;  %1166 = vmatprep.subr.mxu1 %v3647_v14  ;;  %5461 = vst [vmem:[#allocation104_spill] sm:$0xff] %v3659_v17  ;;  %5462 = vst [vmem:[#allocation105_spill] sm:$0xff] %v3663_v1  ;;  %v3665_v10 = vld [vmem:[#allocation11 + $0x3f0] sm:$0xff]  ;;  %v3669_v14 = vld [vmem:[#allocation11 + $0x3c8] sm:$0xff] }
  0x8b   : > { %1096 = vmatpush1.msra.mxu0 %v3651_v15  ;;  %1167 = vmatpush1.msra.mxu1 %v3653_v12  ;;  %5463 = vst [vmem:[#allocation106_spill] sm:$0xff] %v3665_v10  ;;  %5464 = vst [vmem:[#allocation107_spill] sm:$0xff] %v3669_v14  ;;  %v3671_v15 = vld [vmem:[#allocation11 + $0x3d8] sm:$0xff]  ;;  %v3675_v12 = vld [vmem:[#allocation11 + $0x3c0] sm:$0xff] }
  0x8c   : > { %1097 = vmatprep.subr.mxu0 %v3657_v18  ;;  %1168 = vmatprep.subr.mxu1 %v3659_v17  ;;  %5465 = vst [vmem:[#allocation108_spill] sm:$0xff] %v3671_v15  ;;  %5466 = vst [vmem:[#allocation109_spill] sm:$0xff] %v3675_v12  ;;  %v3677_v18 = vld [vmem:[#allocation11 + $0x3d0] sm:$0xff]  ;;  %v3681_v17 = vld [vmem:[#allocation11 + $0x3a8] sm:$0xff] }
  0x8d   : > { %1098 = vmatpush2.msra.mxu0 %v3663_v1  ;;  %1169 = vmatpush2.msra.mxu1 %v3665_v10  ;;  %5467 = vst [vmem:[#allocation110_spill] sm:$0xff] %v3677_v18  ;;  %5468 = vst [vmem:[#allocation111_spill] sm:$0xff] %v3681_v17  ;;  %v3683_v1 = vld [vmem:[#allocation11 + $0x3b8] sm:$0xff]  ;;  %v3687_v10 = vld [vmem:[#allocation11 + $0x3a0] sm:$0xff] }
  0x8e   : > { %1099 = vmatprep.subr.mxu0 %v3669_v14  ;;  %1170 = vmatprep.subr.mxu1 %v3671_v15  ;;  %5469 = vst [vmem:[#allocation112_spill] sm:$0xff] %v3683_v1  ;;  %5470 = vst [vmem:[#allocation113_spill] sm:$0xff] %v3687_v10  ;;  %v3689_v14 = vld [vmem:[#allocation11 + $0x3b0] sm:$0xff]  ;;  %v3693_v15 = vld [vmem:[#allocation11 + $0x388] sm:$0xff] }
  0x8f   : > { %1100 = vmatpush2.msra.mxu0 %v3675_v12  ;;  %1171 = vmatpush2.msra.mxu1 %v3677_v18  ;;  %5471 = vst [vmem:[#allocation114_spill] sm:$0xff] %v3689_v14  ;;  %5472 = vst [vmem:[#allocation115_spill] sm:$0xff] %v3693_v15  ;;  %v3695_v12 = vld [vmem:[#allocation11 + $0x398] sm:$0xff]  ;;  %v3699_v18 = vld [vmem:[#allocation11 + $0x380] sm:$0xff] }
  0x90   : > { %1101 = vmatprep.subr.mxu0 %v3681_v17  ;;  %1172 = vmatprep.subr.mxu1 %v3683_v1  ;;  %5473 = vst [vmem:[#allocation116_spill] sm:$0xff] %v3695_v12  ;;  %5474 = vst [vmem:[#allocation117_spill] sm:$0xff] %v3699_v18  ;;  %v3701_v17 = vld [vmem:[#allocation11 + $0x390] sm:$0xff]  ;;  %v3705_v1 = vld [vmem:[#allocation11 + $0x368] sm:$0xff] }
  0x91   : > { %1102 = vmatpush2.msra.mxu0 %v3687_v10  ;;  %1173 = vmatpush2.msra.mxu1 %v3689_v14  ;;  %5475 = vst [vmem:[#allocation118_spill] sm:$0xff] %v3701_v17  ;;  %5476 = vst [vmem:[#allocation119_spill] sm:$0xff] %v3705_v1  ;;  %v3707_v10 = vld [vmem:[#allocation11 + $0x378] sm:$0xff]  ;;  %v3711_v14 = vld [vmem:[#allocation11 + $0x360] sm:$0xff] }
  0x92   : > { %1103 = vmatprep.subr.mxu0 %v3693_v15  ;;  %1174 = vmatprep.subr.mxu1 %v3695_v12  ;;  %5477 = vst [vmem:[#allocation120_spill] sm:$0xff] %v3707_v10  ;;  %5478 = vst [vmem:[#allocation121_spill] sm:$0xff] %v3711_v14  ;;  %v3713_v15 = vld [vmem:[#allocation11 + $0x370] sm:$0xff]  ;;  %v3717_v12 = vld [vmem:[#allocation11 + $0x348] sm:$0xff] }
  0x93   : > { %1104 = vmatpush2.msra.mxu0 %v3699_v18  ;;  %1175 = vmatpush2.msra.mxu1 %v3701_v17  ;;  %5479 = vst [vmem:[#allocation122_spill] sm:$0xff] %v3713_v15  ;;  %5480 = vst [vmem:[#allocation123_spill] sm:$0xff] %v3717_v12  ;;  %v3719_v18 = vld [vmem:[#allocation11 + $0x358] sm:$0xff]  ;;  %v3723_v17 = vld [vmem:[#allocation11 + $0x340] sm:$0xff] }
  0x94   : > { %1105 = vmatprep.subr.mxu0 %v3705_v1  ;;  %1176 = vmatprep.subr.mxu1 %v3707_v10  ;;  %5481 = vst [vmem:[#allocation124_spill] sm:$0xff] %v3719_v18  ;;  %5482 = vst [vmem:[#allocation125_spill] sm:$0xff] %v3723_v17  ;;  %v3725_v1 = vld [vmem:[#allocation11 + $0x350] sm:$0xff]  ;;  %v3729_v10 = vld [vmem:[#allocation11 + $0x328] sm:$0xff] }
  0x95   : > { %1106 = vmatpush2.msra.mxu0 %v3711_v14  ;;  %1177 = vmatpush2.msra.mxu1 %v3713_v15  ;;  %5483 = vst [vmem:[#allocation126_spill] sm:$0xff] %v3725_v1  ;;  %5484 = vst [vmem:[#allocation127_spill] sm:$0xff] %v3729_v10  ;;  %v3731_v14 = vld [vmem:[#allocation11 + $0x338] sm:$0xff]  ;;  %v3735_v15 = vld [vmem:[#allocation11 + $0x320] sm:$0xff] }
  0x96   : > { %1107 = vmatprep.subr.mxu0 %v3717_v12  ;;  %1178 = vmatprep.subr.mxu1 %v3719_v18  ;;  %5485 = vst [vmem:[#allocation128_spill] sm:$0xff] %v3731_v14  ;;  %5486 = vst [vmem:[#allocation129_spill] sm:$0xff] %v3735_v15  ;;  %v3737_v12 = vld [vmem:[#allocation11 + $0x330] sm:$0xff]  ;;  %v3741_v18 = vld [vmem:[#allocation11 + $0x308] sm:$0xff] }
  0x97   : > { %1108 = vmatpush2.msra.mxu0 %v3723_v17  ;;  %1179 = vmatpush2.msra.mxu1 %v3725_v1  ;;  %5487 = vst [vmem:[#allocation130_spill] sm:$0xff] %v3737_v12  ;;  %5488 = vst [vmem:[#allocation131_spill] sm:$0xff] %v3741_v18  ;;  %v3743_v17 = vld [vmem:[#allocation11 + $0x318] sm:$0xff]  ;;  %v3747_v1 = vld [vmem:[#allocation11 + $0x300] sm:$0xff] }
  0x98   : > { %1109 = vmatprep.subr.mxu0 %v3729_v10  ;;  %1180 = vmatprep.subr.mxu1 %v3731_v14  ;;  %5489 = vst [vmem:[#allocation132_spill] sm:$0xff] %v3743_v17  ;;  %5490 = vst [vmem:[#allocation133_spill] sm:$0xff] %v3747_v1  ;;  %v3749_v10 = vld [vmem:[#allocation11 + $0x310] sm:$0xff]  ;;  %v3751_v14 = vld [vmem:[#allocation11 + $0x2e8] sm:$0xff] }
  0x99   : > { %1110 = vmatpush2.msra.mxu0 %v3735_v15  ;;  %1181 = vmatpush2.msra.mxu1 %v3737_v12  ;;  %5491 = vst [vmem:[#allocation134_spill] sm:$0xff] %v3749_v10  ;;  %5492 = vst [vmem:[#allocation135_spill] sm:$0xff] %v3751_v14  ;;  %v3755_v15 = vld [vmem:[#allocation11 + $0x2f8] sm:$0xff]  ;;  %v3757_v12 = vld [vmem:[#allocation11 + $0x2e0] sm:$0xff] }
  0x9a   : > { %1111 = vmatprep.subr.mxu0 %v3741_v18  ;;  %1182 = vmatprep.subr.mxu1 %v3743_v17  ;;  %5493 = vst [vmem:[#allocation136_spill] sm:$0xff] %v3755_v15  ;;  %5494 = vst [vmem:[#allocation137_spill] sm:$0xff] %v3757_v12  ;;  %v3763_v17 = vld [vmem:[#allocation11 + $0x2c8] sm:$0xff]  ;;  %v3765_v18 = vld [vmem:[#allocation11 + $0x2d8] sm:$0xff] }
  0x9b   : > { %1112 = vmatpush2.msra.mxu0 %v3747_v1  ;;  %1183 = vmatpush2.msra.mxu1 %v3749_v10  ;;  %5496 = vst [vmem:[#allocation139_spill] sm:$0xff] %v3763_v17  ;;  %5497 = vst [vmem:[#allocation140_spill] sm:$0xff] %v3765_v18  ;;  %v3771_v10 = vld [vmem:[#allocation11 + $0x2d0] sm:$0xff]  ;;  %v3773_v1 = vld [vmem:[#allocation11 + $0x2a8] sm:$0xff] }
  0x9c   : > { %1113 = vmatprep.subr.mxu0 %v3751_v14  ;;  %1184 = vmatprep.subr.mxu1 %v3755_v15  ;;  %5499 = vst [vmem:[#allocation142_spill] sm:$0xff] %v3771_v10  ;;  %5500 = vst [vmem:[#allocation143_spill] sm:$0xff] %v3773_v1  ;;  %v3779_v15 = vld [vmem:[#allocation11 + $0x2a0] sm:$0xff]  ;;  %v3781_v14 = vld [vmem:[#allocation11 + $0x2b0] sm:$0xff] }
  0x9d   : > { %1114 = vmatpush2.msra.mxu0 %v3757_v12  ;;  %1185 = vmatpush2.msra.mxu1 %v3759_v20  ;;  %5502 = vst [vmem:[#allocation145_spill] sm:$0xff] %v3779_v15  ;;  %5503 = vst [vmem:[#allocation146_spill] sm:$0xff] %v3781_v14  ;;  %v3785_v12 = vld [vmem:[#allocation11 + $0x288] sm:$0xff]  ;;  %v3787_v20 = vld [vmem:[#allocation11 + $0x298] sm:$0xff] }
  0x9e   : > { %1115 = vmatprep.subr.mxu0 %v3763_v17  ;;  %1186 = vmatprep.subr.mxu1 %v3765_v18  ;;  %5504 = vst [vmem:[#allocation147_spill] sm:$0xff] %v3785_v12  ;;  %5505 = vst [vmem:[#allocation148_spill] sm:$0xff] %v3787_v20  ;;  %v3793_v17 = vld [vmem:[#allocation11 + $0x290] sm:$0xff]  ;;  %v3797_v18 = vld [vmem:[#allocation11 + $0x268] sm:$0xff] }
  0x9f   : > { %1116 = vmatpush2.msra.mxu0 %v3767_v56  ;;  %1187 = vmatpush2.msra.mxu1 %v3771_v10  ;;  %5507 = vst [vmem:[#allocation150_spill] sm:$0xff] %v3793_v17  ;;  %5508 = vst [vmem:[#allocation151_spill] sm:$0xff] %v3797_v18  ;;  %v3799_v56 = vld [vmem:[#allocation11 + $0x278] sm:$0xff]  ;;  %v3803_v10 = vld [vmem:[#allocation11 + $0x260] sm:$0xff] }
  0xa0   : > { %1117 = vmatprep.subr.mxu0 %v3773_v1  ;;  %1188 = vmatprep.subr.mxu1 %v3775_v16  ;;  %5509 = vst [vmem:[#allocation152_spill] sm:$0xff] %v3799_v56  ;;  %5510 = vst [vmem:[#allocation153_spill] sm:$0xff] %v3803_v10  ;;  %v3805_v1 = vld [vmem:[#allocation11 + $0x270] sm:$0xff]  ;;  %v3809_v16 = vld [vmem:[#allocation11 + $0x248] sm:$0xff] }
  0xa1   : > { %1118 = vmatpush2.msra.mxu0 %v3779_v15  ;;  %1189 = vmatpush2.msra.mxu1 %v3781_v14  ;;  %5511 = vst [vmem:[#allocation154_spill] sm:$0xff] %v3805_v1  ;;  %5512 = vst [vmem:[#allocation155_spill] sm:$0xff] %v3809_v16  ;;  %v3811_v15 = vld [vmem:[#allocation11 + $0x258] sm:$0xff]  ;;  %v3815_v14 = vld [vmem:[#allocation11 + $0x240] sm:$0xff] }
  0xa2   : > { %1119 = vmatprep.subr.mxu0 %v3785_v12  ;;  %1190 = vmatprep.subr.mxu1 %v3787_v20  ;;  %5513 = vst [vmem:[#allocation156_spill] sm:$0xff] %v3811_v15  ;;  %5514 = vst [vmem:[#allocation157_spill] sm:$0xff] %v3815_v14  ;;  %v3817_v12 = vld [vmem:[#allocation11 + $0x250] sm:$0xff]  ;;  %v3821_v20 = vld [vmem:[#allocation11 + $0x228] sm:$0xff] }
  0xa3   : > { %1120 = vmatpush2.msra.mxu0 %v3791_v13  ;;  %1191 = vmatpush2.msra.mxu1 %v3793_v17  ;;  %5515 = vst [vmem:[#allocation158_spill] sm:$0xff] %v3817_v12  ;;  %5516 = vst [vmem:[#allocation159_spill] sm:$0xff] %v3821_v20  ;;  %v3823_v13 = vld [vmem:[#allocation11 + $0x238] sm:$0xff]  ;;  %v3827_v17 = vld [vmem:[#allocation11 + $0x220] sm:$0xff] }
  0xa4   : > { %1121 = vmatprep.subr.mxu0 %v3797_v18  ;;  %1192 = vmatprep.subr.mxu1 %v3799_v56  ;;  %5517 = vst [vmem:[#allocation160_spill] sm:$0xff] %v3823_v13  ;;  %5518 = vst [vmem:[#allocation161_spill] sm:$0xff] %v3827_v17  ;;  %v3829_v18 = vld [vmem:[#allocation11 + $0x230] sm:$0xff]  ;;  %v3833_v56 = vld [vmem:[#allocation11 + $0x208] sm:$0xff] }
  0xa5   : > { %1122 = vmatpush2.msra.mxu0 %v3803_v10  ;;  %1193 = vmatpush2.msra.mxu1 %v3805_v1  ;;  %5519 = vst [vmem:[#allocation162_spill] sm:$0xff] %v3829_v18  ;;  %5520 = vst [vmem:[#allocation163_spill] sm:$0xff] %v3833_v56  ;;  %v3835_v10 = vld [vmem:[#allocation11 + $0x218] sm:$0xff] }
  0xa6   : > { %1123 = vmatprep.subr.mxu0 %v3809_v16  ;;  %1194 = vmatprep.subr.mxu1 %v3811_v15  ;;  %5521 = vst [vmem:[#allocation164_spill] sm:$0xff] %v3835_v10  ;;  %v3839_v16 = vld [vmem:[#allocation11 + $0x200] sm:$0xff]  ;;  %v3841_v15 = vld [vmem:[#allocation11 + $0x210] sm:$0xff] }
  0xa7   : > { %1124 = vmatpush2.msra.mxu0 %v3815_v14  ;;  %1195 = vmatpush2.msra.mxu1 %v3817_v12  ;;  %5522 = vst [vmem:[#allocation165_spill] sm:$0xff] %v3839_v16  ;;  %5523 = vst [vmem:[#allocation166_spill] sm:$0xff] %v3841_v15  ;;  %v864_v14 = vld [vmem:[#allocation5] sm:$0xff] }
  0xa8   : > { %1125 = vmatprep.subr.mxu0 %v3821_v20  ;;  %1196 = vmatprep.subr.mxu1 %v3823_v13  ;;  %v5186_v13 = vmov 0  }
  0xa9   : > { %1126 = vmatpush2.msra.mxu0 %v3827_v17  ;;  %1197 = vmatpush2.msra.mxu1 %v3829_v18  ;;  %v859_v17 = vld [vmem:[%s5034_s1] sm:$0xff]  ;;  %v1231_v18 = vstv %s3193_s30 }
  0xaa   : > { %1127 = vmatprep.subr.mxu0 %v3833_v56  ;;  %1198 = vmatprep.subr.mxu1 %v3835_v10  ;;  %v3856_v56 = vadd.s32 4294967295, %v859_v17  ;;  %v437_v10 = vld [vmem:[%s5037_s4] sm:$0xf] }
  0xab   : > { %1128 = vmatpush2.msra.mxu0 %v3839_v16  ;;  %1199 = vmatpush2.msra.mxu1 %v3841_v15  ;;  %v439_v15 = vlaneseq }
  0xac   : > { %1129 = vmatprep.mubr.f32.mxu0 %v864_v14  ;;  %1200 = vmatprep.mubr.f32.mxu1 %v864_v14  ;;  %5524 = vst [vmem:[#allocation167_spill] sm:$0xff] %v3856_v56  ;;  %vm1232_vm1 = vcmp.eq.s32.totalorder %v3856_v56, %v1231_v18 }
  0xad   : > { %1246 = vmatprep.subr.mxu0 %v3252_v19  ;;  %1317 = vmatprep.subr.mxu1 %v3255_v21  ;;  %v1233_v14 = vsel %vm1232_vm1, 1, %v5186_v13  ;;  %v3861_v19 = vshrl.u32 %v439_v15, 7 }
  0xae   : > { %2659 = vset.pattern.permute.xlu0 %v5186_v13  ;;  %2660 = vset.pattern.permute.xlu1 %v5186_v13 }
  0xaf   : > { %1235 = vperm.xlu0 %2659, %v1233_v14   ;;  %5525 = vst [vmem:[#allocation168_spill] sm:$0xff] %v3861_v19  ;;  %v5194_v16 = vsub.s32 0, %v3861_v19  ;;  %v5199_v17 = vsub.s32 1, %v3861_v19  ;;  %v5202_v56 = vsub.s32 2, %v3861_v19  ;;  %v5205_v11 = vsub.s32 3, %v3861_v19 }
  0xb1   : > { %v442_v18 = vrot.slane %v437_v10, %v5194_v16  ;;  %v446_v15 = vrot.slane %v437_v10, %v5199_v17  ;;  %v450_v8 = vrot.slane %v437_v10, %v5202_v56  ;;  %v454_v16 = vrot.slane %v437_v10, %v5205_v11 }
 0x102   : > { %v538_v21 = vpop.f32.mrf.mxu0 }
 0x104   : > { %v627_v20 = vpop.f32.mrf.mxu1  ;;  %v540_v12 = vpop.f32.mrf.mxu0 }
 0x106   : > { %v629_v14 = vpop.f32.mrf.mxu1 }
 0x116   : > { %v544_v13 = vpop.f32.mrf.mxu0 }
 0x117   : > { %v3873_v1 = vadd.f32 %v544_v13, %v442_v18 }
 0x118   : > { %v546_v9 = vpop.f32.mrf.mxu0 }
 0x119   : > { %5526 = vst [vmem:[#allocation169_spill] sm:$0xff] %v3873_v1  ;;  %v3878_v7 = vadd.f32 %v546_v9, %v446_v15 }
 0x11a   : > { %v633_v6 = vpop.f32.mrf.mxu1 }
 0x11b   : > { %5527 = vst [vmem:[#allocation170_spill] sm:$0xff] %v3878_v7  ;;  %v3882_v5 = vadd.f32 %v633_v6, %v450_v8 }
 0x11c   : > { %v550_v4 = vpop.f32.mrf.mxu0  ;;  %v635_v3 = vpop.f32.mrf.mxu1 }
 0x11d   : > { %5528 = vst [vmem:[#allocation171_spill] sm:$0xff] %v3882_v5  ;;  %v3884_v2 = vadd.f32 %v550_v4, %v442_v18  ;;  %v3886_v13 = vadd.f32 %v635_v3, %v454_v16  ;;  %v541_v5 = vadd.f32 %v540_v12, %v446_v15 }
 0x11e   : > { %v552_v17 = vpop.f32.mrf.mxu0 }
 0x11f   : > { %5529 = vst [vmem:[#allocation172_spill] sm:$0xff] %v3884_v2  ;;  %5530 = vst [vmem:[#allocation173_spill] sm:$0xff] %v3886_v13  ;;  %v3888_v1 = vadd.f32 %v552_v17, %v446_v15  ;;  %v539_v17 = vadd.f32 %v538_v21, %v442_v18 }
 0x120   : > { %v639_v0 = vpop.f32.mrf.mxu1 }
 0x121   : > { %5531 = vst [vmem:[#allocation174_spill] sm:$0xff] %v3888_v1  ;;  %v3890_v63 = vadd.f32 %v639_v0, %v450_v8 }
 0x122   : > { %v556_v9 = vpop.f32.mrf.mxu0  ;;  %v641_v56 = vpop.f32.mrf.mxu1 }
 0x123   : > { %5532 = vst [vmem:[#allocation175_spill] sm:$0xff] %v3890_v63  ;;  %v3892_v7 = vadd.f32 %v556_v9, %v442_v18  ;;  %v3894_v19 = vadd.f32 %v641_v56, %v454_v16 }
 0x124   : > { %v558_v6 = vpop.f32.mrf.mxu0 }
 0x125   : > { %5533 = vst [vmem:[#allocation176_spill] sm:$0xff] %v3892_v7  ;;  %5534 = vst [vmem:[#allocation177_spill] sm:$0xff] %v3894_v19  ;;  %v3896_v10 = vadd.f32 %v558_v6, %v446_v15  ;;  %v630_v6 = vadd.f32 %v629_v14, %v454_v16  ;;  %v628_v19 = vadd.f32 %v627_v20, %v450_v8  ;;  %v5578_v14 = vld [vmem:[#allocation54_spill] sm:$0xff] }
 0x126   : > { %v645_v11 = vpop.f32.mrf.mxu1 }
 0x127   : > { %5535 = vst [vmem:[#allocation178_spill] sm:$0xff] %v3896_v10  ;;  %v3898_v4 = vadd.f32 %v645_v11, %v450_v8 }
 0x128   : > { %v647_v3 = vpop.f32.mrf.mxu1 }
 0x129   : > { %5536 = vst [vmem:[#allocation179_spill] sm:$0xff] %v3898_v4  ;;  %v3900_v2 = vadd.f32 %v647_v3, %v454_v16 }
 0x12b   : > { %5537 = vst [vmem:[#allocation180_spill] sm:$0xff] %v3900_v2  ;;  %v940_v1 = vpop.f32.mrf.mxu0  ;;  %v1011_v9 = vpop.f32.mrf.mxu1 }
 0x12c   : > { %v1016_v0 = vadd.f32 %v940_v1, %v539_v17  ;;  %v1018_v61 = vadd.f32 %v1011_v9, %v628_v19  ;;  %v5582_v17 = vld [vmem:[#allocation58_spill] sm:$0xff]  ;;  %v5584_v9 = vld [vmem:[#allocation60_spill] sm:$0xff] }
 0x12d   : > { %v942_v63 = vpop.f32.mrf.mxu0  ;;  %v1013_v7 = vpop.f32.mrf.mxu1 }
 0x12e   : > { %v2526_v13 = vmul.f32 -1.442695, %v1016_v0  ;;  %v1017_v62 = vadd.f32 %v942_v63, %v541_v5  ;;  %v1019_v10 = vadd.f32 %v1013_v7, %v630_v6  ;;  %v863_v5 = vld [vmem:[#allocation4] sm:$0xff] }
 0x12f   : > { %v5583_v0 = vld [vmem:[#allocation59_spill] sm:$0xff]  ;;  %v5586_v6 = vld [vmem:[#allocation62_spill] sm:$0xff] }
 0x130   : > { %2661 = vpow2.f32 %v2526_v13  ;;  %v2527_v56 = vmul.f32 -1.442695, %v1017_v62  ;;  %v2528_v11 = vmul.f32 -1.442695, %v1019_v10  ;;  %v5579_v13 = vld [vmem:[#allocation55_spill] sm:$0xff]  ;;  %v5580_v10 = vld [vmem:[#allocation56_spill] sm:$0xff] }
 0x132   : > { %2663 = vpow2.f32 %v2527_v56  ;;  %v5585_v56 = vld [vmem:[#allocation61_spill] sm:$0xff] }
 0x133   : > { %2665 = vpow2.f32 %v2528_v11  ;;  %v5587_v11 = vld [vmem:[#allocation63_spill] sm:$0xff] }
 0x13d   : > { %v2662_v4 = vpop.eup %2661 }
 0x13e   : > { %v1023_v3 = vadd.f32 1.0, %v2662_v4  ;;  %v5581_v4 = vld [vmem:[#allocation57_spill] sm:$0xff] }
 0x13f   : > { %v2664_v2 = vpop.eup %2663 }
 0x140   : > { %2667 = vrcp.f32 %v1023_v3  ;;  %v1029_v12 = vadd.f32 1.0, %v2664_v2  ;;  %v2666_v1 = vpop.eup %2665  ;;  %v5577_v2 = vld [vmem:[#allocation53_spill] sm:$0xff]  ;;  %v5588_v3 = vld [vmem:[#allocation64_spill] sm:$0xff] }
 0x141   : > { %2669 = vtanh.f32 %v1018_v61  ;;  %v1036_v18 = vadd.f32 1.0, %v2666_v1  ;;  %v5576_v61 = vld [vmem:[#allocation52_spill] sm:$0xff]  ;;  %v5590_v1 = vld [vmem:[#allocation66_spill] sm:$0xff] }
 0x142   : > { %2671 = vrcp.f32 %v1029_v12  ;;  %v5589_v12 = vld [vmem:[#allocation65_spill] sm:$0xff] }
 0x143   : > { %2673 = vrcp.f32 %v1036_v18  ;;  %v5595_v18 = vld [vmem:[#allocation71_spill] sm:$0xff] }
 0x14d   : > { %v2668_v63 = vpop.eup %2667 }
 0x14e   : > { %v2670_v21 = vpop.eup %2669 }
 0x14f   : > { %v2672_v62 = vpop.eup %2671  ;;  %v1040_v15 = vmul.f32 %v2670_v21, %v2668_v63  ;;  %v5591_v63 = vld [vmem:[#allocation67_spill] sm:$0xff]  ;;  %v5593_v21 = vld [vmem:[#allocation69_spill] sm:$0xff] }
 0x150   : > { %v1039_v16 = vmul.f32 %v2672_v62, %v863_v5  ;;  %v2674_v20 = vpop.eup %2673  ;;  %v5592_v5 = vld [vmem:[#allocation68_spill] sm:$0xff]  ;;  %v5594_v62 = vld [vmem:[#allocation70_spill] sm:$0xff] }
 0x152   : > { %v3902_v7 = vadd.f32 %v1040_v15, %v1039_v16  ;;  %v5596_v15 = vld [vmem:[#allocation72_spill] sm:$0xff]  ;;  %v5597_v16 = vld [vmem:[#allocation73_spill] sm:$0xff] }
 0x154   : > { %2675 = vtanh.f32 %v3902_v7 }
 0x161   : > { %v2676_v8 = vpop.eup %2675 }
 0x162   : > { %v3905_v19 = vmul.f32 %v2676_v8, %v2674_v20  ;;  %v5598_v20 = vld [vmem:[#allocation74_spill] sm:$0xff]  ;;  %v5599_v8 = vld [vmem:[#allocation75_spill] sm:$0xff] }
 0x164   : > { %1130 = vmatmul.mubr.f32.vlgmr.msra.gmra.mxu0 %v3905_v19  ;;  %1201 = vmatmul.mubr.f32.vlgmr.msra.gmra.mxu1 %v3905_v19 }
 0x165   : > { %1247 = vmatpush1.msra.mxu0 %v3258_v22  ;;  %1318 = vmatpush1.msra.mxu1 %v3260_v23  ;;  %v5538_v22 = vld [vmem:[#allocation15_spill] sm:$0xff]  ;;  %v5539_v23 = vld [vmem:[#allocation16_spill] sm:$0xff] }
 0x166   : > { %1248 = vmatprep.subr.mxu0 %v3264_v24  ;;  %1319 = vmatprep.subr.mxu1 %v3266_v25  ;;  %v5540_v24 = vld [vmem:[#allocation17_spill] sm:$0xff]  ;;  %v5541_v25 = vld [vmem:[#allocation18_spill] sm:$0xff] }
 0x167   : > { %1249 = vmatpush1.msra.mxu0 %v3270_v26  ;;  %1320 = vmatpush1.msra.mxu1 %v3272_v27  ;;  %v5542_v26 = vld [vmem:[#allocation19_spill] sm:$0xff]  ;;  %v5543_v27 = vld [vmem:[#allocation20_spill] sm:$0xff] }
 0x168   : > { %1250 = vmatprep.subr.mxu0 %v3276_v28  ;;  %1321 = vmatprep.subr.mxu1 %v3278_v29  ;;  %v5544_v28 = vld [vmem:[#allocation21_spill] sm:$0xff]  ;;  %v5545_v29 = vld [vmem:[#allocation22_spill] sm:$0xff] }
 0x169   : > { %1251 = vmatpush1.msra.mxu0 %v3282_v30  ;;  %1322 = vmatpush1.msra.mxu1 %v3284_v31  ;;  %v5546_v30 = vld [vmem:[#allocation23_spill] sm:$0xff]  ;;  %v5547_v31 = vld [vmem:[#allocation24_spill] sm:$0xff] }
 0x16a   : > { %1252 = vmatprep.subr.mxu0 %v3288_v32  ;;  %1323 = vmatprep.subr.mxu1 %v3290_v33  ;;  %v5548_v32 = vld [vmem:[#allocation25_spill] sm:$0xff]  ;;  %v5549_v33 = vld [vmem:[#allocation26_spill] sm:$0xff] }
 0x16b   : > { %1253 = vmatpush1.msra.mxu0 %v3294_v34  ;;  %1324 = vmatpush1.msra.mxu1 %v3296_v35  ;;  %v5550_v34 = vld [vmem:[#allocation27_spill] sm:$0xff]  ;;  %v5551_v35 = vld [vmem:[#allocation28_spill] sm:$0xff] }
 0x16c   : > { %1254 = vmatprep.subr.mxu0 %v3300_v36  ;;  %1325 = vmatprep.subr.mxu1 %v3302_v37  ;;  %v5552_v36 = vld [vmem:[#allocation29_spill] sm:$0xff]  ;;  %v5553_v37 = vld [vmem:[#allocation30_spill] sm:$0xff] }
 0x16d   : > { %1255 = vmatpush1.msra.mxu0 %v3306_v38  ;;  %1326 = vmatpush1.msra.mxu1 %v3308_v39  ;;  %v5554_v38 = vld [vmem:[#allocation31_spill] sm:$0xff]  ;;  %v5555_v39 = vld [vmem:[#allocation32_spill] sm:$0xff] }
 0x16e   : > { %1256 = vmatprep.subr.mxu0 %v3312_v40  ;;  %1327 = vmatprep.subr.mxu1 %v3314_v41  ;;  %v5556_v40 = vld [vmem:[#allocation33_spill] sm:$0xff]  ;;  %v5557_v41 = vld [vmem:[#allocation34_spill] sm:$0xff] }
 0x16f   : > { %1257 = vmatpush1.msra.mxu0 %v3318_v42  ;;  %1328 = vmatpush1.msra.mxu1 %v3320_v43  ;;  %v5558_v42 = vld [vmem:[#allocation35_spill] sm:$0xff]  ;;  %v5559_v43 = vld [vmem:[#allocation36_spill] sm:$0xff] }
 0x170   : > { %1258 = vmatprep.subr.mxu0 %v3324_v44  ;;  %1329 = vmatprep.subr.mxu1 %v3326_v45  ;;  %v5560_v44 = vld [vmem:[#allocation37_spill] sm:$0xff]  ;;  %v5561_v45 = vmov 0.0  }
 0x171   : > { %1259 = vmatpush1.msra.mxu0 %v3330_v46  ;;  %1330 = vmatpush1.msra.mxu1 %v3332_v47  ;;  %v5562_v46 = vld [vmem:[#allocation38_spill] sm:$0xff]  ;;  %v5563_v47 = vld [vmem:[#allocation39_spill] sm:$0xff] }
 0x172   : > { %1260 = vmatprep.subr.mxu0 %v3336_v48  ;;  %1331 = vmatprep.subr.mxu1 %v3338_v49  ;;  %v5564_v48 = vld [vmem:[#allocation40_spill] sm:$0xff]  ;;  %v5565_v49 = vld [vmem:[#allocation41_spill] sm:$0xff] }
 0x173   : > { %1261 = vmatpush1.msra.mxu0 %v3342_v50  ;;  %1332 = vmatpush1.msra.mxu1 %v3344_v51  ;;  %v5566_v50 = vld [vmem:[#allocation42_spill] sm:$0xff]  ;;  %v5567_v51 = vld [vmem:[#allocation43_spill] sm:$0xff] }
 0x174   : > { %1262 = vmatprep.subr.mxu0 %v3348_v52  ;;  %1333 = vmatprep.subr.mxu1 %v3350_v53  ;;  %v5568_v52 = vld [vmem:[#allocation44_spill] sm:$0xff]  ;;  %v5569_v53 = vld [vmem:[#allocation45_spill] sm:$0xff] }
 0x175   : > { %1263 = vmatpush1.msra.mxu0 %v3354_v54  ;;  %1334 = vmatpush1.msra.mxu1 %v3358_v55  ;;  %v5570_v54 = vld [vmem:[#allocation46_spill] sm:$0xff]  ;;  %v5571_v55 = vld [vmem:[#allocation47_spill] sm:$0xff] }
 0x176   : > { %1264 = vmatprep.subr.mxu0 %v3363_v57  ;;  %1335 = vmatprep.subr.mxu1 %v3365_v58  ;;  %v5572_v57 = vld [vmem:[#allocation48_spill] sm:$0xff]  ;;  %v5573_v58 = vld [vmem:[#allocation49_spill] sm:$0xff] }
 0x177   : > { %1265 = vmatpush1.msra.mxu0 %v3369_v59  ;;  %1336 = vmatpush1.msra.mxu1 %v3373_v60  ;;  %v5574_v59 = vld [vmem:[#allocation50_spill] sm:$0xff]  ;;  %v5575_v60 = vld [vmem:[#allocation51_spill] sm:$0xff] }
 0x178   : > { %1266 = vmatprep.subr.mxu0 %v5538_v22  ;;  %1337 = vmatprep.subr.mxu1 %v5539_v23  ;;  %v5601_v22 = vld [vmem:[#allocation77_spill] sm:$0xff]  ;;  %v5602_v23 = vld [vmem:[#allocation78_spill] sm:$0xff] }
 0x179   : > { %1267 = vmatpush1.msra.mxu0 %v5540_v24  ;;  %1338 = vmatpush1.msra.mxu1 %v5541_v25  ;;  %v5603_v24 = vld [vmem:[#allocation79_spill] sm:$0xff]  ;;  %v5604_v25 = vld [vmem:[#allocation80_spill] sm:$0xff] }
 0x17a   : > { %1268 = vmatprep.subr.mxu0 %v5542_v26  ;;  %1339 = vmatprep.subr.mxu1 %v5543_v27  ;;  %v5605_v26 = vld [vmem:[#allocation81_spill] sm:$0xff]  ;;  %v5606_v27 = vld [vmem:[#allocation82_spill] sm:$0xff] }
 0x17b   : > { %1269 = vmatpush1.msra.mxu0 %v5544_v28  ;;  %1340 = vmatpush1.msra.mxu1 %v5545_v29  ;;  %v5607_v28 = vld [vmem:[#allocation83_spill] sm:$0xff]  ;;  %v5608_v29 = vld [vmem:[#allocation84_spill] sm:$0xff] }
 0x17c   : > { %1270 = vmatprep.subr.mxu0 %v5546_v30  ;;  %1341 = vmatprep.subr.mxu1 %v5547_v31  ;;  %v5609_v30 = vld [vmem:[#allocation85_spill] sm:$0xff]  ;;  %v5610_v31 = vld [vmem:[#allocation86_spill] sm:$0xff] }
 0x17d   : > { %1271 = vmatpush1.msra.mxu0 %v5548_v32  ;;  %1342 = vmatpush1.msra.mxu1 %v5549_v33  ;;  %v5611_v32 = vld [vmem:[#allocation87_spill] sm:$0xff]  ;;  %v5612_v33 = vld [vmem:[#allocation88_spill] sm:$0xff] }
 0x17e   : > { %1272 = vmatprep.subr.mxu0 %v5550_v34  ;;  %1343 = vmatprep.subr.mxu1 %v5551_v35  ;;  %v5613_v34 = vld [vmem:[#allocation89_spill] sm:$0xff]  ;;  %v5614_v35 = vld [vmem:[#allocation90_spill] sm:$0xff] }
 0x17f   : > { %1273 = vmatpush1.msra.mxu0 %v5552_v36  ;;  %1344 = vmatpush1.msra.mxu1 %v5553_v37  ;;  %v5615_v36 = vld [vmem:[#allocation91_spill] sm:$0xff]  ;;  %v5616_v37 = vld [vmem:[#allocation92_spill] sm:$0xff] }
 0x180   : > { %1274 = vmatprep.subr.mxu0 %v5554_v38  ;;  %1345 = vmatprep.subr.mxu1 %v5555_v39  ;;  %v5617_v38 = vld [vmem:[#allocation93_spill] sm:$0xff]  ;;  %v5618_v39 = vld [vmem:[#allocation94_spill] sm:$0xff] }
 0x181   : > { %1275 = vmatpush1.msra.mxu0 %v5556_v40  ;;  %1346 = vmatpush1.msra.mxu1 %v5557_v41  ;;  %v5619_v40 = vld [vmem:[#allocation95_spill] sm:$0xff]  ;;  %v5620_v41 = vld [vmem:[#allocation96_spill] sm:$0xff] }
 0x182   : > { %1276 = vmatprep.subr.mxu0 %v5558_v42  ;;  %1347 = vmatprep.subr.mxu1 %v5559_v43  ;;  %v5621_v42 = vld [vmem:[#allocation97_spill] sm:$0xff]  ;;  %v5622_v43 = vld [vmem:[#allocation98_spill] sm:$0xff] }
 0x183   : > { %1277 = vmatpush1.msra.mxu0 %v5560_v44  ;;  %1310 = vmatprep.mubr.f32.mxu0 %v5561_v45  ;;  %v5623_v44 = vld [vmem:[#allocation99_spill] sm:$0xff] }
 0x184   : > { %1348 = vmatpush1.msra.mxu1 %v5562_v46  ;;  %1381 = vmatprep.mubr.f32.mxu1 %v5561_v45  ;;  %v5624_v46 = vld [vmem:[#allocation100_spill] sm:$0xff] }
 0x185   : > { %1311 = vmatmul.mubr.f32.vlgmr.msra.gmra.mxu0 %v3905_v19  ;;  %1382 = vmatmul.mubr.f32.vlgmr.msra.gmra.mxu1 %v3905_v19  ;;  %v5600_v19 = vld [vmem:[#allocation76_spill] sm:$0xff] }
 0x186   : > { %1416 = vmatprep.subr.mxu0 %v5563_v47  ;;  %1487 = vmatprep.subr.mxu1 %v5564_v48  ;;  %v5625_v47 = vld [vmem:[#allocation101_spill] sm:$0xff]  ;;  %v5626_v48 = vld [vmem:[#allocation102_spill] sm:$0xff] }
 0x187   : > { %1417 = vmatpush1.msra.mxu0 %v5565_v49  ;;  %1488 = vmatpush1.msra.mxu1 %v5566_v50  ;;  %v5627_v49 = vld [vmem:[#allocation103_spill] sm:$0xff]  ;;  %v5628_v50 = vld [vmem:[#allocation104_spill] sm:$0xff] }
 0x188   : > { %1418 = vmatprep.subr.mxu0 %v5567_v51  ;;  %1489 = vmatprep.subr.mxu1 %v5568_v52  ;;  %v5629_v51 = vld [vmem:[#allocation105_spill] sm:$0xff]  ;;  %v5630_v52 = vld [vmem:[#allocation106_spill] sm:$0xff] }
 0x189   : > { %1419 = vmatpush1.msra.mxu0 %v5569_v53  ;;  %1490 = vmatpush1.msra.mxu1 %v5570_v54  ;;  %v5631_v53 = vld [vmem:[#allocation107_spill] sm:$0xff]  ;;  %v5632_v54 = vld [vmem:[#allocation108_spill] sm:$0xff] }
 0x18a   : > { %1420 = vmatprep.subr.mxu0 %v5571_v55  ;;  %1491 = vmatprep.subr.mxu1 %v5572_v57  ;;  %v5633_v55 = vld [vmem:[#allocation109_spill] sm:$0xff]  ;;  %v5634_v57 = vld [vmem:[#allocation110_spill] sm:$0xff] }
 0x18b   : > { %1421 = vmatpush1.msra.mxu0 %v5573_v58  ;;  %1492 = vmatpush1.msra.mxu1 %v5574_v59  ;;  %v5635_v58 = vld [vmem:[#allocation111_spill] sm:$0xff]  ;;  %v5636_v59 = vld [vmem:[#allocation112_spill] sm:$0xff] }
 0x18c   : > { %1422 = vmatprep.subr.mxu0 %v5575_v60  ;;  %1493 = vmatprep.subr.mxu1 %v5576_v61  ;;  %v5637_v60 = vld [vmem:[#allocation113_spill] sm:$0xff]  ;;  %v5638_v61 = vld [vmem:[#allocation114_spill] sm:$0xff] }
 0x18d   : > { %1423 = vmatpush1.msra.mxu0 %v5577_v2  ;;  %1494 = vmatpush1.msra.mxu1 %v5578_v14  ;;  %v5639_v2 = vld [vmem:[#allocation115_spill] sm:$0xff]  ;;  %v5640_v14 = vld [vmem:[#allocation116_spill] sm:$0xff] }
 0x18e   : > { %1424 = vmatprep.subr.mxu0 %v5579_v13  ;;  %1495 = vmatprep.subr.mxu1 %v5580_v10  ;;  %v5641_v13 = vld [vmem:[#allocation117_spill] sm:$0xff]  ;;  %v5642_v10 = vld [vmem:[#allocation118_spill] sm:$0xff] }
 0x18f   : > { %1425 = vmatpush1.msra.mxu0 %v5581_v4  ;;  %1496 = vmatpush1.msra.mxu1 %v5582_v17  ;;  %v5643_v4 = vld [vmem:[#allocation119_spill] sm:$0xff]  ;;  %v5644_v17 = vld [vmem:[#allocation120_spill] sm:$0xff] }
 0x190   : > { %1426 = vmatprep.subr.mxu0 %v5583_v0  ;;  %1497 = vmatprep.subr.mxu1 %v5584_v9  ;;  %v5645_v0 = vld [vmem:[#allocation121_spill] sm:$0xff]  ;;  %v5646_v9 = vld [vmem:[#allocation122_spill] sm:$0xff] }
 0x191   : > { %1427 = vmatpush1.msra.mxu0 %v5585_v56  ;;  %1498 = vmatpush1.msra.mxu1 %v5586_v6  ;;  %v5647_v56 = vld [vmem:[#allocation123_spill] sm:$0xff]  ;;  %v5648_v6 = vld [vmem:[#allocation124_spill] sm:$0xff] }
 0x192   : > { %1428 = vmatprep.subr.mxu0 %v5587_v11  ;;  %1499 = vmatprep.subr.mxu1 %v5588_v3  ;;  %v5649_v11 = vld [vmem:[#allocation125_spill] sm:$0xff]  ;;  %v5650_v3 = vld [vmem:[#allocation126_spill] sm:$0xff] }
 0x193   : > { %1429 = vmatpush1.msra.mxu0 %v5589_v12  ;;  %1500 = vmatpush1.msra.mxu1 %v5590_v1  ;;  %v5651_v12 = vld [vmem:[#allocation127_spill] sm:$0xff]  ;;  %v5652_v1 = vld [vmem:[#allocation128_spill] sm:$0xff] }
 0x194   : > { %1430 = vmatprep.subr.mxu0 %v5591_v63  ;;  %1501 = vmatprep.subr.mxu1 %v5592_v5  ;;  %v5653_v63 = vld [vmem:[#allocation129_spill] sm:$0xff]  ;;  %v5654_v5 = vld [vmem:[#allocation130_spill] sm:$0xff] }
 0x195   : > { %1431 = vmatpush1.msra.mxu0 %v5593_v21  ;;  %1502 = vmatpush1.msra.mxu1 %v5594_v62  ;;  %v5655_v21 = vld [vmem:[#allocation131_spill] sm:$0xff]  ;;  %v5656_v62 = vld [vmem:[#allocation132_spill] sm:$0xff] }
 0x196   : > { %1432 = vmatprep.subr.mxu0 %v5595_v18  ;;  %1503 = vmatprep.subr.mxu1 %v5596_v15  ;;  %v5657_v18 = vld [vmem:[#allocation133_spill] sm:$0xff]  ;;  %v5658_v15 = vld [vmem:[#allocation134_spill] sm:$0xff] }
 0x197   : > { %1433 = vmatpush1.msra.mxu0 %v5597_v16  ;;  %1504 = vmatpush1.msra.mxu1 %v5598_v20  ;;  %v5659_v16 = vld [vmem:[#allocation135_spill] sm:$0xff]  ;;  %v5660_v20 = vld [vmem:[#allocation136_spill] sm:$0xff] }
 0x198   : > { %1434 = vmatprep.subr.mxu0 %v5599_v8  ;;  %1505 = vmatprep.subr.mxu1 %v5600_v19  ;;  %v5661_v8 = vld [vmem:[#allocation137_spill] sm:$0xff]  ;;  %v5662_v19 = vld [vmem:[#allocation138_spill] sm:$0xff] }
 0x199   : > { %1435 = vmatpush1.msra.mxu0 %v5601_v22  ;;  %1506 = vmatpush1.msra.mxu1 %v5602_v23  ;;  %v5663_v22 = vld [vmem:[#allocation139_spill] sm:$0xff]  ;;  %v5664_v23 = vld [vmem:[#allocation140_spill] sm:$0xff] }
 0x19a   : > { %1436 = vmatprep.subr.mxu0 %v5603_v24  ;;  %1507 = vmatprep.subr.mxu1 %v5604_v25  ;;  %v5665_v24 = vld [vmem:[#allocation141_spill] sm:$0xff]  ;;  %v5666_v25 = vld [vmem:[#allocation142_spill] sm:$0xff] }
 0x19b   : > { %1437 = vmatpush1.msra.mxu0 %v5605_v26  ;;  %1508 = vmatpush1.msra.mxu1 %v5606_v27  ;;  %v5667_v26 = vld [vmem:[#allocation143_spill] sm:$0xff]  ;;  %v5668_v27 = vld [vmem:[#allocation144_spill] sm:$0xff] }
 0x19c   : > { %1438 = vmatprep.subr.mxu0 %v5607_v28  ;;  %1509 = vmatprep.subr.mxu1 %v5608_v29  ;;  %v5669_v28 = vld [vmem:[#allocation145_spill] sm:$0xff]  ;;  %v5670_v29 = vld [vmem:[#allocation146_spill] sm:$0xff] }
 0x19d   : > { %1439 = vmatpush1.msra.mxu0 %v5609_v30  ;;  %1510 = vmatpush1.msra.mxu1 %v5610_v31  ;;  %v5671_v30 = vld [vmem:[#allocation147_spill] sm:$0xff]  ;;  %v5672_v31 = vld [vmem:[#allocation148_spill] sm:$0xff] }
 0x19e   : > { %1440 = vmatprep.subr.mxu0 %v5611_v32  ;;  %1511 = vmatprep.subr.mxu1 %v5612_v33  ;;  %v5673_v32 = vld [vmem:[#allocation149_spill] sm:$0xff]  ;;  %v5674_v33 = vld [vmem:[#allocation150_spill] sm:$0xff] }
 0x19f   : > { %1441 = vmatpush1.msra.mxu0 %v5613_v34  ;;  %1512 = vmatpush1.msra.mxu1 %v5614_v35  ;;  %v5675_v34 = vld [vmem:[#allocation151_spill] sm:$0xff]  ;;  %v5676_v35 = vld [vmem:[#allocation152_spill] sm:$0xff] }
 0x1a0   : > { %1442 = vmatprep.subr.mxu0 %v5615_v36  ;;  %1513 = vmatprep.subr.mxu1 %v5616_v37  ;;  %v5677_v36 = vld [vmem:[#allocation153_spill] sm:$0xff]  ;;  %v5678_v37 = vld [vmem:[#allocation154_spill] sm:$0xff] }
 0x1a1   : > { %1443 = vmatpush1.msra.mxu0 %v5617_v38  ;;  %1514 = vmatpush1.msra.mxu1 %v5618_v39  ;;  %v5679_v38 = vld [vmem:[#allocation155_spill] sm:$0xff]  ;;  %v5680_v39 = vld [vmem:[#allocation156_spill] sm:$0xff] }
 0x1a2   : > { %1444 = vmatprep.subr.mxu0 %v5619_v40  ;;  %1515 = vmatprep.subr.mxu1 %v5620_v41  ;;  %v5681_v40 = vld [vmem:[#allocation157_spill] sm:$0xff]  ;;  %v5682_v41 = vld [vmem:[#allocation158_spill] sm:$0xff] }
 0x1a3   : > { %1445 = vmatpush1.msra.mxu0 %v5621_v42  ;;  %1516 = vmatpush1.msra.mxu1 %v5622_v43  ;;  %v5683_v42 = vld [vmem:[#allocation159_spill] sm:$0xff]  ;;  %v5684_v43 = vld [vmem:[#allocation160_spill] sm:$0xff] }
 0x1a4   : > { %1446 = vmatprep.subr.mxu0 %v5623_v44  ;;  %1517 = vmatprep.subr.mxu1 %v5624_v46  ;;  %v5685_v44 = vld [vmem:[#allocation161_spill] sm:$0xff]  ;;  %v5686_v46 = vld [vmem:[#allocation162_spill] sm:$0xff] }
 0x1a5   : > { %1447 = vmatpush1.msra.mxu0 %v5625_v47  ;;  %1518 = vmatpush1.msra.mxu1 %v5626_v48  ;;  %v5687_v47 = vld [vmem:[#allocation163_spill] sm:$0xff]  ;;  %v5688_v48 = vld [vmem:[#allocation164_spill] sm:$0xff] }
 0x1a6   : > { %1448 = vmatprep.subr.mxu0 %v5627_v49  ;;  %1519 = vmatprep.subr.mxu1 %v5628_v50  ;;  %v5689_v49 = vld [vmem:[#allocation165_spill] sm:$0xff]  ;;  %v5690_v50 = vld [vmem:[#allocation166_spill] sm:$0xff] }
 0x1a7   : > { %1449 = vmatpush2.msra.mxu0 %v5629_v51  ;;  %1520 = vmatpush2.msra.mxu1 %v5630_v52  ;;  %v4103_v51 = vld [vmem:[#allocation9 + $0x1e8] sm:$0xff]  ;;  %v4106_v52 = vld [vmem:[#allocation9 + $0x1f8] sm:$0xff] }
 0x1a8   : > { %1450 = vmatprep.subr.mxu0 %v5631_v53  ;;  %1521 = vmatprep.subr.mxu1 %v5632_v54  ;;  %v858_v53 = vld [vmem:[%s5039_s6] sm:$0xf]  ;;  %v1583_v54 = vstv %s1582_s23 }
 0x1a9   : > { %1451 = vmatpush2.msra.mxu0 %v5633_v55  ;;  %1522 = vmatpush2.msra.mxu1 %v5634_v57  ;;  %v5691_v55 = vld [vmem:[#allocation168_spill] sm:$0xff] }
 0x1aa   : > { %1452 = vmatprep.subr.mxu0 %v5635_v58  ;;  %1523 = vmatprep.subr.mxu1 %v5636_v59  ;;  %v5692_v57 = vsub.s32 0, %v5691_v55  ;;  %v5694_v59 = vld [vmem:[#allocation167_spill] sm:$0xff] }
 0x1ab   : > { %1453 = vmatpush2.msra.mxu0 %v5637_v60  ;;  %1524 = vmatpush2.msra.mxu1 %v5638_v61  ;;  %vm1584_vm2 = vcmp.eq.s32.totalorder %v5694_v59, %v1583_v54  ;;  %v5695_v60 = vmov 0  }
 0x1ac   : > { %1454 = vmatprep.subr.mxu0 %v5639_v2  ;;  %1525 = vmatprep.subr.mxu1 %v5640_v14  ;;  %v4115_v58 = vrot.slane %v858_v53, %v5692_v57  ;;  %v1585_v61 = vsel %vm1584_vm2, 1, %v5695_v60  ;;  %v5696_v2 = vsub.s32 1, %v5691_v55 }
 0x1ad   : > { %1455 = vmatpush2.msra.mxu0 %v5641_v13  ;;  %1526 = vmatpush2.msra.mxu1 %v5642_v10 }
 0x1ae   : > { %1456 = vmatprep.subr.mxu0 %v5643_v4  ;;  %1527 = vmatprep.subr.mxu1 %v5644_v17  ;;  %5693 = vst [vmem:[#allocation15_spill] sm:$0xff] %v4115_v58  ;;  %v4121_v14 = vrot.slane %v858_v53, %v5696_v2 }
 0x1af   : > { %1457 = vmatpush2.msra.mxu0 %v5645_v0  ;;  %1528 = vmatpush2.msra.mxu1 %v5646_v9 }
 0x1b0   : > { %1458 = vmatprep.subr.mxu0 %v5647_v56  ;;  %1529 = vmatprep.subr.mxu1 %v5648_v6  ;;  %5697 = vst [vmem:[#allocation16_spill] sm:$0xff] %v4121_v14  ;;  %v5698_v6 = vsub.s32 3, %v5691_v55 }
 0x1b1   : > { %1459 = vmatpush2.msra.mxu0 %v5649_v11  ;;  %1530 = vmatpush2.msra.mxu1 %v5650_v3 }
 0x1b2   : > { %1460 = vmatprep.subr.mxu0 %v5651_v12  ;;  %1531 = vmatprep.subr.mxu1 %v5652_v1  ;;  %v4127_v11 = vrot.slane %v858_v53, %v5698_v6  ;;  %v5700_v1 = vsub.s32 2, %v5691_v55  ;;  %v4163_v6 = vld [vmem:[#allocation9 + $0x1d8] sm:$0xff] }
 0x1b3   : > { %1461 = vmatpush2.msra.mxu0 %v5653_v63  ;;  %1532 = vmatpush2.msra.mxu1 %v5654_v5 }
 0x1b4   : > { %1462 = vmatprep.subr.mxu0 %v5655_v21  ;;  %1533 = vmatprep.subr.mxu1 %v5656_v62  ;;  %5699 = vst [vmem:[#allocation17_spill] sm:$0xff] %v4127_v11  ;;  %v4132_v63 = vrot.slane %v858_v53, %v5700_v1  ;;  %v4172_v1 = vld [vmem:[#allocation9 + $0x1a8] sm:$0xff] }
 0x1b5   : > { %1463 = vmatpush2.msra.mxu0 %v5657_v18  ;;  %1534 = vmatpush2.msra.mxu1 %v5658_v15 }
 0x1b6   : > { %1464 = vmatprep.subr.mxu0 %v5659_v16  ;;  %1535 = vmatprep.subr.mxu1 %v5660_v20  ;;  %5701 = vst [vmem:[#allocation18_spill] sm:$0xff] %v4132_v63 }
 0x1b7   : > { %1465 = vmatpush2.msra.mxu0 %v5661_v8  ;;  %1536 = vmatpush2.msra.mxu1 %v5662_v19 }
 0x1b8   : > { %1466 = vmatprep.subr.mxu0 %v5663_v22  ;;  %1537 = vmatprep.subr.mxu1 %v5664_v23  ;;  %v865_v22 = vld [vmem:[#allocation6] sm:$0xff] }
 0x1b9   : > { %1467 = vmatpush2.msra.mxu0 %v5665_v24  ;;  %1538 = vmatpush2.msra.mxu1 %v5666_v25  ;;  %v5702_v23 = vld [vmem:[#allocation169_spill] sm:$0xff] }
 0x1ba   : > { %1468 = vmatprep.subr.mxu0 %v5667_v26  ;;  %1539 = vmatprep.subr.mxu1 %v5668_v27 }
 0x1bb   : > { %1469 = vmatpush2.msra.mxu0 %v5669_v28  ;;  %1540 = vmatpush2.msra.mxu1 %v5670_v29  ;;  %v5703_v29 = vld [vmem:[#allocation170_spill] sm:$0xff] }
 0x1bc   : > { %1470 = vmatprep.subr.mxu0 %v5671_v30  ;;  %1541 = vmatprep.subr.mxu1 %v5672_v31 }
 0x1bd   : > { %1471 = vmatpush2.msra.mxu0 %v5673_v32  ;;  %1542 = vmatpush2.msra.mxu1 %v5674_v33 }
 0x1be   : > { %1472 = vmatprep.subr.mxu0 %v5675_v34  ;;  %1543 = vmatprep.subr.mxu1 %v5676_v35 }
 0x1bf   : > { %1473 = vmatpush2.msra.mxu0 %v5677_v36  ;;  %1544 = vmatpush2.msra.mxu1 %v5678_v37 }
 0x1c0   : > { %1474 = vmatprep.subr.mxu0 %v5679_v38  ;;  %1545 = vmatprep.subr.mxu1 %v5680_v39  ;;  %v5704_v38 = vld [vmem:[#allocation173_spill] sm:$0xff] }
 0x1c1   : > { %1475 = vmatpush2.msra.mxu0 %v5681_v40  ;;  %1546 = vmatpush2.msra.mxu1 %v5682_v41  ;;  %v5705_v40 = vld [vmem:[#allocation171_spill] sm:$0xff] }
 0x1c2   : > { %1476 = vmatprep.subr.mxu0 %v5683_v42  ;;  %1547 = vmatprep.subr.mxu1 %v5684_v43 }
 0x1c3   : > { %1477 = vmatpush2.msra.mxu0 %v5685_v44  ;;  %1548 = vmatpush2.msra.mxu1 %v5686_v46 }
 0x1c4   : > { %1478 = vmatprep.subr.mxu0 %v5687_v47  ;;  %1549 = vmatprep.subr.mxu1 %v5688_v48 }
 0x1c5   : > { %1479 = vmatpush2.msra.mxu0 %v5689_v49  ;;  %1550 = vmatpush2.msra.mxu1 %v5690_v50 }
 0x1c6   : > { %1598 = vmatprep.subr.mxu0 %v4103_v51  ;;  %1669 = vmatprep.subr.mxu1 %v4106_v52 }
 0x1c7   : > { %1587 = vperm.xlu0 %2659, %v1585_v61  }
 0x224   : > { %v1131_v13 = vpop.f32.mrf.mxu0  ;;  %v1202_v9 = vpop.f32.mrf.mxu1 }
 0x225   : > { %v1132_v10 = vadd.f32 %v1131_v13, %v4115_v58  ;;  %v1203_v62 = vadd.f32 %v1202_v9, %v4132_v63  ;;  %v4154_v9 = vld [vmem:[#allocation9 + $0x1e0] sm:$0xff] }
 0x226   : > { %v1133_v4 = vpop.f32.mrf.mxu0  ;;  %v1204_v3 = vpop.f32.mrf.mxu1 }
 0x227   : > { %v2529_v17 = vmul.f32 -1.442695, %v1132_v10  ;;  %v1134_v0 = vadd.f32 %v1133_v4, %v4121_v14  ;;  %v1205_v12 = vadd.f32 %v1204_v3, %v4127_v11  ;;  %v4166_v3 = vld [vmem:[#allocation9 + $0x1c0] sm:$0xff] }
 0x229   : > { %2677 = vpow2.f32 %v2529_v17  ;;  %v2530_v56 = vmul.f32 -1.442695, %v1134_v0  ;;  %v2531_v5 = vmul.f32 -1.442695, %v1205_v12  ;;  %v4169_v12 = vld [vmem:[#allocation9 + $0x1d0] sm:$0xff] }
 0x22b   : > { %2679 = vpow2.f32 %v2530_v56  ;;  %v4157_v56 = vld [vmem:[#allocation9 + $0x1f0] sm:$0xff] }
 0x22c   : > { %2681 = vpow2.f32 %v2531_v5  ;;  %v4175_v5 = vld [vmem:[#allocation9 + $0x1b8] sm:$0xff] }
 0x236   : > { %v2678_v21 = vpop.eup %2677 }
 0x237   : > { %v1210_v18 = vadd.f32 1.0, %v2678_v21  ;;  %v4178_v21 = vld [vmem:[#allocation9 + $0x1a0] sm:$0xff] }
 0x238   : > { %v2680_v15 = vpop.eup %2679 }
 0x239   : > { %2683 = vrcp.f32 %v1210_v18  ;;  %v1216_v16 = vadd.f32 1.0, %v2680_v15  ;;  %v2682_v20 = vpop.eup %2681  ;;  %v4184_v18 = vld [vmem:[#allocation9 + $0x188] sm:$0xff]  ;;  %v4187_v15 = vld [vmem:[#allocation9 + $0x198] sm:$0xff] }
 0x23a   : > { %2685 = vtanh.f32 %v1203_v62  ;;  %v1223_v33 = vadd.f32 1.0, %v2682_v20  ;;  %v4181_v62 = vld [vmem:[#allocation9 + $0x1b0] sm:$0xff] }
 0x23b   : > { %2687 = vrcp.f32 %v1216_v16  ;;  %v4190_v16 = vld [vmem:[#allocation9 + $0x180] sm:$0xff]  ;;  %v4193_v20 = vld [vmem:[#allocation9 + $0x190] sm:$0xff] }
 0x245   : > { %v1312_v8 = vpop.f32.mrf.mxu0  ;;  %v1383_v34 = vpop.f32.mrf.mxu1 }
 0x246   : > { %v2684_v19 = vpop.eup %2683  ;;  %v1388_v24 = vadd.f32 %v1312_v8, %v5702_v23  ;;  %v1390_v41 = vadd.f32 %v1383_v34, %v5705_v40  ;;  %v4196_v8 = vld [vmem:[#allocation9 + $0x168] sm:$0xff]  ;;  %v4205_v23 = vld [vmem:[#allocation9 + $0x170] sm:$0xff]  ;;  %v4238_v34 = vld [vmem:[#allocation9 + $0x100] sm:$0xff] }
 0x247   : > { %v2686_v25 = vpop.eup %2685  ;;  %v1314_v26 = vpop.f32.mrf.mxu0  ;;  %v4253_v40 = vld [vmem:[#allocation9 + $0xf0] sm:$0xff] }
 0x248   : > { %v2688_v27 = vpop.eup %2687  ;;  %v2532_v28 = vmul.f32 -1.442695, %v1388_v24  ;;  %v1389_v30 = vadd.f32 %v1314_v26, %v5703_v29  ;;  %v1227_v31 = vmul.f32 %v2686_v25, %v2684_v19  ;;  %v1385_v37 = vpop.f32.mrf.mxu1  ;;  %v4199_v19 = vld [vmem:[#allocation9 + $0x178] sm:$0xff]  ;;  %v4208_v24 = vld [vmem:[#allocation9 + $0x148] sm:$0xff]  ;;  %v4214_v26 = vld [vmem:[#allocation9 + $0x140] sm:$0xff] }
 0x249   : > { %v1226_v32 = vmul.f32 %v2688_v27, %v865_v22  ;;  %v1391_v39 = vadd.f32 %v1385_v37, %v5704_v38  ;;  %v4202_v22 = vld [vmem:[#allocation9 + $0x160] sm:$0xff]  ;;  %v4211_v25 = vld [vmem:[#allocation9 + $0x158] sm:$0xff]  ;;  %v4217_v27 = vld [vmem:[#allocation9 + $0x150] sm:$0xff] }
 0x24a   : > { %2689 = vpow2.f32 %v2532_v28  ;;  %v2533_v35 = vmul.f32 -1.442695, %v1389_v30  ;;  %v4220_v28 = vld [vmem:[#allocation9 + $0x128] sm:$0xff]  ;;  %v4223_v29 = vld [vmem:[#allocation9 + $0x138] sm:$0xff]  ;;  %v4226_v30 = vld [vmem:[#allocation9 + $0x120] sm:$0xff] }
 0x24b   : > { %v4137_v36 = vadd.f32 %v1227_v31, %v1226_v32  ;;  %v2534_v42 = vmul.f32 -1.442695, %v1391_v39  ;;  %v4229_v31 = vld [vmem:[#allocation9 + $0x130] sm:$0xff]  ;;  %v4232_v32 = vld [vmem:[#allocation9 + $0x108] sm:$0xff]  ;;  %v4247_v38 = vld [vmem:[#allocation9 + $0xf8] sm:$0xff] }
 0x24c   : > { %2691 = vpow2.f32 %v2533_v35  ;;  %v4241_v35 = vld [vmem:[#allocation9 + $0x110] sm:$0xff]  ;;  %v4244_v37 = vld [vmem:[#allocation9 + $0xe8] sm:$0xff]  ;;  %v4250_v39 = vld [vmem:[#allocation9 + $0xe0] sm:$0xff] }
 0x24d   : > { %2693 = vrcp.f32 %v1223_v33  ;;  %v4235_v33 = vld [vmem:[#allocation9 + $0x118] sm:$0xff] }
 0x24e   : > { %2695 = vtanh.f32 %v4137_v36 }
 0x24f   : > { %2697 = vtanh.f32 %v1390_v41  ;;  %v4256_v41 = vld [vmem:[#allocation9 + $0xc8] sm:$0xff] }
 0x250   : > { %2699 = vpow2.f32 %v2534_v42  ;;  %v4259_v42 = vld [vmem:[#allocation9 + $0xd8] sm:$0xff] }
 0x257   : > { %v2690_v43 = vpop.eup %2689 }
 0x258   : > { %v1395_v44 = vadd.f32 1.0, %v2690_v43  ;;  %v4262_v43 = vld [vmem:[#allocation9 + $0xc0] sm:$0xff] }
 0x259   : > { %v2692_v46 = vpop.eup %2691 }
 0x25a   : > { %v2694_v47 = vpop.eup %2693  ;;  %2701 = vrcp.f32 %v1395_v44  ;;  %v1401_v48 = vadd.f32 1.0, %v2692_v46  ;;  %v4265_v44 = vld [vmem:[#allocation9 + $0xd0] sm:$0xff]  ;;  %v4268_v46 = vld [vmem:[#allocation9 + $0xa8] sm:$0xff] }
 0x25b   : > { %v2696_v49 = vpop.eup %2695 }
 0x25c   : > { %2703 = vrcp.f32 %v1401_v48  ;;  %v4142_v50 = vmul.f32 %v2696_v49, %v2694_v47  ;;  %v2698_v53 = vpop.eup %2697  ;;  %v4271_v47 = vld [vmem:[#allocation9 + $0xb8] sm:$0xff]  ;;  %v4274_v48 = vld [vmem:[#allocation9 + $0xa0] sm:$0xff]  ;;  %v4277_v49 = vld [vmem:[#allocation9 + $0xb0] sm:$0xff] }
 0x25d   : > { %v2700_v54 = vpop.eup %2699  ;;  %5706 = vst [vmem:[#allocation19_spill] sm:$0xff] %v4277_v49 }
 0x25e   : > { %1480 = vmatprep.mubr.f32.mxu0 %v4142_v50  ;;  %1551 = vmatprep.mubr.f32.mxu1 %v4142_v50  ;;  %v1408_v2 = vadd.f32 1.0, %v2700_v54  ;;  %v4283_v54 = vld [vmem:[#allocation9 + $0x98] sm:$0xff] }
 0x25f   : > { %5708 = vst [vmem:[#allocation21_spill] sm:$0xff] %v4283_v54 }
 0x260   : > { %2705 = vrcp.f32 %v1408_v2  ;;  %v4295_v2 = vld [vmem:[#allocation9 + $0x78] sm:$0xff] }
 0x261   : > { %5712 = vst [vmem:[#allocation25_spill] sm:$0xff] %v4295_v2 }
 0x267   : > { %v2702_v55 = vpop.eup %2701 }
 0x268   : > { %v1412_v57 = vmul.f32 %v2702_v55, %v2698_v53  ;;  %v4280_v53 = vld [vmem:[#allocation9 + $0x88] sm:$0xff]  ;;  %v4286_v55 = vld [vmem:[#allocation9 + $0x80] sm:$0xff] }
 0x269   : > { %v2704_v61 = vpop.eup %2703  ;;  %5707 = vst [vmem:[#allocation20_spill] sm:$0xff] %v4280_v53  ;;  %5709 = vst [vmem:[#allocation22_spill] sm:$0xff] %v4286_v55 }
 0x26a   : > { %v1411_v13 = vmul.f32 %v2704_v61, %v3902_v7  ;;  %v4160_v7 = vld [vmem:[#allocation9 + $0x1c8] sm:$0xff] }
 0x26b   : > { %v4292_v61 = vld [vmem:[#allocation9 + $0x68] sm:$0xff] }
 0x26c   : > { %v4147_v10 = vadd.f32 %v1412_v57, %v1411_v13  ;;  %v4289_v57 = vld [vmem:[#allocation9 + $0x90] sm:$0xff]  ;;  %5711 = vst [vmem:[#allocation24_spill] sm:$0xff] %v4292_v61  ;;  %v4298_v13 = vld [vmem:[#allocation9 + $0x60] sm:$0xff] }
 0x26d   : > { %v2706_v4 = vpop.eup %2705  ;;  %5710 = vst [vmem:[#allocation23_spill] sm:$0xff] %v4289_v57  ;;  %5713 = vst [vmem:[#allocation26_spill] sm:$0xff] %v4298_v13 }
 0x26e   : > { %2707 = vtanh.f32 %v4147_v10 }
 0x27b   : > { %v2708_v17 = vpop.eup %2707 }
 0x27c   : > { %v4150_v0 = vmul.f32 %v2708_v17, %v2706_v4  ;;  %v4301_v4 = vld [vmem:[#allocation9 + $0x70] sm:$0xff]  ;;  %v4304_v17 = vld [vmem:[#allocation9 + $0x48] sm:$0xff] }
 0x27d   : > { %5714 = vst [vmem:[#allocation27_spill] sm:$0xff] %v4301_v4  ;;  %5715 = vst [vmem:[#allocation28_spill] sm:$0xff] %v4304_v17 }
 0x27e   : > { %1481 = vmatmul.mubr.f32.vlgmr.msra.gmra.mxu0 %v4150_v0  ;;  %1552 = vmatmul.mubr.f32.vlgmr.msra.gmra.mxu1 %v4150_v0 }
 0x27f   : > { %1599 = vmatpush1.msra.mxu0 %v4154_v9  ;;  %1670 = vmatpush1.msra.mxu1 %v4157_v56 }
 0x280   : > { %1600 = vmatprep.subr.mxu0 %v4160_v7  ;;  %1671 = vmatprep.subr.mxu1 %v4163_v6 }
 0x281   : > { %1601 = vmatpush1.msra.mxu0 %v4166_v3  ;;  %1672 = vmatpush1.msra.mxu1 %v4169_v12 }
 0x282   : > { %1602 = vmatprep.subr.mxu0 %v4172_v1  ;;  %1673 = vmatprep.subr.mxu1 %v4175_v5 }
 0x283   : > { %1603 = vmatpush1.msra.mxu0 %v4178_v21  ;;  %1674 = vmatpush1.msra.mxu1 %v4181_v62 }
 0x284   : > { %1604 = vmatprep.subr.mxu0 %v4184_v18  ;;  %1675 = vmatprep.subr.mxu1 %v4187_v15 }
 0x285   : > { %1605 = vmatpush1.msra.mxu0 %v4190_v16  ;;  %1676 = vmatpush1.msra.mxu1 %v4193_v20 }
 0x286   : > { %1606 = vmatprep.subr.mxu0 %v4196_v8  ;;  %1677 = vmatprep.subr.mxu1 %v4199_v19 }
 0x287   : > { %1607 = vmatpush1.msra.mxu0 %v4202_v22  ;;  %1678 = vmatpush1.msra.mxu1 %v4205_v23 }
 0x288   : > { %1608 = vmatprep.subr.mxu0 %v4208_v24  ;;  %1679 = vmatprep.subr.mxu1 %v4211_v25 }
 0x289   : > { %1609 = vmatpush1.msra.mxu0 %v4214_v26  ;;  %1680 = vmatpush1.msra.mxu1 %v4217_v27 }
 0x28a   : > { %1610 = vmatprep.subr.mxu0 %v4220_v28  ;;  %1681 = vmatprep.subr.mxu1 %v4223_v29 }
 0x28b   : > { %1611 = vmatpush1.msra.mxu0 %v4226_v30  ;;  %1682 = vmatpush1.msra.mxu1 %v4229_v31 }
 0x28c   : > { %1612 = vmatprep.subr.mxu0 %v4232_v32  ;;  %1683 = vmatprep.subr.mxu1 %v4235_v33 }
 0x28d   : > { %1613 = vmatpush1.msra.mxu0 %v4238_v34  ;;  %1684 = vmatpush1.msra.mxu1 %v4241_v35 }
 0x28e   : > { %1614 = vmatprep.subr.mxu0 %v4244_v37  ;;  %1685 = vmatprep.subr.mxu1 %v4247_v38 }
 0x28f   : > { %1615 = vmatpush1.msra.mxu0 %v4250_v39  ;;  %1686 = vmatpush1.msra.mxu1 %v4253_v40 }
 0x290   : > { %1616 = vmatprep.subr.mxu0 %v4256_v41  ;;  %1687 = vmatprep.subr.mxu1 %v4259_v42 }
 0x291   : > { %1617 = vmatpush1.msra.mxu0 %v4262_v43  ;;  %1688 = vmatpush1.msra.mxu1 %v4265_v44 }
 0x292   : > { %1618 = vmatprep.subr.mxu0 %v4268_v46  ;;  %1689 = vmatprep.subr.mxu1 %v4271_v47 }
 0x293   : > { %1619 = vmatpush1.msra.mxu0 %v4274_v48  ;;  %1690 = vmatpush1.msra.mxu1 %v4277_v49 }
 0x294   : > { %1620 = vmatprep.subr.mxu0 %v4280_v53  ;;  %1691 = vmatprep.subr.mxu1 %v4283_v54 }
 0x295   : > { %1621 = vmatpush1.msra.mxu0 %v4286_v55  ;;  %1692 = vmatpush1.msra.mxu1 %v4289_v57  ;;  %v4307_v57 = vld [vmem:[#allocation9 + $0x58] sm:$0xff] }
 0x296   : > { %1622 = vmatprep.subr.mxu0 %v4292_v61  ;;  %1693 = vmatprep.subr.mxu1 %v4295_v2  ;;  %5716 = vst [vmem:[#allocation29_spill] sm:$0xff] %v4307_v57  ;;  %v4310_v61 = vld [vmem:[#allocation9 + $0x40] sm:$0xff]  ;;  %v4313_v2 = vld [vmem:[#allocation9 + $0x50] sm:$0xff] }
 0x297   : > { %1623 = vmatpush1.msra.mxu0 %v4298_v13  ;;  %1694 = vmatpush1.msra.mxu1 %v4301_v4  ;;  %5717 = vst [vmem:[#allocation30_spill] sm:$0xff] %v4310_v61  ;;  %5718 = vst [vmem:[#allocation31_spill] sm:$0xff] %v4313_v2  ;;  %v4316_v13 = vld [vmem:[#allocation9 + $0x28] sm:$0xff]  ;;  %v4319_v4 = vld [vmem:[#allocation9 + $0x38] sm:$0xff] }
 0x298   : > { %1624 = vmatprep.subr.mxu0 %v4304_v17  ;;  %1695 = vmatprep.subr.mxu1 %v4307_v57  ;;  %5719 = vst [vmem:[#allocation32_spill] sm:$0xff] %v4316_v13  ;;  %5720 = vst [vmem:[#allocation33_spill] sm:$0xff] %v4319_v4  ;;  %v4322_v17 = vld [vmem:[#allocation9 + $0x20] sm:$0xff]  ;;  %v4325_v57 = vld [vmem:[#allocation9 + $0x30] sm:$0xff] }
 0x299   : > { %1625 = vmatpush1.msra.mxu0 %v4310_v61  ;;  %1696 = vmatpush1.msra.mxu1 %v4313_v2  ;;  %5721 = vst [vmem:[#allocation34_spill] sm:$0xff] %v4322_v17  ;;  %5722 = vst [vmem:[#allocation35_spill] sm:$0xff] %v4325_v57  ;;  %v4328_v61 = vld [vmem:[#allocation9 + $0x8] sm:$0xff]  ;;  %v4331_v2 = vld [vmem:[#allocation9 + $0x18] sm:$0xff] }
 0x29a   : > { %1626 = vmatprep.subr.mxu0 %v4316_v13  ;;  %1697 = vmatprep.subr.mxu1 %v4319_v4  ;;  %5723 = vst [vmem:[#allocation36_spill] sm:$0xff] %v4328_v61  ;;  %5724 = vst [vmem:[#allocation37_spill] sm:$0xff] %v4331_v2  ;;  %v4334_v13 = vld [vmem:[#allocation9] sm:$0xff]  ;;  %v4338_v4 = vld [vmem:[#allocation9 + $0x10] sm:$0xff] }
 0x29b   : > { %1627 = vmatpush1.msra.mxu0 %v4322_v17  ;;  %1698 = vmatpush1.msra.mxu1 %v4325_v57  ;;  %5725 = vst [vmem:[#allocation38_spill] sm:$0xff] %v4334_v13  ;;  %5726 = vst [vmem:[#allocation39_spill] sm:$0xff] %v4338_v4  ;;  %v4353_v57 = vld [vmem:[#allocation11 + $0x1f0] sm:$0xff] }
 0x29c   : > { %1628 = vmatprep.subr.mxu0 %v4328_v61  ;;  %1699 = vmatprep.subr.mxu1 %v4331_v2  ;;  %v4344_v61 = vld [vmem:[#allocation11 + $0x1e8] sm:$0xff]  ;;  %v4347_v2 = vld [vmem:[#allocation11 + $0x1f8] sm:$0xff]  ;;  %5730 = vst [vmem:[#allocation43_spill] sm:$0xff] %v4353_v57 }
 0x29d   : > { %1629 = vmatpush1.msra.mxu0 %v4334_v13  ;;  %1662 = vmatprep.mubr.f32.mxu0 %v5561_v45  ;;  %5727 = vst [vmem:[#allocation40_spill] sm:$0xff] %v4344_v61  ;;  %5728 = vst [vmem:[#allocation41_spill] sm:$0xff] %v4347_v2  ;;  %v4350_v13 = vld [vmem:[#allocation11 + $0x1e0] sm:$0xff] }
 0x29e   : > { %1700 = vmatpush1.msra.mxu1 %v4338_v4  ;;  %1733 = vmatprep.mubr.f32.mxu1 %v5561_v45  ;;  %5729 = vst [vmem:[#allocation42_spill] sm:$0xff] %v4350_v13  ;;  %v4356_v4 = vld [vmem:[#allocation11 + $0x1c8] sm:$0xff] }
 0x29f   : > { %1663 = vmatmul.mubr.f32.vlgmr.msra.gmra.mxu0 %v4150_v0  ;;  %1734 = vmatmul.mubr.f32.vlgmr.msra.gmra.mxu1 %v4150_v0  ;;  %5731 = vst [vmem:[#allocation44_spill] sm:$0xff] %v4356_v4  ;;  %v4359_v0 = vld [vmem:[#allocation11 + $0x1d8] sm:$0xff] }
 0x2a0   : > { %1768 = vmatprep.subr.mxu0 %v4344_v61  ;;  %1839 = vmatprep.subr.mxu1 %v4347_v2  ;;  %5732 = vst [vmem:[#allocation45_spill] sm:$0xff] %v4359_v0  ;;  %v4362_v61 = vld [vmem:[#allocation11 + $0x1c0] sm:$0xff]  ;;  %v4365_v2 = vld [vmem:[#allocation11 + $0x1d0] sm:$0xff] }
 0x2a1   : > { %1769 = vmatpush1.msra.mxu0 %v4350_v13  ;;  %1840 = vmatpush1.msra.mxu1 %v4353_v57  ;;  %5733 = vst [vmem:[#allocation46_spill] sm:$0xff] %v4362_v61  ;;  %5734 = vst [vmem:[#allocation47_spill] sm:$0xff] %v4365_v2  ;;  %v4368_v13 = vld [vmem:[#allocation11 + $0x1a8] sm:$0xff]  ;;  %v4371_v57 = vld [vmem:[#allocation11 + $0x1b8] sm:$0xff] }
 0x2a2   : > { %1770 = vmatprep.subr.mxu0 %v4356_v4  ;;  %1841 = vmatprep.subr.mxu1 %v4359_v0  ;;  %5735 = vst [vmem:[#allocation48_spill] sm:$0xff] %v4368_v13  ;;  %5736 = vst [vmem:[#allocation49_spill] sm:$0xff] %v4371_v57  ;;  %v4374_v4 = vld [vmem:[#allocation11 + $0x1a0] sm:$0xff]  ;;  %v4377_v0 = vld [vmem:[#allocation11 + $0x1b0] sm:$0xff] }
 0x2a3   : > { %1771 = vmatpush1.msra.mxu0 %v4362_v61  ;;  %1842 = vmatpush1.msra.mxu1 %v4365_v2  ;;  %5737 = vst [vmem:[#allocation50_spill] sm:$0xff] %v4374_v4  ;;  %5738 = vst [vmem:[#allocation51_spill] sm:$0xff] %v4377_v0  ;;  %v4380_v61 = vld [vmem:[#allocation11 + $0x188] sm:$0xff]  ;;  %v4383_v2 = vld [vmem:[#allocation11 + $0x198] sm:$0xff] }
 0x2a4   : > { %1772 = vmatprep.subr.mxu0 %v4368_v13  ;;  %1843 = vmatprep.subr.mxu1 %v4371_v57  ;;  %5739 = vst [vmem:[#allocation52_spill] sm:$0xff] %v4380_v61  ;;  %5740 = vst [vmem:[#allocation53_spill] sm:$0xff] %v4383_v2  ;;  %v4386_v13 = vld [vmem:[#allocation11 + $0x180] sm:$0xff]  ;;  %v4389_v57 = vld [vmem:[#allocation11 + $0x190] sm:$0xff] }
 0x2a5   : > { %1773 = vmatpush1.msra.mxu0 %v4374_v4  ;;  %1844 = vmatpush1.msra.mxu1 %v4377_v0  ;;  %5741 = vst [vmem:[#allocation54_spill] sm:$0xff] %v4386_v13  ;;  %5742 = vst [vmem:[#allocation55_spill] sm:$0xff] %v4389_v57  ;;  %v4392_v4 = vld [vmem:[#allocation11 + $0x168] sm:$0xff]  ;;  %v4395_v0 = vld [vmem:[#allocation11 + $0x178] sm:$0xff] }
 0x2a6   : > { %1774 = vmatprep.subr.mxu0 %v4380_v61  ;;  %1845 = vmatprep.subr.mxu1 %v4383_v2  ;;  %5743 = vst [vmem:[#allocation56_spill] sm:$0xff] %v4392_v4  ;;  %5744 = vst [vmem:[#allocation57_spill] sm:$0xff] %v4395_v0  ;;  %v4398_v61 = vld [vmem:[#allocation11 + $0x160] sm:$0xff]  ;;  %v4401_v2 = vld [vmem:[#allocation11 + $0x170] sm:$0xff] }
 0x2a7   : > { %1775 = vmatpush1.msra.mxu0 %v4386_v13  ;;  %1846 = vmatpush1.msra.mxu1 %v4389_v57  ;;  %5745 = vst [vmem:[#allocation58_spill] sm:$0xff] %v4398_v61  ;;  %5746 = vst [vmem:[#allocation59_spill] sm:$0xff] %v4401_v2  ;;  %v4404_v13 = vld [vmem:[#allocation11 + $0x148] sm:$0xff]  ;;  %v4407_v57 = vld [vmem:[#allocation11 + $0x158] sm:$0xff] }
 0x2a8   : > { %1776 = vmatprep.subr.mxu0 %v4392_v4  ;;  %1847 = vmatprep.subr.mxu1 %v4395_v0  ;;  %5747 = vst [vmem:[#allocation60_spill] sm:$0xff] %v4404_v13  ;;  %5748 = vst [vmem:[#allocation61_spill] sm:$0xff] %v4407_v57  ;;  %v4410_v4 = vld [vmem:[#allocation11 + $0x140] sm:$0xff]  ;;  %v4413_v0 = vld [vmem:[#allocation11 + $0x150] sm:$0xff] }
 0x2a9   : > { %1777 = vmatpush1.msra.mxu0 %v4398_v61  ;;  %1848 = vmatpush1.msra.mxu1 %v4401_v2  ;;  %5749 = vst [vmem:[#allocation62_spill] sm:$0xff] %v4410_v4  ;;  %5750 = vst [vmem:[#allocation63_spill] sm:$0xff] %v4413_v0  ;;  %v4416_v61 = vld [vmem:[#allocation11 + $0x128] sm:$0xff]  ;;  %v4419_v2 = vld [vmem:[#allocation11 + $0x138] sm:$0xff] }
 0x2aa   : > { %1778 = vmatprep.subr.mxu0 %v4404_v13  ;;  %1849 = vmatprep.subr.mxu1 %v4407_v57  ;;  %5751 = vst [vmem:[#allocation64_spill] sm:$0xff] %v4416_v61  ;;  %5752 = vst [vmem:[#allocation65_spill] sm:$0xff] %v4419_v2  ;;  %v4422_v13 = vld [vmem:[#allocation11 + $0x120] sm:$0xff]  ;;  %v4425_v57 = vld [vmem:[#allocation11 + $0x130] sm:$0xff] }
 0x2ab   : > { %1779 = vmatpush1.msra.mxu0 %v4410_v4  ;;  %1850 = vmatpush1.msra.mxu1 %v4413_v0  ;;  %5753 = vst [vmem:[#allocation66_spill] sm:$0xff] %v4422_v13  ;;  %5754 = vst [vmem:[#allocation67_spill] sm:$0xff] %v4425_v57  ;;  %v4428_v4 = vld [vmem:[#allocation11 + $0x108] sm:$0xff]  ;;  %v4431_v0 = vld [vmem:[#allocation11 + $0x118] sm:$0xff] }
 0x2ac   : > { %1780 = vmatprep.subr.mxu0 %v4416_v61  ;;  %1851 = vmatprep.subr.mxu1 %v4419_v2  ;;  %5755 = vst [vmem:[#allocation68_spill] sm:$0xff] %v4428_v4  ;;  %5756 = vst [vmem:[#allocation69_spill] sm:$0xff] %v4431_v0  ;;  %v4434_v61 = vld [vmem:[#allocation11 + $0x100] sm:$0xff]  ;;  %v4437_v2 = vld [vmem:[#allocation11 + $0x110] sm:$0xff] }
 0x2ad   : > { %1781 = vmatpush1.msra.mxu0 %v4422_v13  ;;  %1852 = vmatpush1.msra.mxu1 %v4425_v57  ;;  %5757 = vst [vmem:[#allocation70_spill] sm:$0xff] %v4434_v61  ;;  %5758 = vst [vmem:[#allocation71_spill] sm:$0xff] %v4437_v2  ;;  %v4440_v13 = vld [vmem:[#allocation11 + $0xe8] sm:$0xff]  ;;  %v4443_v57 = vld [vmem:[#allocation11 + $0xf8] sm:$0xff] }
 0x2ae   : > { %1782 = vmatprep.subr.mxu0 %v4428_v4  ;;  %1853 = vmatprep.subr.mxu1 %v4431_v0  ;;  %5759 = vst [vmem:[#allocation72_spill] sm:$0xff] %v4440_v13  ;;  %5760 = vst [vmem:[#allocation73_spill] sm:$0xff] %v4443_v57  ;;  %v4446_v4 = vld [vmem:[#allocation11 + $0xe0] sm:$0xff]  ;;  %v4449_v0 = vld [vmem:[#allocation11 + $0xf0] sm:$0xff] }
 0x2af   : > { %1783 = vmatpush1.msra.mxu0 %v4434_v61  ;;  %1854 = vmatpush1.msra.mxu1 %v4437_v2  ;;  %5761 = vst [vmem:[#allocation74_spill] sm:$0xff] %v4446_v4  ;;  %5762 = vst [vmem:[#allocation75_spill] sm:$0xff] %v4449_v0  ;;  %v4452_v61 = vld [vmem:[#allocation11 + $0xc8] sm:$0xff]  ;;  %v4455_v2 = vld [vmem:[#allocation11 + $0xd8] sm:$0xff] }
 0x2b0   : > { %1784 = vmatprep.subr.mxu0 %v4440_v13  ;;  %1855 = vmatprep.subr.mxu1 %v4443_v57  ;;  %5763 = vst [vmem:[#allocation76_spill] sm:$0xff] %v4452_v61  ;;  %5764 = vst [vmem:[#allocation77_spill] sm:$0xff] %v4455_v2  ;;  %v4458_v13 = vld [vmem:[#allocation11 + $0xc0] sm:$0xff]  ;;  %v4461_v57 = vld [vmem:[#allocation11 + $0xd0] sm:$0xff] }
 0x2b1   : > { %1785 = vmatpush1.msra.mxu0 %v4446_v4  ;;  %1856 = vmatpush1.msra.mxu1 %v4449_v0  ;;  %5765 = vst [vmem:[#allocation78_spill] sm:$0xff] %v4458_v13  ;;  %5766 = vst [vmem:[#allocation79_spill] sm:$0xff] %v4461_v57  ;;  %v4464_v4 = vld [vmem:[#allocation11 + $0xa8] sm:$0xff]  ;;  %v4467_v0 = vld [vmem:[#allocation11 + $0xb8] sm:$0xff] }
 0x2b2   : > { %1786 = vmatprep.subr.mxu0 %v4452_v61  ;;  %1857 = vmatprep.subr.mxu1 %v4455_v2  ;;  %5767 = vst [vmem:[#allocation80_spill] sm:$0xff] %v4464_v4  ;;  %5768 = vst [vmem:[#allocation81_spill] sm:$0xff] %v4467_v0  ;;  %v4470_v61 = vld [vmem:[#allocation11 + $0xa0] sm:$0xff]  ;;  %v4473_v2 = vld [vmem:[#allocation11 + $0xb0] sm:$0xff] }
 0x2b3   : > { %1787 = vmatpush1.msra.mxu0 %v4458_v13  ;;  %1858 = vmatpush1.msra.mxu1 %v4461_v57  ;;  %5769 = vst [vmem:[#allocation82_spill] sm:$0xff] %v4470_v61  ;;  %5770 = vst [vmem:[#allocation83_spill] sm:$0xff] %v4473_v2  ;;  %v4476_v13 = vld [vmem:[#allocation11 + $0x88] sm:$0xff]  ;;  %v4479_v57 = vld [vmem:[#allocation11 + $0x98] sm:$0xff] }
 0x2b4   : > { %1788 = vmatprep.subr.mxu0 %v4464_v4  ;;  %1859 = vmatprep.subr.mxu1 %v4467_v0  ;;  %5771 = vst [vmem:[#allocation84_spill] sm:$0xff] %v4476_v13  ;;  %5772 = vst [vmem:[#allocation85_spill] sm:$0xff] %v4479_v57  ;;  %v4482_v4 = vld [vmem:[#allocation11 + $0x80] sm:$0xff]  ;;  %v4485_v0 = vld [vmem:[#allocation11 + $0x90] sm:$0xff] }
 0x2b5   : > { %1789 = vmatpush1.msra.mxu0 %v4470_v61  ;;  %1860 = vmatpush1.msra.mxu1 %v4473_v2  ;;  %5773 = vst [vmem:[#allocation86_spill] sm:$0xff] %v4482_v4  ;;  %5774 = vst [vmem:[#allocation87_spill] sm:$0xff] %v4485_v0  ;;  %v4488_v61 = vld [vmem:[#allocation11 + $0x68] sm:$0xff]  ;;  %v4491_v2 = vld [vmem:[#allocation11 + $0x78] sm:$0xff] }
 0x2b6   : > { %1790 = vmatprep.subr.mxu0 %v4476_v13  ;;  %1861 = vmatprep.subr.mxu1 %v4479_v57  ;;  %5775 = vst [vmem:[#allocation88_spill] sm:$0xff] %v4488_v61  ;;  %5776 = vst [vmem:[#allocation89_spill] sm:$0xff] %v4491_v2  ;;  %v4494_v13 = vld [vmem:[#allocation11 + $0x60] sm:$0xff]  ;;  %v4497_v57 = vld [vmem:[#allocation11 + $0x70] sm:$0xff] }
 0x2b7   : > { %1791 = vmatpush1.msra.mxu0 %v4482_v4  ;;  %1862 = vmatpush1.msra.mxu1 %v4485_v0  ;;  %5777 = vst [vmem:[#allocation90_spill] sm:$0xff] %v4494_v13  ;;  %5778 = vst [vmem:[#allocation91_spill] sm:$0xff] %v4497_v57  ;;  %v4500_v4 = vld [vmem:[#allocation11 + $0x48] sm:$0xff]  ;;  %v4503_v0 = vld [vmem:[#allocation11 + $0x58] sm:$0xff] }
 0x2b8   : > { %1792 = vmatprep.subr.mxu0 %v4488_v61  ;;  %1863 = vmatprep.subr.mxu1 %v4491_v2  ;;  %5779 = vst [vmem:[#allocation92_spill] sm:$0xff] %v4500_v4  ;;  %5780 = vst [vmem:[#allocation93_spill] sm:$0xff] %v4503_v0  ;;  %v4506_v61 = vld [vmem:[#allocation11 + $0x40] sm:$0xff]  ;;  %v4509_v2 = vld [vmem:[#allocation11 + $0x50] sm:$0xff] }
 0x2b9   : > { %1793 = vmatpush1.msra.mxu0 %v4494_v13  ;;  %1864 = vmatpush1.msra.mxu1 %v4497_v57  ;;  %5781 = vst [vmem:[#allocation94_spill] sm:$0xff] %v4506_v61  ;;  %5782 = vst [vmem:[#allocation95_spill] sm:$0xff] %v4509_v2  ;;  %v4512_v13 = vld [vmem:[#allocation11 + $0x28] sm:$0xff]  ;;  %v4515_v57 = vld [vmem:[#allocation11 + $0x38] sm:$0xff] }
 0x2ba   : > { %1794 = vmatprep.subr.mxu0 %v4500_v4  ;;  %1865 = vmatprep.subr.mxu1 %v4503_v0  ;;  %5783 = vst [vmem:[#allocation96_spill] sm:$0xff] %v4512_v13  ;;  %5784 = vst [vmem:[#allocation97_spill] sm:$0xff] %v4515_v57  ;;  %v4518_v4 = vld [vmem:[#allocation11 + $0x20] sm:$0xff]  ;;  %v4521_v0 = vld [vmem:[#allocation11 + $0x30] sm:$0xff] }
 0x2bb   : > { %1795 = vmatpush1.msra.mxu0 %v4506_v61  ;;  %1866 = vmatpush1.msra.mxu1 %v4509_v2  ;;  %5785 = vst [vmem:[#allocation98_spill] sm:$0xff] %v4518_v4  ;;  %5786 = vst [vmem:[#allocation99_spill] sm:$0xff] %v4521_v0  ;;  %v4524_v61 = vld [vmem:[#allocation11 + $0x8] sm:$0xff]  ;;  %v4527_v2 = vld [vmem:[#allocation11 + $0x18] sm:$0xff] }
 0x2bc   : > { %1796 = vmatprep.subr.mxu0 %v4512_v13  ;;  %1867 = vmatprep.subr.mxu1 %v4515_v57  ;;  %5787 = vst [vmem:[#allocation100_spill] sm:$0xff] %v4524_v61  ;;  %5788 = vst [vmem:[#allocation101_spill] sm:$0xff] %v4527_v2  ;;  %v4530_v13 = vld [vmem:[#allocation11] sm:$0xff]  ;;  %v4533_v57 = vld [vmem:[#allocation11 + $0x10] sm:$0xff] }
 0x2bd   : > { %1797 = vmatpush1.msra.mxu0 %v4518_v4  ;;  %1868 = vmatpush1.msra.mxu1 %v4521_v0  ;;  %5789 = vst [vmem:[#allocation102_spill] sm:$0xff] %v4530_v13  ;;  %5790 = vst [vmem:[#allocation103_spill] sm:$0xff] %v4533_v57  ;;  %v4536_v4 = vld [vmem:[#allocation11 + $0x3e8] sm:$0xff]  ;;  %v4539_v0 = vld [vmem:[#allocation11 + $0x3f8] sm:$0xff] }
 0x2be   : > { %1798 = vmatprep.subr.mxu0 %v4524_v61  ;;  %1869 = vmatprep.subr.mxu1 %v4527_v2  ;;  %5791 = vst [vmem:[#allocation104_spill] sm:$0xff] %v4536_v4  ;;  %5792 = vst [vmem:[#allocation105_spill] sm:$0xff] %v4539_v0  ;;  %v4542_v61 = vld [vmem:[#allocation11 + $0x3e0] sm:$0xff]  ;;  %v4545_v2 = vld [vmem:[#allocation11 + $0x3f0] sm:$0xff] }
 0x2bf   : > { %1799 = vmatpush1.msra.mxu0 %v4530_v13  ;;  %1870 = vmatpush1.msra.mxu1 %v4533_v57  ;;  %5793 = vst [vmem:[#allocation106_spill] sm:$0xff] %v4542_v61  ;;  %5794 = vst [vmem:[#allocation107_spill] sm:$0xff] %v4545_v2  ;;  %v4548_v13 = vld [vmem:[#allocation11 + $0x3c8] sm:$0xff]  ;;  %v4551_v57 = vld [vmem:[#allocation11 + $0x3d8] sm:$0xff] }
 0x2c0   : > { %1800 = vmatprep.subr.mxu0 %v4536_v4  ;;  %1871 = vmatprep.subr.mxu1 %v4539_v0  ;;  %5795 = vst [vmem:[#allocation108_spill] sm:$0xff] %v4548_v13  ;;  %5796 = vst [vmem:[#allocation109_spill] sm:$0xff] %v4551_v57  ;;  %v4554_v4 = vld [vmem:[#allocation11 + $0x3c0] sm:$0xff]  ;;  %v4557_v0 = vld [vmem:[#allocation11 + $0x3d0] sm:$0xff] }
 0x2c1   : > { %1801 = vmatpush2.msra.mxu0 %v4542_v61  ;;  %1872 = vmatpush2.msra.mxu1 %v4545_v2  ;;  %5797 = vst [vmem:[#allocation110_spill] sm:$0xff] %v4554_v4  ;;  %5798 = vst [vmem:[#allocation111_spill] sm:$0xff] %v4557_v0  ;;  %v4560_v61 = vld [vmem:[#allocation11 + $0x3a8] sm:$0xff]  ;;  %v4563_v2 = vld [vmem:[#allocation11 + $0x3b8] sm:$0xff] }
 0x2c2   : > { %1802 = vmatprep.subr.mxu0 %v4548_v13  ;;  %1873 = vmatprep.subr.mxu1 %v4551_v57  ;;  %5799 = vst [vmem:[#allocation112_spill] sm:$0xff] %v4560_v61  ;;  %5800 = vst [vmem:[#allocation113_spill] sm:$0xff] %v4563_v2  ;;  %v4566_v13 = vld [vmem:[#allocation11 + $0x3a0] sm:$0xff]  ;;  %v4569_v57 = vld [vmem:[#allocation11 + $0x3b0] sm:$0xff] }
 0x2c3   : > { %1803 = vmatpush2.msra.mxu0 %v4554_v4  ;;  %1874 = vmatpush2.msra.mxu1 %v4557_v0  ;;  %5801 = vst [vmem:[#allocation114_spill] sm:$0xff] %v4566_v13  ;;  %5802 = vst [vmem:[#allocation115_spill] sm:$0xff] %v4569_v57  ;;  %v4572_v4 = vld [vmem:[#allocation11 + $0x388] sm:$0xff]  ;;  %v4575_v0 = vld [vmem:[#allocation11 + $0x398] sm:$0xff] }
 0x2c4   : > { %1804 = vmatprep.subr.mxu0 %v4560_v61  ;;  %1875 = vmatprep.subr.mxu1 %v4563_v2  ;;  %5803 = vst [vmem:[#allocation116_spill] sm:$0xff] %v4572_v4  ;;  %5804 = vst [vmem:[#allocation117_spill] sm:$0xff] %v4575_v0  ;;  %v4578_v61 = vld [vmem:[#allocation11 + $0x380] sm:$0xff]  ;;  %v4581_v2 = vld [vmem:[#allocation11 + $0x390] sm:$0xff] }
 0x2c5   : > { %1805 = vmatpush2.msra.mxu0 %v4566_v13  ;;  %1876 = vmatpush2.msra.mxu1 %v4569_v57  ;;  %5805 = vst [vmem:[#allocation118_spill] sm:$0xff] %v4578_v61  ;;  %5806 = vst [vmem:[#allocation119_spill] sm:$0xff] %v4581_v2  ;;  %v4584_v13 = vld [vmem:[#allocation11 + $0x368] sm:$0xff]  ;;  %v4587_v57 = vld [vmem:[#allocation11 + $0x378] sm:$0xff] }
 0x2c6   : > { %1806 = vmatprep.subr.mxu0 %v4572_v4  ;;  %1877 = vmatprep.subr.mxu1 %v4575_v0  ;;  %5807 = vst [vmem:[#allocation120_spill] sm:$0xff] %v4584_v13  ;;  %5808 = vst [vmem:[#allocation121_spill] sm:$0xff] %v4587_v57  ;;  %v4590_v4 = vld [vmem:[#allocation11 + $0x360] sm:$0xff]  ;;  %v4593_v0 = vld [vmem:[#allocation11 + $0x370] sm:$0xff] }
 0x2c7   : > { %1807 = vmatpush2.msra.mxu0 %v4578_v61  ;;  %1878 = vmatpush2.msra.mxu1 %v4581_v2  ;;  %5809 = vst [vmem:[#allocation122_spill] sm:$0xff] %v4590_v4  ;;  %5810 = vst [vmem:[#allocation123_spill] sm:$0xff] %v4593_v0  ;;  %v4596_v61 = vld [vmem:[#allocation11 + $0x348] sm:$0xff]  ;;  %v4599_v2 = vld [vmem:[#allocation11 + $0x358] sm:$0xff] }
 0x2c8   : > { %1808 = vmatprep.subr.mxu0 %v4584_v13  ;;  %1879 = vmatprep.subr.mxu1 %v4587_v57  ;;  %5811 = vst [vmem:[#allocation124_spill] sm:$0xff] %v4596_v61  ;;  %5812 = vst [vmem:[#allocation125_spill] sm:$0xff] %v4599_v2  ;;  %v4602_v13 = vld [vmem:[#allocation11 + $0x340] sm:$0xff]  ;;  %v4605_v57 = vld [vmem:[#allocation11 + $0x350] sm:$0xff] }
 0x2c9   : > { %1809 = vmatpush2.msra.mxu0 %v4590_v4  ;;  %1880 = vmatpush2.msra.mxu1 %v4593_v0  ;;  %5813 = vst [vmem:[#allocation126_spill] sm:$0xff] %v4602_v13  ;;  %5814 = vst [vmem:[#allocation127_spill] sm:$0xff] %v4605_v57  ;;  %v4608_v4 = vld [vmem:[#allocation11 + $0x328] sm:$0xff]  ;;  %v4611_v0 = vld [vmem:[#allocation11 + $0x338] sm:$0xff] }
 0x2ca   : > { %1810 = vmatprep.subr.mxu0 %v4596_v61  ;;  %1881 = vmatprep.subr.mxu1 %v4599_v2  ;;  %5815 = vst [vmem:[#allocation128_spill] sm:$0xff] %v4608_v4  ;;  %5816 = vst [vmem:[#allocation129_spill] sm:$0xff] %v4611_v0  ;;  %v4614_v61 = vld [vmem:[#allocation11 + $0x320] sm:$0xff]  ;;  %v4617_v2 = vld [vmem:[#allocation11 + $0x330] sm:$0xff] }
 0x2cb   : > { %1811 = vmatpush2.msra.mxu0 %v4602_v13  ;;  %1882 = vmatpush2.msra.mxu1 %v4605_v57  ;;  %5817 = vst [vmem:[#allocation130_spill] sm:$0xff] %v4614_v61  ;;  %5818 = vst [vmem:[#allocation131_spill] sm:$0xff] %v4617_v2  ;;  %v4620_v13 = vld [vmem:[#allocation11 + $0x308] sm:$0xff]  ;;  %v4623_v57 = vld [vmem:[#allocation11 + $0x318] sm:$0xff] }
 0x2cc   : > { %1812 = vmatprep.subr.mxu0 %v4608_v4  ;;  %1883 = vmatprep.subr.mxu1 %v4611_v0  ;;  %5819 = vst [vmem:[#allocation132_spill] sm:$0xff] %v4620_v13  ;;  %5820 = vst [vmem:[#allocation133_spill] sm:$0xff] %v4623_v57  ;;  %v4626_v4 = vld [vmem:[#allocation11 + $0x300] sm:$0xff]  ;;  %v4629_v0 = vld [vmem:[#allocation11 + $0x310] sm:$0xff] }
 0x2cd   : > { %1813 = vmatpush2.msra.mxu0 %v4614_v61  ;;  %1884 = vmatpush2.msra.mxu1 %v4617_v2  ;;  %5821 = vst [vmem:[#allocation134_spill] sm:$0xff] %v4626_v4  ;;  %5822 = vst [vmem:[#allocation135_spill] sm:$0xff] %v4629_v0  ;;  %v4632_v61 = vld [vmem:[#allocation11 + $0x2e8] sm:$0xff]  ;;  %v4635_v2 = vld [vmem:[#allocation11 + $0x2f8] sm:$0xff] }
 0x2ce   : > { %1814 = vmatprep.subr.mxu0 %v4620_v13  ;;  %1885 = vmatprep.subr.mxu1 %v4623_v57  ;;  %5823 = vst [vmem:[#allocation136_spill] sm:$0xff] %v4632_v61  ;;  %5824 = vst [vmem:[#allocation137_spill] sm:$0xff] %v4635_v2  ;;  %v4638_v13 = vld [vmem:[#allocation11 + $0x2e0] sm:$0xff]  ;;  %v4641_v57 = vld [vmem:[#allocation11 + $0x2f0] sm:$0xff] }
 0x2cf   : > { %1815 = vmatpush2.msra.mxu0 %v4626_v4  ;;  %1886 = vmatpush2.msra.mxu1 %v4629_v0  ;;  %5825 = vst [vmem:[#allocation138_spill] sm:$0xff] %v4638_v13  ;;  %5826 = vst [vmem:[#allocation139_spill] sm:$0xff] %v4641_v57  ;;  %v4644_v4 = vld [vmem:[#allocation11 + $0x2c8] sm:$0xff]  ;;  %v4647_v0 = vld [vmem:[#allocation11 + $0x2d8] sm:$0xff] }
 0x2d0   : > { %1816 = vmatprep.subr.mxu0 %v4632_v61  ;;  %1887 = vmatprep.subr.mxu1 %v4635_v2  ;;  %5827 = vst [vmem:[#allocation140_spill] sm:$0xff] %v4644_v4  ;;  %5828 = vst [vmem:[#allocation141_spill] sm:$0xff] %v4647_v0  ;;  %v4650_v61 = vld [vmem:[#allocation11 + $0x2c0] sm:$0xff]  ;;  %v4653_v2 = vld [vmem:[#allocation11 + $0x2d0] sm:$0xff] }
 0x2d1   : > { %1817 = vmatpush2.msra.mxu0 %v4638_v13  ;;  %1888 = vmatpush2.msra.mxu1 %v4641_v57  ;;  %5829 = vst [vmem:[#allocation142_spill] sm:$0xff] %v4650_v61  ;;  %5830 = vst [vmem:[#allocation143_spill] sm:$0xff] %v4653_v2  ;;  %v4656_v13 = vld [vmem:[#allocation11 + $0x2a8] sm:$0xff]  ;;  %v4659_v57 = vld [vmem:[#allocation11 + $0x2b8] sm:$0xff] }
 0x2d2   : > { %1818 = vmatprep.subr.mxu0 %v4644_v4  ;;  %1889 = vmatprep.subr.mxu1 %v4647_v0  ;;  %5831 = vst [vmem:[#allocation144_spill] sm:$0xff] %v4656_v13  ;;  %5832 = vst [vmem:[#allocation145_spill] sm:$0xff] %v4659_v57  ;;  %v4662_v4 = vld [vmem:[#allocation11 + $0x2a0] sm:$0xff]  ;;  %v4665_v0 = vld [vmem:[#allocation11 + $0x2b0] sm:$0xff] }
 0x2d3   : > { %1819 = vmatpush2.msra.mxu0 %v4650_v61  ;;  %1890 = vmatpush2.msra.mxu1 %v4653_v2  ;;  %5833 = vst [vmem:[#allocation146_spill] sm:$0xff] %v4662_v4  ;;  %5834 = vst [vmem:[#allocation147_spill] sm:$0xff] %v4665_v0  ;;  %v4668_v61 = vld [vmem:[#allocation11 + $0x288] sm:$0xff]  ;;  %v4671_v2 = vld [vmem:[#allocation11 + $0x298] sm:$0xff] }
 0x2d4   : > { %1820 = vmatprep.subr.mxu0 %v4656_v13  ;;  %1891 = vmatprep.subr.mxu1 %v4659_v57  ;;  %5835 = vst [vmem:[#allocation148_spill] sm:$0xff] %v4668_v61  ;;  %5836 = vst [vmem:[#allocation149_spill] sm:$0xff] %v4671_v2  ;;  %v4674_v13 = vld [vmem:[#allocation11 + $0x280] sm:$0xff]  ;;  %v4677_v57 = vld [vmem:[#allocation11 + $0x290] sm:$0xff] }
 0x2d5   : > { %1821 = vmatpush2.msra.mxu0 %v4662_v4  ;;  %1892 = vmatpush2.msra.mxu1 %v4665_v0  ;;  %5837 = vst [vmem:[#allocation150_spill] sm:$0xff] %v4674_v13  ;;  %5838 = vst [vmem:[#allocation151_spill] sm:$0xff] %v4677_v57  ;;  %v4680_v4 = vld [vmem:[#allocation11 + $0x268] sm:$0xff]  ;;  %v4683_v0 = vld [vmem:[#allocation11 + $0x278] sm:$0xff] }
 0x2d6   : > { %1822 = vmatprep.subr.mxu0 %v4668_v61  ;;  %1893 = vmatprep.subr.mxu1 %v4671_v2  ;;  %5839 = vst [vmem:[#allocation152_spill] sm:$0xff] %v4680_v4  ;;  %5840 = vst [vmem:[#allocation153_spill] sm:$0xff] %v4683_v0  ;;  %v4686_v61 = vld [vmem:[#allocation11 + $0x260] sm:$0xff]  ;;  %v4689_v2 = vld [vmem:[#allocation11 + $0x270] sm:$0xff] }
 0x2d7   : > { %1823 = vmatpush2.msra.mxu0 %v4674_v13  ;;  %1894 = vmatpush2.msra.mxu1 %v4677_v57  ;;  %5841 = vst [vmem:[#allocation154_spill] sm:$0xff] %v4686_v61  ;;  %5842 = vst [vmem:[#allocation155_spill] sm:$0xff] %v4689_v2  ;;  %v4692_v13 = vld [vmem:[#allocation11 + $0x248] sm:$0xff]  ;;  %v4695_v57 = vld [vmem:[#allocation11 + $0x258] sm:$0xff] }
 0x2d8   : > { %1824 = vmatprep.subr.mxu0 %v4680_v4  ;;  %1895 = vmatprep.subr.mxu1 %v4683_v0  ;;  %5843 = vst [vmem:[#allocation156_spill] sm:$0xff] %v4692_v13  ;;  %5844 = vst [vmem:[#allocation157_spill] sm:$0xff] %v4695_v57  ;;  %v4698_v4 = vld [vmem:[#allocation11 + $0x240] sm:$0xff]  ;;  %v4701_v0 = vld [vmem:[#allocation11 + $0x250] sm:$0xff] }
 0x2d9   : > { %1825 = vmatpush2.msra.mxu0 %v4686_v61  ;;  %1896 = vmatpush2.msra.mxu1 %v4689_v2  ;;  %5845 = vst [vmem:[#allocation158_spill] sm:$0xff] %v4698_v4  ;;  %5846 = vst [vmem:[#allocation159_spill] sm:$0xff] %v4701_v0  ;;  %v4704_v61 = vld [vmem:[#allocation11 + $0x228] sm:$0xff]  ;;  %v4707_v2 = vld [vmem:[#allocation11 + $0x238] sm:$0xff] }
 0x2da   : > { %1826 = vmatprep.subr.mxu0 %v4692_v13  ;;  %1897 = vmatprep.subr.mxu1 %v4695_v57  ;;  %5847 = vst [vmem:[#allocation160_spill] sm:$0xff] %v4704_v61  ;;  %5848 = vst [vmem:[#allocation161_spill] sm:$0xff] %v4707_v2  ;;  %v4710_v13 = vld [vmem:[#allocation11 + $0x220] sm:$0xff]  ;;  %v4713_v57 = vld [vmem:[#allocation11 + $0x230] sm:$0xff] }
 0x2db   : > { %1827 = vmatpush2.msra.mxu0 %v4698_v4  ;;  %1898 = vmatpush2.msra.mxu1 %v4701_v0  ;;  %5849 = vst [vmem:[#allocation162_spill] sm:$0xff] %v4710_v13  ;;  %5850 = vst [vmem:[#allocation163_spill] sm:$0xff] %v4713_v57  ;;  %v4716_v4 = vld [vmem:[#allocation11 + $0x208] sm:$0xff]  ;;  %v4719_v0 = vld [vmem:[#allocation11 + $0x218] sm:$0xff] }
 0x2dc   : > { %1828 = vmatprep.subr.mxu0 %v4704_v61  ;;  %1899 = vmatprep.subr.mxu1 %v4707_v2  ;;  %5851 = vst [vmem:[#allocation164_spill] sm:$0xff] %v4716_v4  ;;  %5852 = vst [vmem:[#allocation165_spill] sm:$0xff] %v4719_v0  ;;  %v4722_v61 = vld [vmem:[#allocation11 + $0x200] sm:$0xff]  ;;  %v4725_v2 = vld [vmem:[#allocation11 + $0x210] sm:$0xff] }
 0x2dd   : > { %1829 = vmatpush2.msra.mxu0 %v4710_v13  ;;  %1900 = vmatpush2.msra.mxu1 %v4713_v57  ;;  %5853 = vst [vmem:[#allocation166_spill] sm:$0xff] %v4722_v61  ;;  %5854 = vst [vmem:[#allocation168_spill] sm:$0xff] %v4725_v2  ;;  %v1935_v57 = vstv %s1934_s24 }
 0x2de   : > { %1830 = vmatprep.subr.mxu0 %v4716_v4  ;;  %1901 = vmatprep.subr.mxu1 %v4719_v0  ;;  %vm1936_vm3 = vcmp.eq.s32.totalorder %v5694_v59, %v1935_v57 }
 0x2df   : > { %1831 = vmatpush2.msra.mxu0 %v4722_v61  ;;  %1902 = vmatpush2.msra.mxu1 %v4725_v2  ;;  %v1937_v4 = vsel %vm1936_vm3, 1, %v5695_v60 }
 0x2e0   : > { %1950 = vmatprep.subr.mxu0 %v4103_v51  ;;  %2021 = vmatprep.subr.mxu1 %v4106_v52 }
 0x2e1   : > { %1939 = vperm.xlu1 %2660, %v1937_v4  }
 0x33e   : > { %v1482_v0 = vpop.f32.mrf.mxu0  ;;  %v1553_v2 = vpop.f32.mrf.mxu1 }
 0x33f   : > { %v1483_v13 = vadd.f32 %v1482_v0, %v4115_v58  ;;  %v1554_v57 = vadd.f32 %v1553_v2, %v4132_v63 }
 0x340   : > { %v1484_v45 = vpop.f32.mrf.mxu0  ;;  %v1555_v51 = vpop.f32.mrf.mxu1 }
 0x341   : > { %v2535_v61 = vmul.f32 -1.442695, %v1483_v13  ;;  %v1485_v17 = vadd.f32 %v1484_v45, %v4121_v14  ;;  %v1556_v52 = vadd.f32 %v1555_v51, %v4127_v11  ;;  %v5855_v14 = vld [vmem:[#allocation172_spill] sm:$0xff] }
 0x343   : > { %2709 = vpow2.f32 %v2535_v61  ;;  %v2536_v55 = vmul.f32 -1.442695, %v1485_v17  ;;  %v2537_v54 = vmul.f32 -1.442695, %v1556_v52  ;;  %v5856_v52 = vld [vmem:[#allocation174_spill] sm:$0xff] }
 0x345   : > { %2711 = vpow2.f32 %v2536_v55 }
 0x346   : > { %2713 = vpow2.f32 %v2537_v54 }
 0x350   : > { %v2710_v53 = vpop.eup %2709 }
 0x351   : > { %v1561_v60 = vadd.f32 1.0, %v2710_v53 }
 0x352   : > { %v2712_v4 = vpop.eup %2711 }
 0x353   : > { %2715 = vrcp.f32 %v1561_v60  ;;  %v1567_v0 = vadd.f32 1.0, %v2712_v4  ;;  %v2714_v13 = vpop.eup %2713 }
 0x354   : > { %2717 = vtanh.f32 %v1554_v57  ;;  %v1574_v2 = vadd.f32 1.0, %v2714_v13 }
 0x355   : > { %2719 = vrcp.f32 %v1567_v0 }
 0x35f   : > { %v1664_v45 = vpop.f32.mrf.mxu0  ;;  %v1735_v60 = vpop.f32.mrf.mxu1 }
 0x360   : > { %v2716_v61 = vpop.eup %2715  ;;  %v1740_v17 = vadd.f32 %v1664_v45, %v5855_v14  ;;  %v5857_v14 = vld [vmem:[#allocation177_spill] sm:$0xff]  ;;  %v1236_v45 = vpop.permute.xlu0 %1235 }
 0x361   : > { %v2718_v55 = vpop.eup %2717  ;;  %v1666_v58 = vpop.f32.mrf.mxu0  ;;  %vm1237_vm4 = vcmp.eq.s32.totalorder %v1236_v45, 1 }
 0x362   : > { %v2720_v59 = vpop.eup %2719  ;;  %v2538_v51 = vmul.f32 -1.442695, %v1740_v17  ;;  %v1741_v11 = vadd.f32 %v1666_v58, %v5856_v52  ;;  %v1578_v49 = vmul.f32 %v2718_v55, %v2716_v61  ;;  %v1737_v4 = vpop.f32.mrf.mxu1  ;;  %v5858_v17 = vld [vmem:[#allocation175_spill] sm:$0xff] }
 0x363   : > { %v1577_v53 = vmul.f32 %v2720_v59, %v4137_v36  ;;  %v1743_v0 = vadd.f32 %v1737_v4, %v5857_v14  ;;  %v1742_v63 = vadd.f32 %v1735_v60, %v5858_v17 }
 0x364   : > { %2721 = vpow2.f32 %v2538_v51  ;;  %v2539_v54 = vmul.f32 -1.442695, %v1741_v11  ;;  %v1588_v59 = vpop.permute.xlu0 %1587 }
 0x365   : > { %v4740_v57 = vadd.f32 %v1578_v49, %v1577_v53  ;;  %v2540_v58 = vmul.f32 -1.442695, %v1743_v0  ;;  %v866_v49 = vld [vmem:[#allocation7] sm:$0xff]  ;;  %vm1589_vm5 = vcmp.eq.s32.totalorder %v1588_v59, 1 }
 0x366   : > { %2723 = vpow2.f32 %v2539_v54  ;;  %v1238_v53 = vsel %vm1237_vm4, %v4142_v50, %v866_v49  ;;  %v5902_v59 = vld [vmem:[#allocation61_spill] sm:$0xff]  ;;  %v5905_v49 = vld [vmem:[#allocation64_spill] sm:$0xff] }
 0x367   : > { %2725 = vrcp.f32 %v1574_v2 }
 0x368   : > { %2727 = vtanh.f32 %v4740_v57 }
 0x369   : > { %2729 = vtanh.f32 %v1742_v63 }
 0x36a   : > { %2731 = vpow2.f32 %v2540_v58 }
 0x371   : > { %v2722_v61 = vpop.eup %2721 }
 0x372   : > { %v1747_v55 = vadd.f32 1.0, %v2722_v61 }
 0x373   : > { %v2724_v36 = vpop.eup %2723 }
 0x374   : > { %v2726_v11 = vpop.eup %2725  ;;  %2733 = vrcp.f32 %v1747_v55  ;;  %v1753_v13 = vadd.f32 1.0, %v2724_v36  ;;  %v5901_v55 = vld [vmem:[#allocation60_spill] sm:$0xff]  ;;  %v5903_v36 = vld [vmem:[#allocation62_spill] sm:$0xff] }
 0x375   : > { %v2728_v51 = vpop.eup %2727 }
 0x376   : > { %2735 = vrcp.f32 %v1753_v13  ;;  %v1581_v52 = vmul.f32 %v2728_v51, %v2726_v11  ;;  %v2730_v60 = vpop.eup %2729  ;;  %v5904_v11 = vld [vmem:[#allocation63_spill] sm:$0xff]  ;;  %v5906_v13 = vld [vmem:[#allocation65_spill] sm:$0xff]  ;;  %v5907_v51 = vld [vmem:[#allocation66_spill] sm:$0xff] }
 0x377   : > { %v2732_v63 = vpop.eup %2731 }
 0x378   : > { %v4746_v2 = vsel %vm1589_vm5, %v1581_v52, %v1238_v53  ;;  %1832 = vmatprep.mubr.f32.mxu0 %v1581_v52  ;;  %1903 = vmatprep.mubr.f32.mxu1 %v1581_v52  ;;  %v1760_v0 = vadd.f32 1.0, %v2732_v63  ;;  %v5908_v52 = vld [vmem:[#allocation67_spill] sm:$0xff]  ;;  %v5909_v53 = vld [vmem:[#allocation68_spill] sm:$0xff]  ;;  %v5911_v63 = vld [vmem:[#allocation70_spill] sm:$0xff] }
 0x37a   : > { %2737 = vrcp.f32 %v1760_v0  ;;  %v5915_v0 = vld [vmem:[#allocation74_spill] sm:$0xff] }
 0x381   : > { %v2734_v54 = vpop.eup %2733 }
 0x382   : > { %v1764_v4 = vmul.f32 %v2734_v54, %v2730_v60  ;;  %v5910_v60 = vld [vmem:[#allocation69_spill] sm:$0xff]  ;;  %v5912_v54 = vld [vmem:[#allocation71_spill] sm:$0xff] }
 0x383   : > { %v2736_v14 = vpop.eup %2735 }
 0x384   : > { %v1763_v45 = vmul.f32 %v2736_v14, %v4147_v10  ;;  %v5859_v10 = vld [vmem:[#allocation19_spill] sm:$0xff]  ;;  %v5914_v14 = vld [vmem:[#allocation73_spill] sm:$0xff] }
 0x386   : > { %v4749_v17 = vadd.f32 %v1764_v4, %v1763_v45  ;;  %v5913_v4 = vld [vmem:[#allocation72_spill] sm:$0xff]  ;;  %v5916_v45 = vld [vmem:[#allocation75_spill] sm:$0xff] }
 0x387   : > { %v2738_v58 = vpop.eup %2737 }
 0x388   : > { %2739 = vtanh.f32 %v4749_v17 }
 0x395   : > { %v2740_v61 = vpop.eup %2739 }
 0x396   : > { %v4752_v50 = vmul.f32 %v2740_v61, %v2738_v58  ;;  %v5917_v58 = vld [vmem:[#allocation76_spill] sm:$0xff]  ;;  %v5918_v61 = vld [vmem:[#allocation77_spill] sm:$0xff] }
 0x398   : > { %1833 = vmatmul.mubr.f32.vlgmr.msra.gmra.mxu0 %v4752_v50  ;;  %1904 = vmatmul.mubr.f32.vlgmr.msra.gmra.mxu1 %v4752_v50 }
 0x399   : > { %1951 = vmatpush1.msra.mxu0 %v4154_v9  ;;  %2022 = vmatpush1.msra.mxu1 %v4157_v56  ;;  %v5860_v9 = vld [vmem:[#allocation20_spill] sm:$0xff]  ;;  %v5861_v56 = vld [vmem:[#allocation21_spill] sm:$0xff] }
 0x39a   : > { %1952 = vmatprep.subr.mxu0 %v4160_v7  ;;  %2023 = vmatprep.subr.mxu1 %v4163_v6  ;;  %v5862_v7 = vld [vmem:[#allocation22_spill] sm:$0xff]  ;;  %v5863_v6 = vld [vmem:[#allocation23_spill] sm:$0xff] }
 0x39b   : > { %1953 = vmatpush1.msra.mxu0 %v4166_v3  ;;  %2024 = vmatpush1.msra.mxu1 %v4169_v12  ;;  %v5864_v3 = vld [vmem:[#allocation24_spill] sm:$0xff]  ;;  %v5865_v12 = vld [vmem:[#allocation25_spill] sm:$0xff] }
 0x39c   : > { %1954 = vmatprep.subr.mxu0 %v4172_v1  ;;  %2025 = vmatprep.subr.mxu1 %v4175_v5  ;;  %v5866_v1 = vld [vmem:[#allocation26_spill] sm:$0xff]  ;;  %v5867_v5 = vld [vmem:[#allocation27_spill] sm:$0xff] }
 0x39d   : > { %1955 = vmatpush1.msra.mxu0 %v4178_v21  ;;  %2026 = vmatpush1.msra.mxu1 %v4181_v62  ;;  %v5868_v21 = vld [vmem:[#allocation28_spill] sm:$0xff]  ;;  %v5869_v62 = vld [vmem:[#allocation29_spill] sm:$0xff] }
 0x39e   : > { %1956 = vmatprep.subr.mxu0 %v4184_v18  ;;  %2027 = vmatprep.subr.mxu1 %v4187_v15  ;;  %v5870_v18 = vld [vmem:[#allocation30_spill] sm:$0xff]  ;;  %v5871_v15 = vld [vmem:[#allocation31_spill] sm:$0xff] }
 0x39f   : > { %1957 = vmatpush1.msra.mxu0 %v4190_v16  ;;  %2028 = vmatpush1.msra.mxu1 %v4193_v20  ;;  %v5872_v16 = vld [vmem:[#allocation32_spill] sm:$0xff]  ;;  %v5873_v20 = vld [vmem:[#allocation33_spill] sm:$0xff] }
 0x3a0   : > { %1958 = vmatprep.subr.mxu0 %v4196_v8  ;;  %2029 = vmatprep.subr.mxu1 %v4199_v19  ;;  %v5874_v8 = vld [vmem:[#allocation34_spill] sm:$0xff]  ;;  %v5875_v19 = vld [vmem:[#allocation35_spill] sm:$0xff] }
 0x3a1   : > { %1959 = vmatpush1.msra.mxu0 %v4202_v22  ;;  %2030 = vmatpush1.msra.mxu1 %v4205_v23  ;;  %v5876_v22 = vld [vmem:[#allocation36_spill] sm:$0xff]  ;;  %v5877_v23 = vld [vmem:[#allocation37_spill] sm:$0xff] }
 0x3a2   : > { %1960 = vmatprep.subr.mxu0 %v4208_v24  ;;  %2031 = vmatprep.subr.mxu1 %v4211_v25  ;;  %v5878_v24 = vld [vmem:[#allocation38_spill] sm:$0xff]  ;;  %v5879_v25 = vmov 0.0  }
 0x3a3   : > { %1961 = vmatpush1.msra.mxu0 %v4214_v26  ;;  %2032 = vmatpush1.msra.mxu1 %v4217_v27  ;;  %v5880_v26 = vld [vmem:[#allocation39_spill] sm:$0xff]  ;;  %v5881_v27 = vld [vmem:[#allocation40_spill] sm:$0xff] }
 0x3a4   : > { %1962 = vmatprep.subr.mxu0 %v4220_v28  ;;  %2033 = vmatprep.subr.mxu1 %v4223_v29  ;;  %v5882_v28 = vld [vmem:[#allocation41_spill] sm:$0xff]  ;;  %v5883_v29 = vld [vmem:[#allocation42_spill] sm:$0xff] }
 0x3a5   : > { %1963 = vmatpush1.msra.mxu0 %v4226_v30  ;;  %2034 = vmatpush1.msra.mxu1 %v4229_v31  ;;  %v5884_v30 = vld [vmem:[#allocation43_spill] sm:$0xff]  ;;  %v5885_v31 = vld [vmem:[#allocation44_spill] sm:$0xff] }
 0x3a6   : > { %1964 = vmatprep.subr.mxu0 %v4232_v32  ;;  %2035 = vmatprep.subr.mxu1 %v4235_v33  ;;  %v5886_v32 = vld [vmem:[#allocation45_spill] sm:$0xff]  ;;  %v5887_v33 = vld [vmem:[#allocation46_spill] sm:$0xff] }
 0x3a7   : > { %1965 = vmatpush1.msra.mxu0 %v4238_v34  ;;  %2036 = vmatpush1.msra.mxu1 %v4241_v35  ;;  %v5888_v34 = vld [vmem:[#allocation47_spill] sm:$0xff]  ;;  %v5889_v35 = vld [vmem:[#allocation48_spill] sm:$0xff] }
 0x3a8   : > { %1966 = vmatprep.subr.mxu0 %v4244_v37  ;;  %2037 = vmatprep.subr.mxu1 %v4247_v38  ;;  %v5890_v37 = vld [vmem:[#allocation49_spill] sm:$0xff]  ;;  %v5891_v38 = vld [vmem:[#allocation50_spill] sm:$0xff] }
 0x3a9   : > { %1967 = vmatpush1.msra.mxu0 %v4250_v39  ;;  %2038 = vmatpush1.msra.mxu1 %v4253_v40  ;;  %v5892_v39 = vld [vmem:[#allocation51_spill] sm:$0xff]  ;;  %v5893_v40 = vld [vmem:[#allocation52_spill] sm:$0xff] }
 0x3aa   : > { %1968 = vmatprep.subr.mxu0 %v4256_v41  ;;  %2039 = vmatprep.subr.mxu1 %v4259_v42  ;;  %v5894_v41 = vld [vmem:[#allocation53_spill] sm:$0xff]  ;;  %v5895_v42 = vld [vmem:[#allocation54_spill] sm:$0xff] }
 0x3ab   : > { %1969 = vmatpush1.msra.mxu0 %v4262_v43  ;;  %2040 = vmatpush1.msra.mxu1 %v4265_v44  ;;  %v5896_v43 = vld [vmem:[#allocation55_spill] sm:$0xff]  ;;  %v5897_v44 = vld [vmem:[#allocation56_spill] sm:$0xff] }
 0x3ac   : > { %1970 = vmatprep.subr.mxu0 %v4268_v46  ;;  %2041 = vmatprep.subr.mxu1 %v4271_v47  ;;  %v5898_v46 = vld [vmem:[#allocation57_spill] sm:$0xff]  ;;  %v5899_v47 = vld [vmem:[#allocation58_spill] sm:$0xff] }
 0x3ad   : > { %1971 = vmatpush1.msra.mxu0 %v4274_v48  ;;  %2042 = vmatpush1.msra.mxu1 %v5859_v10  ;;  %v5900_v48 = vld [vmem:[#allocation59_spill] sm:$0xff] }
 0x3ae   : > { %1972 = vmatprep.subr.mxu0 %v5860_v9  ;;  %2043 = vmatprep.subr.mxu1 %v5861_v56  ;;  %v5920_v10 = vld [vmem:[#allocation79_spill] sm:$0xff]  ;;  %v5921_v9 = vld [vmem:[#allocation80_spill] sm:$0xff]  ;;  %v5922_v56 = vld [vmem:[#allocation81_spill] sm:$0xff] }
 0x3af   : > { %1973 = vmatpush1.msra.mxu0 %v5862_v7  ;;  %2044 = vmatpush1.msra.mxu1 %v5863_v6  ;;  %v5923_v7 = vld [vmem:[#allocation82_spill] sm:$0xff]  ;;  %v5924_v6 = vld [vmem:[#allocation83_spill] sm:$0xff] }
 0x3b0   : > { %1974 = vmatprep.subr.mxu0 %v5864_v3  ;;  %2045 = vmatprep.subr.mxu1 %v5865_v12  ;;  %v5925_v3 = vld [vmem:[#allocation84_spill] sm:$0xff]  ;;  %v5926_v12 = vld [vmem:[#allocation85_spill] sm:$0xff] }
 0x3b1   : > { %1975 = vmatpush1.msra.mxu0 %v5866_v1  ;;  %2046 = vmatpush1.msra.mxu1 %v5867_v5  ;;  %v5927_v1 = vld [vmem:[#allocation86_spill] sm:$0xff]  ;;  %v5928_v5 = vld [vmem:[#allocation87_spill] sm:$0xff] }
 0x3b2   : > { %1976 = vmatprep.subr.mxu0 %v5868_v21  ;;  %2047 = vmatprep.subr.mxu1 %v5869_v62  ;;  %v5929_v21 = vld [vmem:[#allocation88_spill] sm:$0xff]  ;;  %v5930_v62 = vld [vmem:[#allocation89_spill] sm:$0xff] }
 0x3b3   : > { %1977 = vmatpush1.msra.mxu0 %v5870_v18  ;;  %2048 = vmatpush1.msra.mxu1 %v5871_v15  ;;  %v5931_v18 = vld [vmem:[#allocation90_spill] sm:$0xff]  ;;  %v5932_v15 = vld [vmem:[#allocation91_spill] sm:$0xff] }
 0x3b4   : > { %1978 = vmatprep.subr.mxu0 %v5872_v16  ;;  %2049 = vmatprep.subr.mxu1 %v5873_v20  ;;  %v5933_v16 = vld [vmem:[#allocation92_spill] sm:$0xff]  ;;  %v5934_v20 = vld [vmem:[#allocation93_spill] sm:$0xff] }
 0x3b5   : > { %1979 = vmatpush1.msra.mxu0 %v5874_v8  ;;  %2050 = vmatpush1.msra.mxu1 %v5875_v19  ;;  %v5935_v8 = vld [vmem:[#allocation94_spill] sm:$0xff]  ;;  %v5936_v19 = vld [vmem:[#allocation95_spill] sm:$0xff] }
 0x3b6   : > { %1980 = vmatprep.subr.mxu0 %v5876_v22  ;;  %2051 = vmatprep.subr.mxu1 %v5877_v23  ;;  %v5937_v22 = vld [vmem:[#allocation96_spill] sm:$0xff]  ;;  %v5938_v23 = vld [vmem:[#allocation97_spill] sm:$0xff] }
 0x3b7   : > { %1981 = vmatpush1.msra.mxu0 %v5878_v24  ;;  %2014 = vmatprep.mubr.f32.mxu0 %v5879_v25  ;;  %v5939_v24 = vld [vmem:[#allocation98_spill] sm:$0xff] }
 0x3b8   : > { %2052 = vmatpush1.msra.mxu1 %v5880_v26  ;;  %2085 = vmatprep.mubr.f32.mxu1 %v5879_v25  ;;  %v5940_v25 = vld [vmem:[#allocation99_spill] sm:$0xff]  ;;  %v5941_v26 = vld [vmem:[#allocation100_spill] sm:$0xff] }
 0x3b9   : > { %2015 = vmatmul.mubr.f32.vlgmr.msra.gmra.mxu0 %v4752_v50  ;;  %2086 = vmatmul.mubr.f32.vlgmr.msra.gmra.mxu1 %v4752_v50  ;;  %v5919_v50 = vld [vmem:[#allocation78_spill] sm:$0xff] }
 0x3ba   : > { %2120 = vmatprep.subr.mxu0 %v5881_v27  ;;  %2191 = vmatprep.subr.mxu1 %v5882_v28  ;;  %v5942_v27 = vld [vmem:[#allocation101_spill] sm:$0xff]  ;;  %v5943_v28 = vld [vmem:[#allocation102_spill] sm:$0xff] }
 0x3bb   : > { %2121 = vmatpush1.msra.mxu0 %v5883_v29  ;;  %2192 = vmatpush1.msra.mxu1 %v5884_v30  ;;  %v5944_v29 = vld [vmem:[#allocation103_spill] sm:$0xff]  ;;  %v5945_v30 = vld [vmem:[#allocation104_spill] sm:$0xff] }
 0x3bc   : > { %2122 = vmatprep.subr.mxu0 %v5885_v31  ;;  %2193 = vmatprep.subr.mxu1 %v5886_v32  ;;  %v5946_v31 = vld [vmem:[#allocation105_spill] sm:$0xff]  ;;  %v5947_v32 = vld [vmem:[#allocation106_spill] sm:$0xff] }
 0x3bd   : > { %2123 = vmatpush1.msra.mxu0 %v5887_v33  ;;  %2194 = vmatpush1.msra.mxu1 %v5888_v34  ;;  %v5948_v33 = vld [vmem:[#allocation107_spill] sm:$0xff]  ;;  %v5949_v34 = vld [vmem:[#allocation108_spill] sm:$0xff] }
 0x3be   : > { %2124 = vmatprep.subr.mxu0 %v5889_v35  ;;  %2195 = vmatprep.subr.mxu1 %v5890_v37  ;;  %v5950_v35 = vld [vmem:[#allocation109_spill] sm:$0xff]  ;;  %v5951_v37 = vld [vmem:[#allocation110_spill] sm:$0xff] }
 0x3bf   : > { %2125 = vmatpush1.msra.mxu0 %v5891_v38  ;;  %2196 = vmatpush1.msra.mxu1 %v5892_v39  ;;  %v5952_v38 = vld [vmem:[#allocation111_spill] sm:$0xff]  ;;  %v5953_v39 = vld [vmem:[#allocation112_spill] sm:$0xff] }
 0x3c0   : > { %2126 = vmatprep.subr.mxu0 %v5893_v40  ;;  %2197 = vmatprep.subr.mxu1 %v5894_v41  ;;  %v5954_v40 = vld [vmem:[#allocation113_spill] sm:$0xff]  ;;  %v5955_v41 = vld [vmem:[#allocation114_spill] sm:$0xff] }
 0x3c1   : > { %2127 = vmatpush1.msra.mxu0 %v5895_v42  ;;  %2198 = vmatpush1.msra.mxu1 %v5896_v43  ;;  %v5956_v42 = vld [vmem:[#allocation115_spill] sm:$0xff]  ;;  %v5957_v43 = vld [vmem:[#allocation116_spill] sm:$0xff] }
 0x3c2   : > { %2128 = vmatprep.subr.mxu0 %v5897_v44  ;;  %2199 = vmatprep.subr.mxu1 %v5898_v46  ;;  %v5958_v44 = vld [vmem:[#allocation117_spill] sm:$0xff]  ;;  %v5959_v46 = vld [vmem:[#allocation118_spill] sm:$0xff] }
 0x3c3   : > { %2129 = vmatpush1.msra.mxu0 %v5899_v47  ;;  %2200 = vmatpush1.msra.mxu1 %v5900_v48  ;;  %v5960_v47 = vld [vmem:[#allocation119_spill] sm:$0xff]  ;;  %v5961_v48 = vld [vmem:[#allocation120_spill] sm:$0xff] }
 0x3c4   : > { %2130 = vmatprep.subr.mxu0 %v5901_v55  ;;  %2201 = vmatprep.subr.mxu1 %v5902_v59  ;;  %v5962_v55 = vld [vmem:[#allocation121_spill] sm:$0xff]  ;;  %v5963_v59 = vld [vmem:[#allocation122_spill] sm:$0xff] }
 0x3c5   : > { %2131 = vmatpush1.msra.mxu0 %v5903_v36  ;;  %2202 = vmatpush1.msra.mxu1 %v5904_v11  ;;  %v5964_v36 = vld [vmem:[#allocation123_spill] sm:$0xff]  ;;  %v5965_v11 = vld [vmem:[#allocation124_spill] sm:$0xff] }
 0x3c6   : > { %2132 = vmatprep.subr.mxu0 %v5905_v49  ;;  %2203 = vmatprep.subr.mxu1 %v5906_v13  ;;  %v5966_v49 = vld [vmem:[#allocation125_spill] sm:$0xff]  ;;  %v5967_v13 = vld [vmem:[#allocation126_spill] sm:$0xff] }
 0x3c7   : > { %2133 = vmatpush1.msra.mxu0 %v5907_v51  ;;  %2204 = vmatpush1.msra.mxu1 %v5908_v52  ;;  %v5968_v51 = vld [vmem:[#allocation127_spill] sm:$0xff]  ;;  %v5969_v52 = vld [vmem:[#allocation128_spill] sm:$0xff] }
 0x3c8   : > { %2134 = vmatprep.subr.mxu0 %v5909_v53  ;;  %2205 = vmatprep.subr.mxu1 %v5910_v60  ;;  %v5970_v53 = vld [vmem:[#allocation129_spill] sm:$0xff]  ;;  %v5971_v60 = vld [vmem:[#allocation130_spill] sm:$0xff] }
 0x3c9   : > { %2135 = vmatpush1.msra.mxu0 %v5911_v63  ;;  %2206 = vmatpush1.msra.mxu1 %v5912_v54  ;;  %v5972_v63 = vld [vmem:[#allocation131_spill] sm:$0xff]  ;;  %v5973_v54 = vld [vmem:[#allocation132_spill] sm:$0xff] }
 0x3ca   : > { %2136 = vmatprep.subr.mxu0 %v5913_v4  ;;  %2207 = vmatprep.subr.mxu1 %v5914_v14  ;;  %v5974_v4 = vld [vmem:[#allocation133_spill] sm:$0xff]  ;;  %v5975_v14 = vld [vmem:[#allocation134_spill] sm:$0xff] }
 0x3cb   : > { %2137 = vmatpush1.msra.mxu0 %v5915_v0  ;;  %2208 = vmatpush1.msra.mxu1 %v5916_v45  ;;  %v5976_v0 = vld [vmem:[#allocation135_spill] sm:$0xff]  ;;  %v5977_v45 = vld [vmem:[#allocation136_spill] sm:$0xff] }
 0x3cc   : > { %2138 = vmatprep.subr.mxu0 %v5917_v58  ;;  %2209 = vmatprep.subr.mxu1 %v5918_v61  ;;  %v5978_v58 = vld [vmem:[#allocation137_spill] sm:$0xff]  ;;  %v5979_v61 = vld [vmem:[#allocation138_spill] sm:$0xff] }
 0x3cd   : > { %2139 = vmatpush1.msra.mxu0 %v5919_v50  ;;  %2210 = vmatpush1.msra.mxu1 %v5920_v10  ;;  %v5980_v50 = vld [vmem:[#allocation139_spill] sm:$0xff]  ;;  %v5981_v10 = vld [vmem:[#allocation140_spill] sm:$0xff] }
 0x3ce   : > { %2140 = vmatprep.subr.mxu0 %v5921_v9  ;;  %2211 = vmatprep.subr.mxu1 %v5922_v56  ;;  %v5982_v9 = vld [vmem:[#allocation141_spill] sm:$0xff]  ;;  %v5983_v56 = vld [vmem:[#allocation142_spill] sm:$0xff] }
 0x3cf   : > { %2141 = vmatpush1.msra.mxu0 %v5923_v7  ;;  %2212 = vmatpush1.msra.mxu1 %v5924_v6  ;;  %v5984_v7 = vld [vmem:[#allocation143_spill] sm:$0xff]  ;;  %v5985_v6 = vld [vmem:[#allocation144_spill] sm:$0xff] }
 0x3d0   : > { %2142 = vmatprep.subr.mxu0 %v5925_v3  ;;  %2213 = vmatprep.subr.mxu1 %v5926_v12  ;;  %v5986_v3 = vld [vmem:[#allocation145_spill] sm:$0xff]  ;;  %v5987_v12 = vld [vmem:[#allocation146_spill] sm:$0xff] }
 0x3d1   : > { %2143 = vmatpush1.msra.mxu0 %v5927_v1  ;;  %2214 = vmatpush1.msra.mxu1 %v5928_v5  ;;  %v5988_v1 = vld [vmem:[#allocation147_spill] sm:$0xff]  ;;  %v5989_v5 = vld [vmem:[#allocation148_spill] sm:$0xff] }
 0x3d2   : > { %2144 = vmatprep.subr.mxu0 %v5929_v21  ;;  %2215 = vmatprep.subr.mxu1 %v5930_v62  ;;  %v5990_v21 = vld [vmem:[#allocation149_spill] sm:$0xff]  ;;  %v5991_v62 = vld [vmem:[#allocation150_spill] sm:$0xff] }
 0x3d3   : > { %2145 = vmatpush1.msra.mxu0 %v5931_v18  ;;  %2216 = vmatpush1.msra.mxu1 %v5932_v15  ;;  %v5992_v18 = vld [vmem:[#allocation151_spill] sm:$0xff]  ;;  %v5993_v15 = vld [vmem:[#allocation152_spill] sm:$0xff] }
 0x3d4   : > { %2146 = vmatprep.subr.mxu0 %v5933_v16  ;;  %2217 = vmatprep.subr.mxu1 %v5934_v20  ;;  %v5994_v16 = vld [vmem:[#allocation153_spill] sm:$0xff]  ;;  %v5995_v20 = vld [vmem:[#allocation154_spill] sm:$0xff] }
 0x3d5   : > { %2147 = vmatpush1.msra.mxu0 %v5935_v8  ;;  %2218 = vmatpush1.msra.mxu1 %v5936_v19  ;;  %v5996_v8 = vld [vmem:[#allocation155_spill] sm:$0xff]  ;;  %v5997_v19 = vld [vmem:[#allocation156_spill] sm:$0xff] }
 0x3d6   : > { %2148 = vmatprep.subr.mxu0 %v5937_v22  ;;  %2219 = vmatprep.subr.mxu1 %v5938_v23  ;;  %v5998_v22 = vld [vmem:[#allocation157_spill] sm:$0xff]  ;;  %v5999_v23 = vld [vmem:[#allocation158_spill] sm:$0xff] }
 0x3d7   : > { %2149 = vmatpush1.msra.mxu0 %v5939_v24  ;;  %2220 = vmatpush1.msra.mxu1 %v5940_v25  ;;  %v6000_v24 = vld [vmem:[#allocation159_spill] sm:$0xff]  ;;  %v6001_v25 = vld [vmem:[#allocation160_spill] sm:$0xff] }
 0x3d8   : > { %2150 = vmatprep.subr.mxu0 %v5941_v26  ;;  %2221 = vmatprep.subr.mxu1 %v5942_v27  ;;  %v6002_v26 = vld [vmem:[#allocation161_spill] sm:$0xff]  ;;  %v6003_v27 = vld [vmem:[#allocation162_spill] sm:$0xff] }
 0x3d9   : > { %2151 = vmatpush1.msra.mxu0 %v5943_v28  ;;  %2222 = vmatpush1.msra.mxu1 %v5944_v29  ;;  %v6004_v28 = vld [vmem:[#allocation163_spill] sm:$0xff]  ;;  %v6005_v29 = vld [vmem:[#allocation164_spill] sm:$0xff] }
 0x3da   : > { %2152 = vmatprep.subr.mxu0 %v5945_v30  ;;  %2223 = vmatprep.subr.mxu1 %v5946_v31  ;;  %v6006_v30 = vld [vmem:[#allocation165_spill] sm:$0xff]  ;;  %v6007_v31 = vld [vmem:[#allocation166_spill] sm:$0xff] }
 0x3db   : > { %2153 = vmatpush2.msra.mxu0 %v5947_v32  ;;  %2224 = vmatpush2.msra.mxu1 %v5948_v33  ;;  %v6008_v32 = vld [vmem:[#allocation168_spill] sm:$0xff]  ;;  %v2287_v33 = vstv %s2286_s25 }
 0x3dc   : > { %2154 = vmatprep.subr.mxu0 %v5949_v34  ;;  %2225 = vmatprep.subr.mxu1 %v5950_v35  ;;  %v6009_v34 = vld [vmem:[#allocation167_spill] sm:$0xff]  ;;  %v6010_v35 = vmov 0  }
 0x3dd   : > { %2155 = vmatpush2.msra.mxu0 %v5951_v37  ;;  %2226 = vmatpush2.msra.mxu1 %v5952_v38  ;;  %vm2288_vm6 = vcmp.eq.s32.totalorder %v6009_v34, %v2287_v33 }
 0x3de   : > { %2156 = vmatprep.subr.mxu0 %v5953_v39  ;;  %2227 = vmatprep.subr.mxu1 %v5954_v40  ;;  %v2289_v37 = vsel %vm2288_vm6, 1, %v6010_v35  ;;  %v6011_v39 = vld [vmem:[#allocation15_spill] sm:$0xff] }
 0x3df   : > { %2157 = vmatpush2.msra.mxu0 %v5955_v41  ;;  %2228 = vmatpush2.msra.mxu1 %v5956_v42 }
 0x3e0   : > { %2158 = vmatprep.subr.mxu0 %v5957_v43  ;;  %2229 = vmatprep.subr.mxu1 %v5958_v44  ;;  %v6012_v43 = vld [vmem:[#allocation16_spill] sm:$0xff] }
 0x3e1   : > { %2159 = vmatpush2.msra.mxu0 %v5959_v46  ;;  %2230 = vmatpush2.msra.mxu1 %v5960_v47 }
 0x3e2   : > { %2160 = vmatprep.subr.mxu0 %v5961_v48  ;;  %2231 = vmatprep.subr.mxu1 %v5962_v55  ;;  %v6013_v55 = vld [vmem:[#allocation17_spill] sm:$0xff] }
 0x3e3   : > { %2161 = vmatpush2.msra.mxu0 %v5963_v59  ;;  %2232 = vmatpush2.msra.mxu1 %v5964_v36 }
 0x3e4   : > { %2162 = vmatprep.subr.mxu0 %v5965_v11  ;;  %2233 = vmatprep.subr.mxu1 %v5966_v49  ;;  %v6014_v49 = vld [vmem:[#allocation18_spill] sm:$0xff] }
 0x3e5   : > { %2163 = vmatpush2.msra.mxu0 %v5967_v13  ;;  %2234 = vmatpush2.msra.mxu1 %v5968_v51 }
 0x3e6   : > { %2164 = vmatprep.subr.mxu0 %v5969_v52  ;;  %2235 = vmatprep.subr.mxu1 %v5970_v53 }
 0x3e7   : > { %2165 = vmatpush2.msra.mxu0 %v5971_v60  ;;  %2236 = vmatpush2.msra.mxu1 %v5972_v63 }
 0x3e8   : > { %2166 = vmatprep.subr.mxu0 %v5973_v54  ;;  %2237 = vmatprep.subr.mxu1 %v5974_v4  ;;  %v6015_v4 = vld [vmem:[#allocation176_spill] sm:$0xff] }
 0x3e9   : > { %2167 = vmatpush2.msra.mxu0 %v5975_v14  ;;  %2238 = vmatpush2.msra.mxu1 %v5976_v0 }
 0x3ea   : > { %2168 = vmatprep.subr.mxu0 %v5977_v45  ;;  %2239 = vmatprep.subr.mxu1 %v5978_v58 }
 0x3eb   : > { %2169 = vmatpush2.msra.mxu0 %v5979_v61  ;;  %2240 = vmatpush2.msra.mxu1 %v5980_v50  ;;  %v6016_v50 = vld [vmem:[#allocation178_spill] sm:$0xff] }
 0x3ec   : > { %2170 = vmatprep.subr.mxu0 %v5981_v10  ;;  %2241 = vmatprep.subr.mxu1 %v5982_v9 }
 0x3ed   : > { %2171 = vmatpush2.msra.mxu0 %v5983_v56  ;;  %2242 = vmatpush2.msra.mxu1 %v5984_v7 }
 0x3ee   : > { %2172 = vmatprep.subr.mxu0 %v5985_v6  ;;  %2243 = vmatprep.subr.mxu1 %v5986_v3 }
 0x3ef   : > { %2173 = vmatpush2.msra.mxu0 %v5987_v12  ;;  %2244 = vmatpush2.msra.mxu1 %v5988_v1 }
 0x3f0   : > { %2174 = vmatprep.subr.mxu0 %v5989_v5  ;;  %2245 = vmatprep.subr.mxu1 %v5990_v21  ;;  %v6017_v5 = vld [vmem:[#allocation180_spill] sm:$0xff] }
 0x3f1   : > { %2175 = vmatpush2.msra.mxu0 %v5991_v62  ;;  %2246 = vmatpush2.msra.mxu1 %v5992_v18  ;;  %v6018_v62 = vld [vmem:[#allocation179_spill] sm:$0xff] }
 0x3f2   : > { %2176 = vmatprep.subr.mxu0 %v5993_v15  ;;  %2247 = vmatprep.subr.mxu1 %v5994_v16 }
 0x3f3   : > { %2177 = vmatpush2.msra.mxu0 %v5995_v20  ;;  %2248 = vmatpush2.msra.mxu1 %v5996_v8 }
 0x3f4   : > { %2178 = vmatprep.subr.mxu0 %v5997_v19  ;;  %2249 = vmatprep.subr.mxu1 %v5998_v22 }
 0x3f5   : > { %2179 = vmatpush2.msra.mxu0 %v5999_v23  ;;  %2250 = vmatpush2.msra.mxu1 %v6000_v24 }
 0x3f6   : > { %2180 = vmatprep.subr.mxu0 %v6001_v25  ;;  %2251 = vmatprep.subr.mxu1 %v6002_v26 }
 0x3f7   : > { %2181 = vmatpush2.msra.mxu0 %v6003_v27  ;;  %2252 = vmatpush2.msra.mxu1 %v6004_v28 }
 0x3f8   : > { %2182 = vmatprep.subr.mxu0 %v6005_v29  ;;  %2253 = vmatprep.subr.mxu1 %v6006_v30 }
 0x3f9   : > { %2183 = vmatpush2.msra.mxu0 %v6007_v31  ;;  %2254 = vmatpush2.msra.mxu1 %v6008_v32 }
 0x3fa   : > { %2291 = vperm.xlu1 %2660, %v2289_v37  }
 0x458   : > { %v1834_v38 = vpop.f32.mrf.mxu0  ;;  %v1905_v46 = vpop.f32.mrf.mxu1 }
 0x459   : > { %v1835_v40 = vadd.f32 %v1834_v38, %v6011_v39  ;;  %v1906_v13 = vadd.f32 %v1905_v46, %v6014_v49 }
 0x45a   : > { %v1836_v41 = vpop.f32.mrf.mxu0  ;;  %v1907_v48 = vpop.f32.mrf.mxu1 }
 0x45b   : > { %v2541_v42 = vmul.f32 -1.442695, %v1835_v40  ;;  %v1837_v44 = vadd.f32 %v1836_v41, %v6012_v43  ;;  %v1908_v59 = vadd.f32 %v1907_v48, %v6013_v55 }
 0x45d   : > { %2741 = vpow2.f32 %v2541_v42  ;;  %v2542_v47 = vmul.f32 -1.442695, %v1837_v44  ;;  %v2543_v36 = vmul.f32 -1.442695, %v1908_v59 }
 0x45f   : > { %2743 = vpow2.f32 %v2542_v47 }
 0x460   : > { %2745 = vpow2.f32 %v2543_v36 }
 0x46a   : > { %v2742_v11 = vpop.eup %2741 }
 0x46b   : > { %v1913_v51 = vadd.f32 1.0, %v2742_v11 }
 0x46c   : > { %v2744_v52 = vpop.eup %2743 }
 0x46d   : > { %2747 = vrcp.f32 %v1913_v51  ;;  %v1919_v53 = vadd.f32 1.0, %v2744_v52  ;;  %v2746_v60 = vpop.eup %2745 }
 0x46e   : > { %2749 = vtanh.f32 %v1906_v13  ;;  %v1926_v7 = vadd.f32 1.0, %v2746_v60 }
 0x46f   : > { %2751 = vrcp.f32 %v1919_v53 }
 0x479   : > { %v2016_v63 = vpop.f32.mrf.mxu0  ;;  %v2087_v6 = vpop.f32.mrf.mxu1 }
 0x47a   : > { %v2748_v54 = vpop.eup %2747  ;;  %v2092_v14 = vadd.f32 %v2016_v63, %v6015_v4  ;;  %v2094_v18 = vadd.f32 %v2087_v6, %v6018_v62 }
 0x47b   : > { %v2750_v0 = vpop.eup %2749  ;;  %v2018_v45 = vpop.f32.mrf.mxu0 }
 0x47c   : > { %v2752_v58 = vpop.eup %2751  ;;  %v2544_v61 = vmul.f32 -1.442695, %v2092_v14  ;;  %v2093_v10 = vadd.f32 %v2018_v45, %v6016_v50  ;;  %v1930_v9 = vmul.f32 %v2750_v0, %v2748_v54  ;;  %v2089_v1 = vpop.f32.mrf.mxu1 }
 0x47d   : > { %v1929_v56 = vmul.f32 %v2752_v58, %v4740_v57  ;;  %v2095_v21 = vadd.f32 %v2089_v1, %v6017_v5  ;;  %v1940_v57 = vpop.permute.xlu1 %1939 }
 0x47e   : > { %2753 = vpow2.f32 %v2544_v61  ;;  %v2545_v3 = vmul.f32 -1.442695, %v2093_v10  ;;  %vm1941_vm7 = vcmp.eq.s32.totalorder %v1940_v57, 1 }
 0x47f   : > { %v4960_v12 = vadd.f32 %v1930_v9, %v1929_v56  ;;  %v2546_v15 = vmul.f32 -1.442695, %v2095_v21 }
 0x480   : > { %2755 = vpow2.f32 %v2545_v3 }
 0x481   : > { %2757 = vrcp.f32 %v1926_v7  ;;  %v2292_v4 = vpop.permute.xlu1 %2291 }
 0x482   : > { %2759 = vtanh.f32 %v4960_v12  ;;  %vm2293_vm8 = vcmp.eq.s32.totalorder %v2292_v4, 1 }
 0x483   : > { %2761 = vtanh.f32 %v2094_v18 }
 0x484   : > { %2763 = vpow2.f32 %v2546_v15 }
 0x48b   : > { %v2754_v16 = vpop.eup %2753 }
 0x48c   : > { %v2099_v20 = vadd.f32 1.0, %v2754_v16 }
 0x48d   : > { %v2756_v8 = vpop.eup %2755 }
 0x48e   : > { %v2758_v19 = vpop.eup %2757  ;;  %2765 = vrcp.f32 %v2099_v20  ;;  %v2105_v22 = vadd.f32 1.0, %v2756_v8 }
 0x48f   : > { %v2760_v23 = vpop.eup %2759 }
 0x490   : > { %2767 = vrcp.f32 %v2105_v22  ;;  %v1933_v24 = vmul.f32 %v2760_v23, %v2758_v19  ;;  %v2762_v26 = vpop.eup %2761 }
 0x491   : > { %v2764_v27 = vpop.eup %2763 }
 0x492   : > { %v1942_v25 = vsel %vm1941_vm7, %v1933_v24, %v4746_v2  ;;  %2184 = vmatprep.mubr.f32.mxu0 %v1933_v24  ;;  %2255 = vmatprep.mubr.f32.mxu1 %v1933_v24  ;;  %v2112_v31 = vadd.f32 1.0, %v2764_v27 }
 0x494   : > { %2769 = vrcp.f32 %v2112_v31 }
 0x49b   : > { %v2766_v28 = vpop.eup %2765 }
 0x49c   : > { %v2116_v29 = vmul.f32 %v2766_v28, %v2762_v26 }
 0x49d   : > { %v2768_v30 = vpop.eup %2767 }
 0x49e   : > { %v2115_v32 = vmul.f32 %v2768_v30, %v4749_v17 }
 0x4a0   : > { %v2117_v33 = vadd.f32 %v2116_v29, %v2115_v32 }
 0x4a1   : > { %v2770_v34 = vpop.eup %2769 }
 0x4a2   : > { %2296 = vst [vmem:[#allocation4] sm:$0xff] %v2117_v33  ;;  %2771 = vtanh.f32 %v2117_v33 }
 0x4af   : > { %v2772_v35 = vpop.eup %2771 }
 0x4b0   : > { %v2119_v37 = vmul.f32 %v2772_v35, %v2770_v34 }
 0x4b2   : > { %2185 = vmatmul.mubr.f32.vlgmr.msra.gmra.mxu0 %v2119_v37  ;;  %2295 = vst [vmem:[#allocation3] sm:$0xff] %v2119_v37  ;;  %2256 = vmatmul.mubr.f32.vlgmr.msra.gmra.mxu1 %v2119_v37 }
 0x572   : > { %v2186_v2 = vpop.f32.mrf.mxu0  ;;  %v2257_v44 = vpop.f32.mrf.mxu1 }
 0x573   : > { %v2187_v38 = vadd.f32 %v2186_v2, %v6011_v39  ;;  %v2258_v36 = vadd.f32 %v2257_v44, %v6014_v49 }
 0x574   : > { %v2188_v40 = vpop.f32.mrf.mxu0  ;;  %v2259_v46 = vpop.f32.mrf.mxu1 }
 0x575   : > { %v2547_v41 = vmul.f32 -1.442695, %v2187_v38  ;;  %v2189_v42 = vadd.f32 %v2188_v40, %v6012_v43  ;;  %v2260_v47 = vadd.f32 %v2259_v46, %v6013_v55 }
 0x577   : > { %2773 = vpow2.f32 %v2547_v41  ;;  %v2548_v17 = vmul.f32 -1.442695, %v2189_v42  ;;  %v2549_v48 = vmul.f32 -1.442695, %v2260_v47 }
 0x579   : > { %2775 = vpow2.f32 %v2548_v17 }
 0x57a   : > { %2777 = vpow2.f32 %v2549_v48 }
 0x584   : > { %v2774_v59 = vpop.eup %2773 }
 0x585   : > { %v2265_v11 = vadd.f32 1.0, %v2774_v59 }
 0x586   : > { %v2776_v13 = vpop.eup %2775 }
 0x587   : > { %2779 = vrcp.f32 %v2265_v11  ;;  %v2271_v39 = vadd.f32 1.0, %v2776_v13  ;;  %v2778_v51 = vpop.eup %2777 }
 0x588   : > { %2781 = vtanh.f32 %v2258_v36  ;;  %v2278_v60 = vadd.f32 1.0, %v2778_v51 }
 0x589   : > { %2783 = vrcp.f32 %v2271_v39 }
 0x58a   : > { %2785 = vrcp.f32 %v2278_v60 }
 0x594   : > { %v2780_v43 = vpop.eup %2779 }
 0x595   : > { %v2782_v52 = vpop.eup %2781 }
 0x596   : > { %v2784_v53 = vpop.eup %2783  ;;  %v2282_v63 = vmul.f32 %v2782_v52, %v2780_v43 }
 0x597   : > { %v2281_v54 = vmul.f32 %v2784_v53, %v4960_v12  ;;  %v2786_v49 = vpop.eup %2785 }
 0x599   : > { %v2283_v55 = vadd.f32 %v2282_v63, %v2281_v54 }
 0x59b   : > { %2298 = vst [vmem:[#allocation6] sm:$0xff] %v2283_v55  ;;  %2787 = vtanh.f32 %v2283_v55 }
 0x5a8   : > { %v2788_v14 = vpop.eup %2787  ;;  %2303 = sbr.rel (%p2550_p4) target bundleno = 1682 (0x692), region = 72 }
 0x5a9   : > { %v2285_v0 = vmul.f32 %v2788_v14, %v2786_v49 }
 0x5ab   : > { %v2294_v45 = vsel %vm2293_vm8, %v2285_v0, %v1942_v25  ;;  %2297 = vst [vmem:[#allocation5] sm:$0xff] %v2285_v0 }
 0x5ac   : > { %2299 = vst [vmem:[#allocation7] sm:$0xff] %v2294_v45 }
 0x5ad   : > { %v2319_v58 = vld [vmem:[%s5040_s7 + $0x78] sm:$0xff]  ;;  %v3072_v61 = vmov 0.0   ;;  %v2318_v50 = vld [vmem:[%s5040_s7 + $0x70] sm:$0xff]  ;;  %vm3073_vm9 = vmmov 0   ;;  %v2317_v10 = vld [vmem:[%s5040_s7 + $0x68] sm:$0xff]  ;;  %vm2397_vm10 = vcmask 7168  }
 0x5ae   : > { %2572 = vmatprep.subr.mxu0 %v3072_v61  ;;  %2604 = vmatprep.mubr.msk.f32.mxu0 %vm3073_vm9, %v3072_v61  ;;  %v2316_v9 = vld [vmem:[%s5040_s7 + $0x60] sm:$0xff]  ;;  %v2315_v56 = vld [vmem:[%s5040_s7 + $0x58] sm:$0xff]  ;;  %v2314_v7 = vld [vmem:[%s5040_s7 + $0x50] sm:$0xff] }
 0x5af   : > { %2573 = vmatpush3.msra.mxu0 %v2319_v58  ;;  %v2313_v6 = vld [vmem:[%s5040_s7 + $0x48] sm:$0xff]  ;;  %v2312_v3 = vld [vmem:[%s5040_s7 + $0x40] sm:$0xff]  ;;  %v2311_v12 = vld [vmem:[%s5040_s7 + $0x38] sm:$0xff] }
 0x5b0   : > { %2574 = vmatprep.subr.mxu0 %v3072_v61  ;;  %v2310_v1 = vld [vmem:[%s5040_s7 + $0x30] sm:$0xff]  ;;  %v2309_v5 = vld [vmem:[%s5040_s7 + $0x28] sm:$0xff]  ;;  %v2308_v21 = vld [vmem:[%s5040_s7 + $0x20] sm:$0xff] }
 0x5b1   : > { %2575 = vmatpush3.msra.mxu0 %v2318_v50  ;;  %v2307_v62 = vld [vmem:[%s5040_s7 + $0x18] sm:$0xff]  ;;  %v2306_v18 = vld [vmem:[%s5040_s7 + $0x10] sm:$0xff]  ;;  %v2305_v15 = vld [vmem:[%s5040_s7 + $0x8] sm:$0xff] }
 0x5b2   : > { %2576 = vmatprep.subr.mxu0 %v3072_v61  ;;  %v2304_v16 = vld [vmem:[%s5040_s7] sm:$0xff]  ;;  %v2551_v20 = vld [vmem:[#allocation8] ss:$0 sm:$0xff] }
 0x5b3   : > { %2577 = vmatpush3.msra.mxu0 %v2317_v10 }
 0x5b4   : > { %2578 = vmatprep.subr.mxu0 %v3072_v61 }
 0x5b5   : > { %2579 = vmatpush3.msra.mxu0 %v2316_v9 }
 0x5b6   : > { %2580 = vmatprep.subr.mxu0 %v3072_v61 }
 0x5b7   : > { %2581 = vmatpush3.msra.mxu0 %v2315_v56 }
 0x5b8   : > { %2582 = vmatprep.subr.mxu0 %v3072_v61 }
 0x5b9   : > { %2583 = vmatpush3.msra.mxu0 %v2314_v7 }
 0x5ba   : > { %2584 = vmatprep.subr.mxu0 %v3072_v61 }
 0x5bb   : > { %2585 = vmatpush3.msra.mxu0 %v2313_v6 }
 0x5bc   : > { %2586 = vmatprep.subr.mxu0 %v3072_v61 }
 0x5bd   : > { %2587 = vmatpush3.msra.mxu0 %v2312_v3 }
 0x5be   : > { %2588 = vmatprep.subr.mxu0 %v3072_v61 }
 0x5bf   : > { %2589 = vmatpush3.msra.mxu0 %v2311_v12 }
 0x5c0   : > { %2590 = vmatprep.subr.mxu0 %v3072_v61 }
 0x5c1   : > { %2591 = vmatpush3.msra.mxu0 %v2310_v1 }
 0x5c2   : > { %2592 = vmatprep.subr.mxu0 %v3072_v61 }
 0x5c3   : > { %2593 = vmatpush3.msra.mxu0 %v2309_v5 }
 0x5c4   : > { %2594 = vmatprep.subr.mxu0 %v3072_v61 }
 0x5c5   : > { %2595 = vmatpush3.msra.mxu0 %v2308_v21 }
 0x5c6   : > { %2596 = vmatprep.subr.mxu0 %v3072_v61 }
 0x5c7   : > { %2597 = vmatpush3.msra.mxu0 %v2307_v62 }
 0x5c8   : > { %2598 = vmatprep.subr.mxu0 %v3072_v61 }
 0x5c9   : > { %2599 = vmatpush3.msra.mxu0 %v2306_v18 }
 0x5ca   : > { %2600 = vmatprep.subr.mxu0 %v3072_v61 }
 0x5cb   : > { %2601 = vmatpush3.msra.mxu0 %v2305_v15 }
 0x5cc   : > { %2602 = vmatprep.subr.mxu0 %v3072_v61 }
 0x5cd   : > { %2603 = vmatpush3.msra.mxu0 %v2304_v16 }
 0x5ce   : > { %2605 = vmatmul.mubr.f32.vlgmr.msra.gmra.mxu0 %v2294_v45 }
 0x68e   : > { %v2393_v57 = vpop.f32.mrf.mxu0 }
 0x68f   : > { %v2394_v8 = vadd.f32 %v2551_v20, %v2393_v57 }
 0x690   : > { %v2606_v19 = vpop.f32.mrf.mxu0 }
 0x691   : > { %2398 = vst.msk [vmem:[%s5042_s9] sm:$0xff] %vm2397_vm10, %v2394_v8 }
 0x692 PF: > { %s23_s13 = sadd.s32 1, %s3063_s13   ;;  %s6019_s11 = smov %s3059_s12 }
 0x693   : > { %p20_p7 = scmp.ge.s32.totalorder %s23_s13, 4   ;;  %s6020_s12 = smov %s6022_s14 }
 0x695   :  { %22 = sbr.rel (!%p20_p7) target bundleno = 6 (0x6), region = 110 }
 0x69a   :  { %2418 = vsyncpa [#allocation10], 1 }
 0x69b   :  { %2420 = vsyncpa [#allocation10 + $0x1], 1 }
 0x69c   :  { %2421 = vsyncpa [#allocation12], 1 }

</bundles_post_ra>
